<compile_context>
chip_gen: v7x
topology: tpu7x:2x2x1
jax: 0.10.0
libtpu: 0.0.40
codegen_flags: <defaults>
</compile_context>

<pallas_src>
import functools

import jax
import jax.numpy as jnp
from jax.experimental import pallas as pl
from jax.experimental.pallas import tpu as pltpu

C_IN = 512      # channel dim (matches Linear(512, 32))
C_HID = 32      # bottleneck dim
BN_EPS = 1e-5
LANE = 128

_TARGET_BLOCK_BYTES = 2 * 1024 * 1024     # amortize ~0.35us per grid step
_MAX_X_BUF_BYTES = 16 * 1024 * 1024       # cap per pipeline buffer of x


def channel_attention_kernel(x_ref, w1_ref, b1_ref, w2_ref, b2_ref,
                             out_ref, acc_ref, *, inv_hw, hw, tile_hw, chunked):
    """Grid: (num_batch_blocks, num_hw_tiles); HW is the reduction axis.

    x_ref   : (n_blk, C, tile_hw) tile of the NCHW activation (HW flattened)
    acc_ref : (n_blk, C, 128) [chunked] or (n_blk, C) f32 VMEM accumulator
    out_ref : (n_blk, 1, C) f32, written once in the finalize step
    """
    hw_step = pl.program_id(1)

    @pl.when(hw_step == 0)
    def _init():
        acc_ref[...] = jnp.zeros_like(acc_ref)

    x = x_ref[...]  # (n_blk, C, tile_hw)

    if chunked:
        # Lane-aligned partial sums on the VPU; the cross-lane (XLU) reduce is
        # deferred to the finalize step.
        needs_mask = (hw % tile_hw) != 0
        num_chunks = tile_hw // LANE
        base = hw_step * tile_hw  # only used when needs_mask

        def chunk(j):
            c = x[:, :, j * LANE:(j + 1) * LANE].astype(jnp.float32)
            if needs_mask:
                lane_idx = jax.lax.broadcasted_iota(jnp.int32, (1, 1, LANE), 2)
                c = jnp.where(lane_idx + (base + j * LANE) < hw, c, 0.0)
            return c

        partial = chunk(0)
        for j in range(1, num_chunks):
            partial = partial + chunk(j)
        acc_ref[...] += partial
    else:
        # Fallback (whole HW in one tile, HW not a 128-multiple): single step.
        acc_ref[...] += jnp.sum(x.astype(jnp.float32), axis=-1)

    @pl.when(hw_step == pl.num_programs(1) - 1)
    def _finalize():
        if chunked:
            gap = jnp.sum(acc_ref[...], axis=-1) * inv_hw      # (n_blk, C)
        else:
            gap = acc_ref[...] * inv_hw
        # Linear(512 -> 32) with inference-mode BatchNorm1d folded in.
        h = jnp.dot(gap, w1_ref[...], preferred_element_type=jnp.float32)
        h = jnp.maximum(h + b1_ref[...], 0.0)                  # ReLU
        # Linear(32 -> 512)
        y = jnp.dot(h, w2_ref[...], preferred_element_type=jnp.float32)
        y = jax.nn.sigmoid(y + b2_ref[...])
        out = (gap * y).astype(out_ref.dtype)                  # (n_blk, C)
        out_ref[...] = out.reshape(out_ref.shape)              # (n_blk, 1, C)


def _vmem_capacity_bytes():
    try:
        cap = getattr(pltpu.get_tpu_info(), "vmem_capacity_bytes", None)
        if cap:
            return int(cap)
    except Exception:
        pass
    return 64 * 1024 * 1024   # conservative: v7x per-TensorCore VMEM


def _plan_tiling(n, c, hw, itemsize):
    """Pick (n_tile, tile_hw, num_n, num_hw, vmem_limit_bytes)."""
    vmem_cap = _vmem_capacity_bytes()
    vmem_limit = min((vmem_cap * 3) // 4, 96 * 1024 * 1024)
    x_buf_budget = min((vmem_limit - 4 * 1024 * 1024) // 2, _MAX_X_BUF_BYTES)

    row_bytes = c * hw * itemsize
    if n == 1 or row_bytes >= _TARGET_BLOCK_BYTES:
        # One batch row per block: the "parallel" axis has length N (v7x dual
        # TC sharding); blocks are >= ~2 MiB so step overhead stays small.
        n_tile = 1
        tile_hw_max = max(LANE, (x_buf_budget // (c * itemsize)) // LANE * LANE)
        if hw <= tile_hw_max:
            tile_hw = hw                       # whole HW: one contiguous DMA
        else:
            tile_hw = tile_hw_max
            # Prefer a 128-multiple divisor of HW (avoids masking) when it is
            # not much smaller than the budget-derived tile.
            for cand in range(tile_hw_max, tile_hw_max // 2 - 1, -LANE):
                if cand > 0 and hw % cand == 0:
                    tile_hw = cand
                    break
    else:
        # Small per-row slabs: group rows so each DMA block is >= ~2 MiB.
        n_tile = -(-_TARGET_BLOCK_BYTES // row_bytes)                # ceil
        n_tile = min(n_tile, n, max(1, x_buf_budget // row_bytes))
        if n_tile < n:
            n_tile = ((n_tile + 7) // 8) * 8                         # sublane-friendly
        n_tile = min(n_tile, n)
        tile_hw = hw
    num_n = -(-n // n_tile)
    num_hw = -(-hw // tile_hw)
    return n_tile, tile_hw, num_n, num_hw, vmem_limit


def channel_attention(x_nchw, params):
    """x_nchw: (N, 512, H, W) float. Returns (N, 512) float32."""
    n, c, h, w = x_nchw.shape
    assert c == C_IN, f"ChannelAttention expects {C_IN} channels, got {c}"
    hw = h * w
    # Free view of contiguous NCHW -> (N, C, H*W); no HBM transpose pass.
    x = x_nchw.reshape(n, c, hw)
    itemsize = jnp.dtype(x.dtype).itemsize

    # Fold BatchNorm1d (inference) into the first Linear at trace time.
    scale = params["gamma"] * jax.lax.rsqrt(params["running_var"] + BN_EPS)      # (1, 32)
    w1f = (params["w1"] * scale).astype(jnp.float32)                             # (512, 32)
    b1f = ((params["b1"] - params["running_mean"]) * scale
           + params["beta"]).astype(jnp.float32)                                 # (1, 32)
    w2 = params["w2"].astype(jnp.float32)                                        # (32, 512)
    b2 = params["b2"].astype(jnp.float32)                                        # (1, 512)

    n_tile, tile_hw, num_n, num_hw, vmem_limit = _plan_tiling(n, c, hw, itemsize)
    chunked = (tile_hw % LANE) == 0
    assert chunked or num_hw == 1   # non-128-multiple tiles only in the 1-step case

    acc_shape = (n_tile, c, LANE) if chunked else (n_tile, c)

    grid_spec = pltpu.PrefetchScalarGridSpec(
        num_scalar_prefetch=0,
        grid=(num_n, num_hw),
        in_specs=[
            # Activation: batch-blocked, spatial (reduction) axis tiled.
            pl.BlockSpec((n_tile, c, tile_hw), lambda i, j: (i, 0, j)),
            # Small weights/biases: constant block index -> DMA'd once, resident.
            pl.BlockSpec(w1f.shape, lambda i, j: (0, 0)),
            pl.BlockSpec(b1f.shape, lambda i, j: (0, 0)),
            pl.BlockSpec(w2.shape, lambda i, j: (0, 0)),
            pl.BlockSpec(b2.shape, lambda i, j: (0, 0)),
        ],
        # Lane-dense (n_tile, 1, 512) output, resident across the HW axis and
        # written once in the finalize step.
        out_specs=pl.BlockSpec((n_tile, 1, c), lambda i, j: (i, 0, 0)),
        scratch_shapes=[pltpu.VMEM(acc_shape, jnp.float32)],
    )

    kernel = functools.partial(
        channel_attention_kernel,
        inv_hw=1.0 / float(hw), hw=hw, tile_hw=tile_hw, chunked=chunked)

    cost = pl.CostEstimate(
        flops=2 * n * c * hw + 4 * n * C_IN * C_HID + 2 * n * c,
        transcendentals=n * c,
        bytes_accessed=(n * c * hw * itemsize
                        + (w1f.size + b1f.size + w2.size + b2.size) * 4
                        + n * c * 4),
    )

    out = pl.pallas_call(
        kernel,
        out_shape=jax.ShapeDtypeStruct((n, 1, c), jnp.float32),
        grid_spec=grid_spec,
        compiler_params=pltpu.CompilerParams(
            dimension_semantics=("parallel", "arbitrary"),
            vmem_limit_bytes=vmem_limit,
        ),
        cost_estimate=cost,
    )(x, w1f, b1f, w2, b2)
    return out.reshape(n, c)


def init_params(key):
    """Deterministic synthetic parameters (PyTorch Linear weights are (out,in);
    stored pre-transposed here for x @ W)."""
    k1, k2, k3, k4, k5, k6, k7, k8 = jax.random.split(key, 8)
    w1 = jax.random.normal(k1, (C_IN, C_HID), jnp.float32) * 0.04   # (512, 32)
    b1 = jax.random.normal(k2, (1, C_HID), jnp.float32) * 0.02
    w2 = jax.random.normal(k3, (C_HID, C_IN), jnp.float32) * 0.17   # (32, 512)
    b2 = jax.random.normal(k4, (1, C_IN), jnp.float32) * 0.02
    gamma = 1.0 + 0.1 * jax.random.normal(k5, (1, C_HID), jnp.float32)
    beta = 0.1 * jax.random.normal(k6, (1, C_HID), jnp.float32)
    running_mean = 0.05 * jax.random.normal(k7, (1, C_HID), jnp.float32)
    running_var = 1.0 + 0.1 * jax.random.uniform(k8, (1, C_HID), jnp.float32)
    return dict(w1=w1, b1=b1, w2=w2, b2=b2, gamma=gamma, beta=beta,
                running_mean=running_mean, running_var=running_var)


def reference(x_nchw, p):
    """Plain-JAX reference (un-fused BN, eval mode) for correctness check."""
    gap = jnp.mean(x_nchw, axis=(2, 3))                              # (N, 512)
    h = gap @ p["w1"] + p["b1"]
    h = (h - p["running_mean"]) / jnp.sqrt(p["running_var"] + BN_EPS)
    h = h * p["gamma"] + p["beta"]
    h = jnp.maximum(h, 0.0)
    y = jax.nn.sigmoid(h @ p["w2"] + p["b2"])
    return gap * y


if __name__ == "__main__":
    key = jax.random.PRNGKey(0)
    kx, kp = jax.random.split(key)
    # Small but module-consistent shapes: batch=2, channels=512 (required by
    # Linear(512, 32)), spatial=32x32 -> HW=1024 (fits a single HW tile).
    x = jax.random.normal(kx, (2, C_IN, 32, 32), jnp.float32)
    params = init_params(kp)

    out = jax.block_until_ready(channel_attention(x, params))

    ref = reference(x, params)
    assert out.shape == (2, C_IN)
    assert jnp.allclose(out, ref, atol=1e-4, rtol=1e-4), "mismatch vs reference"
    print("KERNEL_OK")
</pallas_src>

<mosaic_0001>
module attributes {stable_mosaic.version = 11 : i64} {
  func.func @channel_attention_kernel(%arg0: i32, %arg1: i32, %arg2: memref<1x512x1024xf32, #tpu.memory_space<vmem>>, %arg3: memref<512x32xf32, #tpu.memory_space<vmem>>, %arg4: memref<1x32xf32, #tpu.memory_space<vmem>>, %arg5: memref<32x512xf32, #tpu.memory_space<vmem>>, %arg6: memref<1x512xf32, #tpu.memory_space<vmem>>, %arg7: memref<1x1x512xf32, #tpu.memory_space<vmem>>, %arg8: memref<1x512x128xf32, #tpu.memory_space<vmem>>) attributes {dimension_semantics = [#tpu.dimension_semantics<parallel>, #tpu.dimension_semantics<arbitrary>], iteration_bounds = array<i64: 2, 1>, scalar_prefetch = 0 : i64, scratch_operands = 1 : i64, tpu.core_type = #tpu.core_type<tc>, window_params = [{transform_indices = @transform_0, window_bounds = array<i64: 1, 512, 1024>}, {pipeline_mode = #tpu.pipeline_mode<synchronous>, transform_indices = @transform_1, window_bounds = array<i64: 512, 32>}, {pipeline_mode = #tpu.pipeline_mode<synchronous>, transform_indices = @transform_2, window_bounds = array<i64: 1, 32>}, {pipeline_mode = #tpu.pipeline_mode<synchronous>, transform_indices = @transform_3, window_bounds = array<i64: 32, 512>}, {pipeline_mode = #tpu.pipeline_mode<synchronous>, transform_indices = @transform_4, window_bounds = array<i64: 1, 512>}, {transform_indices = @transform_5, window_bounds = array<i64: 1, 1, 512>}]} {
    %c0_i32 = arith.constant 0 : i32
    %0 = arith.cmpi eq, %arg1, %c0_i32 : i32
    %1 = arith.extui %0 : i1 to i32
    %c0_i32_0 = arith.constant 0 : i32
    %2 = arith.cmpi ne, %1, %c0_i32_0 : i32
    scf.if %2 {
      %cst = arith.constant 0.000000e+00 : f32
      %25 = vector.broadcast %cst : f32 to vector<1x512x128xf32>
      %c0_11 = arith.constant 0 : index
      %c0_12 = arith.constant 0 : index
      %c0_13 = arith.constant 0 : index
      %26 = vector.load %arg8[%c0_11, %c0_12, %c0_13] : memref<1x512x128xf32, #tpu.memory_space<vmem>>, vector<1x512x128xf32>
      tpu.vector_store %arg8[%c0_11, %c0_12, %c0_13], %25 {strides = array<i32>} : memref<1x512x128xf32, #tpu.memory_space<vmem>>, vector<1x512x128xf32>,
    } else {
    }
    %c0 = arith.constant 0 : index
    %c0_1 = arith.constant 0 : index
    %c0_2 = arith.constant 0 : index
    %3 = vector.load %arg2[%c0, %c0_1, %c0_2] : memref<1x512x1024xf32, #tpu.memory_space<vmem>>, vector<1x512x1024xf32>
    %4 = vector.extract_strided_slice %3 {offsets = [0, 0, 0], sizes = [1, 512, 128], strides = [1, 1, 1]} : vector<1x512x1024xf32> to vector<1x512x128xf32>
    %5 = vector.extract_strided_slice %3 {offsets = [0, 0, 128], sizes = [1, 512, 128], strides = [1, 1, 1]} : vector<1x512x1024xf32> to vector<1x512x128xf32>
    %6 = arith.addf %4, %5 : vector<1x512x128xf32>
    %7 = vector.extract_strided_slice %3 {offsets = [0, 0, 256], sizes = [1, 512, 128], strides = [1, 1, 1]} : vector<1x512x1024xf32> to vector<1x512x128xf32>
    %8 = arith.addf %6, %7 : vector<1x512x128xf32>
    %9 = vector.extract_strided_slice %3 {offsets = [0, 0, 384], sizes = [1, 512, 128], strides = [1, 1, 1]} : vector<1x512x1024xf32> to vector<1x512x128xf32>
    %10 = arith.addf %8, %9 : vector<1x512x128xf32>
    %11 = vector.extract_strided_slice %3 {offsets = [0, 0, 512], sizes = [1, 512, 128], strides = [1, 1, 1]} : vector<1x512x1024xf32> to vector<1x512x128xf32>
    %12 = arith.addf %10, %11 : vector<1x512x128xf32>
    %13 = vector.extract_strided_slice %3 {offsets = [0, 0, 640], sizes = [1, 512, 128], strides = [1, 1, 1]} : vector<1x512x1024xf32> to vector<1x512x128xf32>
    %14 = arith.addf %12, %13 : vector<1x512x128xf32>
    %15 = vector.extract_strided_slice %3 {offsets = [0, 0, 768], sizes = [1, 512, 128], strides = [1, 1, 1]} : vector<1x512x1024xf32> to vector<1x512x128xf32>
    %16 = arith.addf %14, %15 : vector<1x512x128xf32>
    %17 = vector.extract_strided_slice %3 {offsets = [0, 0, 896], sizes = [1, 512, 128], strides = [1, 1, 1]} : vector<1x512x1024xf32> to vector<1x512x128xf32>
    %18 = arith.addf %16, %17 : vector<1x512x128xf32>
    %c0_3 = arith.constant 0 : index
    %c0_4 = arith.constant 0 : index
    %c0_5 = arith.constant 0 : index
    %19 = vector.load %arg8[%c0_3, %c0_4, %c0_5] : memref<1x512x128xf32, #tpu.memory_space<vmem>>, vector<1x512x128xf32>
    %20 = arith.addf %19, %18 : vector<1x512x128xf32>
    %c0_6 = arith.constant 0 : index
    %c0_7 = arith.constant 0 : index
    %c0_8 = arith.constant 0 : index
    %21 = vector.load %arg8[%c0_6, %c0_7, %c0_8] : memref<1x512x128xf32, #tpu.memory_space<vmem>>, vector<1x512x128xf32>
    tpu.vector_store %arg8[%c0_6, %c0_7, %c0_8], %20 {strides = array<i32>} : memref<1x512x128xf32, #tpu.memory_space<vmem>>, vector<1x512x128xf32>,
    %c0_i32_9 = arith.constant 0 : i32
    %22 = arith.cmpi eq, %arg1, %c0_i32_9 : i32
    %23 = arith.extui %22 : i1 to i32
    %c0_i32_10 = arith.constant 0 : i32
    %24 = arith.cmpi ne, %23, %c0_i32_10 : i32
    scf.if %24 {
      %c0_11 = arith.constant 0 : index
      %c0_12 = arith.constant 0 : index
      %c0_13 = arith.constant 0 : index
      %25 = vector.load %arg8[%c0_11, %c0_12, %c0_13] : memref<1x512x128xf32, #tpu.memory_space<vmem>>, vector<1x512x128xf32>
      %cst = arith.constant dense<0.000000e+00> : vector<1x512xf32>
      %26 = vector.multi_reduction <add>, %25, %cst [2] : vector<1x512x128xf32> to vector<1x512xf32>
      %cst_14 = arith.constant 9.765625E-4 : f32
      %27 = vector.broadcast %cst_14 : f32 to vector<1x512xf32>
      %28 = arith.mulf %26, %27 : vector<1x512xf32>
      %c0_15 = arith.constant 0 : index
      %c0_16 = arith.constant 0 : index
      %29 = vector.load %arg3[%c0_15, %c0_16] : memref<512x32xf32, #tpu.memory_space<vmem>>, vector<512x32xf32>
      %cst_17 = arith.constant dense<0.000000e+00> : vector<1x32xf32>
      %30 = tpu.matmul %28, %29, %cst_17 {dimension_numbers = #tpu.dot_dimension_numbers<[1], [0], [0], [1], [0, 0, 1, 1], [], []>} : vector<1x512xf32>, vector<512x32xf32>, vector<1x32xf32> -> vector<1x32xf32>
      %c0_18 = arith.constant 0 : index
      %c0_19 = arith.constant 0 : index
      %31 = vector.load %arg4[%c0_18, %c0_19] : memref<1x32xf32, #tpu.memory_space<vmem>>, vector<1x32xf32>
      %32 = arith.addf %30, %31 : vector<1x32xf32>
      %cst_20 = arith.constant 0.000000e+00 : f32
      %33 = vector.broadcast %cst_20 : f32 to vector<1x32xf32>
      %34 = arith.maximumf %32, %33 : vector<1x32xf32>
      %c0_21 = arith.constant 0 : index
      %c0_22 = arith.constant 0 : index
      %35 = vector.load %arg5[%c0_21, %c0_22] : memref<32x512xf32, #tpu.memory_space<vmem>>, vector<32x512xf32>
      %cst_23 = arith.constant dense<0.000000e+00> : vector<1x512xf32>
      %36 = tpu.matmul %34, %35, %cst_23 {dimension_numbers = #tpu.dot_dimension_numbers<[1], [0], [0], [1], [0, 0, 1, 1], [], []>} : vector<1x32xf32>, vector<32x512xf32>, vector<1x512xf32> -> vector<1x512xf32>
      %c0_24 = arith.constant 0 : index
      %c0_25 = arith.constant 0 : index
      %37 = vector.load %arg6[%c0_24, %c0_25] : memref<1x512xf32, #tpu.memory_space<vmem>>, vector<1x512xf32>
      %38 = arith.addf %36, %37 : vector<1x512xf32>
      %39 = arith.negf %38 : vector<1x512xf32>
      %40 = math.exp %39 : vector<1x512xf32>
      %cst_26 = arith.constant 1.000000e+00 : f32
      %41 = vector.broadcast %cst_26 : f32 to vector<1x512xf32>
      %42 = arith.addf %41, %40 : vector<1x512xf32>
      %43 = arith.divf %41, %42 : vector<1x512xf32>
      %44 = arith.mulf %28, %43 : vector<1x512xf32>
      %45 = vector.shape_cast %44 : vector<1x512xf32> to vector<1x1x512xf32>
      %c0_27 = arith.constant 0 : index
      %c0_28 = arith.constant 0 : index
      %c0_29 = arith.constant 0 : index
      %46 = vector.load %arg7[%c0_27, %c0_28, %c0_29] : memref<1x1x512xf32, #tpu.memory_space<vmem>>, vector<1x1x512xf32>
      tpu.vector_store %arg7[%c0_27, %c0_28, %c0_29], %45 {strides = array<i32>} : memref<1x1x512xf32, #tpu.memory_space<vmem>>, vector<1x1x512xf32>,
    } else {
    }
    return
  }
  func.func @transform_0(%arg0: i32, %arg1: i32) -> (i32, i32, i32) {
    %c0_i32 = arith.constant 0 : i32
    %c0_i32_0 = arith.constant 0 : i32
    return %arg0, %c0_i32, %arg1 : i32, i32, i32
  }
  func.func @transform_1(%arg0: i32, %arg1: i32) -> (i32, i32) {
    %c0_i32 = arith.constant 0 : i32
    %c0_i32_0 = arith.constant 0 : i32
    %c0_i32_1 = arith.constant 0 : i32
    return %c0_i32, %c0_i32_0 : i32, i32
  }
  func.func @transform_2(%arg0: i32, %arg1: i32) -> (i32, i32) {
    %c0_i32 = arith.constant 0 : i32
    %c0_i32_0 = arith.constant 0 : i32
    %c0_i32_1 = arith.constant 0 : i32
    return %c0_i32, %c0_i32_0 : i32, i32
  }
  func.func @transform_3(%arg0: i32, %arg1: i32) -> (i32, i32) {
    %c0_i32 = arith.constant 0 : i32
    %c0_i32_0 = arith.constant 0 : i32
    %c0_i32_1 = arith.constant 0 : i32
    return %c0_i32, %c0_i32_0 : i32, i32
  }
  func.func @transform_4(%arg0: i32, %arg1: i32) -> (i32, i32) {
    %c0_i32 = arith.constant 0 : i32
    %c0_i32_0 = arith.constant 0 : i32
    %c0_i32_1 = arith.constant 0 : i32
    return %c0_i32, %c0_i32_0 : i32, i32
  }
  func.func @transform_5(%arg0: i32, %arg1: i32) -> (i32, i32, i32) {
    %c0_i32 = arith.constant 0 : i32
    %c0_i32_0 = arith.constant 0 : i32
    %c0_i32_1 = arith.constant 0 : i32
    return %arg0, %c0_i32, %c0_i32_0 : i32, i32, i32
  }
}

</mosaic_0001>

<bundles_post_ra>
// kernel: tpu_custom_call.1
= control target key start
LH: loop header
LB: loop body
LE: loop exit
PB: predicated region body
PF: predicated region fallthrough
CT: control target
= control target key end

     0   :  { %s14174_s0 = inlined_call_operand.hbm [shape: f32[2,512,1024], index: 0, kind: input, shape index: {}]   ;;  %s14175_s1 = inlined_call_operand.vmem [shape: f32[512,32], index: 1, kind: input, shape index: {}]   ;;  %s14176_s2 = inlined_call_operand.hbm [shape: f32[1,32], index: 2, kind: input, shape index: {}]   ;;  %s14177_s3 = inlined_call_operand.hbm [shape: f32[32,512], index: 3, kind: input, shape index: {}]   ;;  %s14178_s4 = inlined_call_operand.hbm [shape: f32[1,512], index: 4, kind: input, shape index: {}]   ;;  %s14179_s5 = inlined_call_operand.hbm [shape: f32[2,1,512], index: 5, kind: output, shape index: {}]  }
   0x1   :  { %14271 = sst [smem:[#allocation77_spill]] %s14176_s2 }
   0x2   :  { %10 = vsyncpa [#allocation4], 0 }
   0x3   :  { %12 = vsyncpa [#allocation4 + $0x1], 0 }
   0x4   :  { %13 = vsyncpa [#allocation7], 0 }
   0x5   :  { %14 = vsyncpa [#allocation10], 0 }
   0x6   :  { %15 = vsyncpa [#allocation5], 0 }
   0x7   :  { %17 = vsyncpa [#allocation5 + $0x1], 0  ;;  %s10681_s18 = smov 0   ;;  %s10683_s19 = smov 0  }
   0x8   :  { %s10685_s20 = smov 0   ;;  %s10687_s21 = smov 0  }
   0x9   :  { %s10689_s22 = smov 0   ;;  %s10691_s23 = smov 0  }
   0xa LB: > { %s10008_s24 = sadd.s32 4294967295, %s10637_s23   ;;  %s10009_s25 = sadd.s32 4294967294, %s10637_s23   ;;  %s10637_s23 = sphi %s10691_s23, %s23_s23   ;;  %s10633_s22 = sphi %s10689_s22, %s14516_s22   ;;  %s10629_s21 = sphi %s10687_s21, %s14515_s21   ;;  %s10625_s20 = sphi %s10685_s20, %s14514_s20   ;;  %s10621_s19 = sphi %s10683_s19, %s14513_s19   ;;  %s10617_s18 = sphi %s10681_s18, %s14512_s18  }
   0xb   : > { %p57_p0 = scmp.ne.s32.totalorder %s10621_s19, %s10617_s18  ;;  %p10715_p1 = scmp.eq.s32.totalorder %s10008_s24, 0 }
   0xc   : > { %p10719_p2 = scmp.eq.s32.totalorder %s10008_s24, 1  ;;  %p171_p3 = scmp.eq.s32.totalorder %s10009_s25, 1 }
   0xd   : > { %s14272_s26 = scalar_select %p10715_p1, 1, 0 }
   0xe   : > { %s14273_s27 = scalar_select %p10719_p2, 1, 0 }
   0xf   : > { %p10725_p4 = por %p10715_p1, %p57_p0  ;;  %p10010_p5 = scmp.ge.s32.totalorder %s10637_s23, 1 }
  0x10   : > { %p10730_p6 = por %p171_p3, %p57_p0  ;;  %p178_p7 = scmp.lt.s32.totalorder %s10637_s23, 3 }
  0x11   : > { %s14274_s28 = scalar_select %p10725_p4, 1, 0 }
  0x12   : > { %s14275_s29 = scalar_select %p10730_p6, 1, 0 }
  0x13   : > { %p10735_p8 = pnand %p10010_p5, %p178_p7  ;;  %s10639_s6 = smov [#allocation6]  }
  0x14   : > { %s194_s7 = sshll.u32 %s10639_s6, 4  ;;  %s10640_s8 = smov [#allocation8]   ;;  %s195_s7 = int_to_ptr.vmem [resolvable:$true] %s194_s7 }
  0x15   : > { %s14276_s30 = scalar_select %p10735_p8, 1, 0 }
  0x16   : > { %p10331_p10 = pneg %p10735_p8  ;;  %s204_s9 = sshll.u32 %s10640_s8, 4  ;;  %s10748_s9 = int_to_ptr.vmem [resolvable:$true] %s204_s9 }
  0x17   : > { %s10641_s11 = smov [#allocation9]   ;;  %s14278_s2 = sld [smem:[#allocation77_spill]] }
  0x18   : > { %p10744_p11 = pnand %p10331_p10, %p10715_p1  ;;  %s10750_s12 = sshll.u32 %s10641_s11, 4  ;;  %s219_s12 = int_to_ptr.vmem [resolvable:$true] %s10750_s12 }
  0x1a   : > { %p10760_p13 = pneg %p10744_p11 }
  0x1d   : > { %s10433_s15 = scalar_lea.hbm %s14278_s2, 16 }
  0x1e   : > { %p10434_p12 = scmp.ne.s32.totalorder %s14278_s2, %s10433_s15  ;;  %p10440_p5 = scmp.lt.u32.totalorder %s10433_s15, %s14278_s2 }
  0x20   : > { %p10436_p0 = pnand %p10760_p13, %p10434_p12 }
  0x22   : > { %p10437_p3 = pneg %p10436_p0 }
  0x24   : > { %p10442_p7 = pnand %p10440_p5, %p10437_p3 }
  0x26   : > { %10445 = shalt.err (!%p10442_p7)
}
  0x27   : > { %s10446_s8 = scalar_lea.vmem %s195_s7, 16  ;;  %s10453_s11 = scalar_lea.vmem %s195_s7, 32 }
  0x28   : > { %p10447_p10 = scmp.ne.s32.totalorder %s195_s7, %s10446_s8  ;;  %p10454_p1 = scmp.lt.s32.totalorder %s195_s7, %s195_s7 }
  0x29   : > { %p10455_p4 = scmp.lt.s32.totalorder %s10453_s11, %s10446_s8 }
  0x2a   : > { %p10449_p9 = pnand %p10447_p10, %p10760_p13 }
  0x2b   : > { %p10456_p8 = por %p10455_p4, %p10454_p1 }
  0x2c   : > { %p10450_p6 = pneg %p10449_p9 }
  0x2e   : > { %p10457_p2 = pnand %p10456_p8, %p10450_p6 }
  0x30   : > { %10460 = shalt.err (!%p10457_p2)
}
  0x31   : > { %10334 = dma.hbm_to_vmem [thread:$0]  (!%p10744_p11), %s14278_s2, 16, %s195_s7, [#allocation7]  }
  0x32   : > { %s10461_s17 = scalar_lea.hbm %s14177_s3, 2048 }
  0x33   : > { %p10462_p9 = scmp.ne.s32.totalorder %s14177_s3, %s10461_s17  ;;  %p10468_p2 = scmp.lt.u32.totalorder %s10461_s17, %s14177_s3 }
  0x35   : > { %p10464_p12 = pnand %p10462_p9, %p10760_p13 }
  0x37   : > { %p10465_p1 = pneg %p10464_p12 }
  0x39   : > { %p10470_p4 = pnand %p10468_p2, %p10465_p1 }
  0x3b   : > { %10473 = shalt.err (!%p10470_p4)
}
  0x3c   : > { %s10474_s7 = scalar_lea.vmem %s10748_s9, 2048  ;;  %p10482_p3 = scmp.lt.s32.totalorder %s10748_s9, %s10748_s9 }
  0x3d   : > { %p10475_p6 = scmp.ne.s32.totalorder %s10748_s9, %s10474_s7  ;;  %p10483_p5 = scmp.lt.s32.totalorder %s10474_s7, %s10474_s7 }
  0x3f   : > { %p10477_p8 = pnand %p10475_p6, %p10760_p13  ;;  %p10484_p7 = por %p10483_p5, %p10482_p3 }
  0x41   : > { %p10478_p0 = pneg %p10477_p8 }
  0x43   : > { %p10485_p10 = pnand %p10484_p7, %p10478_p0 }
  0x45   : > { %10488 = shalt.err (!%p10485_p10)
}
  0x46   : > { %s10642_s13 = smov 512   ;;  %s10643_s14 = smov 32  }
  0x47   : > { %10337 = dma.hbm_to_vmem [thread:$0]  (!%p10744_p11), %s14177_s3, 2048, %s10748_s9, [#allocation7], %s10642_s13, %s10642_s13, %s10643_s14  }
  0x48   : > { %s10489_s6 = scalar_lea.hbm %s14178_s4, 64 }
  0x49   : > { %p10490_p9 = scmp.ne.s32.totalorder %s14178_s4, %s10489_s6  ;;  %p10496_p2 = scmp.lt.u32.totalorder %s10489_s6, %s14178_s4 }
  0x4b   : > { %p10492_p12 = pnand %p10490_p9, %p10760_p13 }
  0x4d   : > { %p10493_p1 = pneg %p10492_p12 }
  0x4f   : > { %p10498_p4 = pnand %p10496_p2, %p10493_p1 }
  0x51   : > { %10501 = shalt.err (!%p10498_p4)
}
  0x52   : > { %s10502_s15 = scalar_lea.vmem %s219_s12, 64  ;;  %p10510_p3 = scmp.lt.s32.totalorder %s219_s12, %s219_s12 }
  0x53   : > { %p10503_p6 = scmp.ne.s32.totalorder %s219_s12, %s10502_s15  ;;  %p10511_p5 = scmp.lt.s32.totalorder %s10502_s15, %s10502_s15 }
  0x55   : > { %p10505_p8 = pnand %p10503_p6, %p10760_p13  ;;  %p10512_p7 = por %p10511_p5, %p10510_p3 }
  0x57   : > { %p10506_p0 = pneg %p10505_p8 }
  0x59   : > { %p10513_p10 = pnand %p10512_p7, %p10506_p0 }
  0x5b   : > { %10516 = shalt.err (!%p10513_p10)
}
  0x5c   : > { %10340 = dma.hbm_to_vmem [thread:$0]  (!%p10744_p11), %s14178_s4, 64, %s219_s12, [#allocation10]  }
  0x5d   : > { %s44_s2 = sadd.s32 1, %s10625_s20  ;;  %s35_s24 = sadd.s32 1, %s10633_s22 }
  0x5e   : > { %p51_p13 = scmp.ne.s32.totalorder %s10625_s20, %s10621_s19  ;;  %p37_p9 = scmp.ge.s32.totalorder %s35_s24, 2 }
  0x5f   : > { %p52_p12 = scmp.eq.s32.totalorder %s10637_s23, 0  ;;  %p14280_p1 = scmp.ne.s32.totalorder %s14273_s27, 0 }
  0x60   : > { %p10352_p4 = scmp.lt.s32.totalorder %s10637_s23, 2  ;;  %s14518_s24 = smov (%p37_p9, %s35_s24), 0 }
  0x61   : > { %p10825_p2 = por %p14280_p1, %p51_p13  ;;  %p53_p6 = por %p52_p12, %p51_p13 }
  0x62   : > { %s229_s14 = sand.u32 1, %s10625_s20   ;;  %s39_s16 = ssub.s32 %s10633_s22, %s14518_s24 }
  0x63   : > { %p42_p8 = scmp.eq.s32.totalorder %s39_s16, 0  ;;  %s10015_s12 = sshll.u32 %s229_s14, 12 }
  0x64   : > { %s10163_s17 = sshll.u32 %s10633_s22, 16  ;;  %s233_s11 = scalar_lea.vmem [#allocation3], %s10015_s12 }
  0x65   : > { %s10837_s25 = scalar_select %p42_p8, %s10625_s20, %s44_s2  }
  0x66   : > { %s10842_s27 = scalar_lea.hbm %s14174_s0, %s10163_s17  ;;  %s242_s7 = sshll.u32 %s233_s11, 4  ;;  %s10844_s7 = int_to_ptr.vmem [resolvable:$true] %s242_s7 }
  0x67   : > { %p10848_p11 = pnand %p10352_p4, %p53_p6  ;;  %s10852_s9 = scalar_lea.sflag [#allocation4], %s229_s14 }
  0x68   : > { %s10517_s13 = scalar_lea.hbm %s10842_s27, 65536  ;;  %s10522_s12 = scalar_lea.hbm %s14174_s0, 131072 }
  0x69   : > { %p10518_p0 = scmp.ne.s32.totalorder %s10842_s27, %s10517_s13  ;;  %p10519_p3 = pneg %p10848_p11 }
  0x6a   : > { %p10523_p10 = scmp.lt.u32.totalorder %s10842_s27, %s14174_s0  ;;  %p10524_p13 = scmp.lt.u32.totalorder %s10522_s12, %s10517_s13 }
  0x6b   : > { %p10520_p5 = pnand %p10519_p3, %p10518_p0  ;;  %p10526_p12 = scmp.lt.u32.totalorder %s10517_s13, %s10842_s27 }
  0x6c   : > { %p10525_p9 = por %p10524_p13, %p10523_p10 }
  0x6d   : > { %p10521_p7 = pneg %p10520_p5 }
  0x6e   : > { %p10527_p1 = por %p10526_p12, %p10525_p9 }
  0x70   : > { %p10528_p4 = pnand %p10527_p1, %p10521_p7 }
  0x72   : > { %10531 = shalt.err (!%p10528_p4)
}
  0x73   : > { %s10532_s14 = scalar_lea.vmem %s10844_s7, 65536  ;;  %s10644_s8 = smov [#allocation3]  }
  0x74   : > { %p10533_p6 = scmp.ne.s32.totalorder %s10844_s7, %s10532_s14  ;;  %s10537_s11 = sshll.u32 %s10644_s8, 4  ;;  %s10538_s11 = int_to_ptr.vmem [resolvable:$false] %s10537_s11 }
  0x75   : > { %s10539_s2 = scalar_lea.vmem %s10538_s11, 131072  ;;  %p10540_p5 = scmp.lt.s32.totalorder %s10844_s7, %s10538_s11 }
  0x76   : > { %p10535_p8 = pnand %p10533_p6, %p10519_p3  ;;  %p10541_p10 = scmp.lt.s32.totalorder %s10539_s2, %s10532_s14 }
  0x78   : > { %p10536_p0 = pneg %p10535_p8  ;;  %p10542_p13 = por %p10541_p10, %p10540_p5 }
  0x7a   : > { %p10543_p9 = pnand %p10542_p13, %p10536_p0 }
  0x7c   : > { %10546 = shalt.err (!%p10543_p9)
}
  0x7d   : > { %s10645_s13 = smov 1024   ;;  %s10646_s16 = smov 64  }
  0x7e   : > { %10344 = dma.hbm_to_vmem [thread:$0]  (!%p10848_p11), %s10842_s27, 65536, %s10844_s7, %s10852_s9, %s10645_s13, %s10645_s13, %s10646_s16  }
  0x7f   : > { %p14283_p3 = scmp.ne.s32.totalorder %s14276_s30, 0 }
  0x81   : > { %254 = sbr.rel (%p14283_p3) target bundleno = 1586 (0x632), region = 40 }
  0x88   : > { %s10883_s12 = sand.u32 1, %s10621_s19   ;;  %p14284_p7 = scmp.ne.s32.totalorder %s14274_s28, 0 }
  0x89   : > { %s10019_s17 = sshll.u32 %s10883_s12, 12  ;;  %s257_s6 = scalar_lea.sflag [#allocation4], %s10883_s12 }
  0x8a   : > { %s10887_s14 = scalar_lea.vmem [#allocation3], %s10019_s17 }
  0x8b   : > { %10600 = dma.done.wait (%p14284_p7), %s257_s6, 65536  }
  0x8c   : > { %10602 = vsyncadd (%p14284_p7), %s257_s6, 4294901760  ;;  %p14285_p11 = scmp.ne.s32.totalorder %s14272_s26, 0 }
  0x8e   : > { %10604 = dma.done.wait (%p14285_p11), [#allocation7], 2064  }
  0x8f   : > { %10606 = vsyncadd (%p14285_p11), [#allocation7], 4294965232 }
  0x90   : > { %10608 = dma.done.wait (%p14285_p11), [#allocation10], 64  }
  0x91   : > { %10610 = vsyncadd (%p14285_p11), [#allocation10], 4294967232  ;;  %v496_v0 = vld [vmem:[%s10887_s14 + $0x400] sm:$0xff]  ;;  %v497_v1 = vld [vmem:[%s10887_s14 + $0x408] sm:$0xff]  ;;  %vm1919_vm0 = vcmask 130112   ;;  %vm1926_vm1 = vcmask 195712  }
  0x92   : > { %v498_v2 = vld [vmem:[%s10887_s14 + $0x410] sm:$0xff]  ;;  %v896_v3 = vadd.f32 %v497_v1, %v496_v0  ;;  %v499_v4 = vld [vmem:[%s10887_s14 + $0x418] sm:$0xff]  ;;  %v368_v5 = vld [vmem:[%s10887_s14] sm:$0xff]  ;;  %vm1933_vm2 = vcmask 261312   ;;  %vm1940_vm3 = vcmask 326912   ;;  %vm1947_vm4 = vcmask 392512  }
  0x93   : > { %v369_v7 = vld [vmem:[%s10887_s14 + $0x8] sm:$0xff]  ;;  %v370_v8 = vld [vmem:[%s10887_s14 + $0x10] sm:$0xff]  ;;  %v500_v9 = vld [vmem:[%s10887_s14 + $0x420] sm:$0xff]  ;;  %vm1954_vm5 = vcmask 458112   ;;  %vm1961_vm6 = vcmask 523712   ;;  %vm1968_vm7 = vcmask 589312  }
  0x94   : > { %v960_v6 = vadd.f32 %v896_v3, %v498_v2  ;;  %v880_v10 = vadd.f32 %v369_v7, %v368_v5  ;;  %v371_v12 = vld [vmem:[%s10887_s14 + $0x18] sm:$0xff]  ;;  %v504_v13 = vld [vmem:[%s10887_s14 + $0x440] sm:$0xff]  ;;  %v505_v14 = vld [vmem:[%s10887_s14 + $0x448] sm:$0xff]  ;;  %vm1975_vm8 = vcmask 654912   ;;  %vm1982_vm9 = vcmask 720512   ;;  %s10023_s2 = sshll.u32 %s10883_s12, 2 }
  0x95   : > { %v501_v15 = vld [vmem:[%s10887_s14 + $0x428] sm:$0xff]  ;;  %v506_v17 = vld [vmem:[%s10887_s14 + $0x450] sm:$0xff]  ;;  %v897_v18 = vadd.f32 %v505_v14, %v504_v13  ;;  %v372_v21 = vld [vmem:[%s10887_s14 + $0x20] sm:$0xff]  ;;  %vm1989_vm10 = vcmask 786112   ;;  %vm1996_vm11 = vcmask 851712   ;;  %vm2003_vm12 = vcmask 917312  }
  0x96   : > { %v1024_v11 = vadd.f32 %v960_v6, %v499_v4  ;;  %v944_v16 = vadd.f32 %v880_v10, %v370_v8  ;;  %v502_v19 = vld [vmem:[%s10887_s14 + $0x430] sm:$0xff]  ;;  %v507_v22 = vld [vmem:[%s10887_s14 + $0x458] sm:$0xff]  ;;  %v376_v25 = vld [vmem:[%s10887_s14 + $0x40] sm:$0xff]  ;;  %vm2010_vm13 = vcmask 982912   ;;  %vm2017_vm14 = vcmask 1048512   ;;  %s10164_s13 = sshll.u32 %s10629_s21, 6 }
  0x97   : > { %v961_v24 = vadd.f32 %v897_v18, %v506_v17  ;;  %v377_v26 = vld [vmem:[%s10887_s14 + $0x48] sm:$0xff]  ;;  %v378_v27 = vld [vmem:[%s10887_s14 + $0x50] sm:$0xff]  ;;  %v503_v28 = vld [vmem:[%s10887_s14 + $0x438] sm:$0xff]  ;;  %vm2439_vm15 = vcmask 261120   ;;  %s298_s16 = scalar_lea.vmem [#allocation11], %s10023_s2  ;;  %s14125_s28 = scalar_lea.hbm %s14179_s5, %s10164_s13 }
  0x98   : > { %v1088_v20 = vadd.f32 %v1024_v11, %v500_v9  ;;  %v1008_v23 = vadd.f32 %v944_v16, %v371_v12  ;;  %v373_v30 = vld [vmem:[%s10887_s14 + $0x28] sm:$0xff]  ;;  %v508_v31 = vld [vmem:[%s10887_s14 + $0x460] sm:$0xff]  ;;  %v881_v32 = vadd.f32 %v377_v26, %v376_v25  ;;  %v374_v33 = vld [vmem:[%s10887_s14 + $0x30] sm:$0xff]  ;;  %s9898_s17 = sshll.u32 %s298_s16, 4  ;;  %s9884_s30 = scalar_lea.sflag [#allocation5], %s10883_s12  ;;  %s14127_s17 = int_to_ptr.vmem [resolvable:$true] %s9898_s17 }
  0x99   : > { %v1025_v35 = vadd.f32 %v961_v24, %v507_v22  ;;  %v379_v36 = vld [vmem:[%s10887_s14 + $0x58] sm:$0xff]  ;;  %v512_v37 = vld [vmem:[%s10887_s14 + $0x480] sm:$0xff]  ;;  %v509_v39 = vld [vmem:[%s10887_s14 + $0x468] sm:$0xff]  ;;  %s10547_s21 = scalar_lea.vmem %s14127_s17, 64  ;;  %s10650_s27 = smov [#allocation11]  }
  0x9a   : > { %v1152_v29 = vadd.f32 %v1088_v20, %v501_v15  ;;  %v1072_v34 = vadd.f32 %v1008_v23, %v372_v21  ;;  %v945_v40 = vadd.f32 %v881_v32, %v378_v27  ;;  %v513_v41 = vld [vmem:[%s10887_s14 + $0x488] sm:$0xff]  ;;  %v514_v42 = vld [vmem:[%s10887_s14 + $0x490] sm:$0xff]  ;;  %v375_v43 = vld [vmem:[%s10887_s14 + $0x38] sm:$0xff]  ;;  %p10548_p12 = scmp.ne.s32.totalorder %s14127_s17, %s10547_s21  ;;  %s10551_s7 = sshll.u32 %s10650_s27, 4  ;;  %s10552_s7 = int_to_ptr.vmem [resolvable:$false] %s10551_s7 }
  0x9b   : > { %v510_v45 = vld [vmem:[%s10887_s14 + $0x470] sm:$0xff]  ;;  %v1089_v46 = vadd.f32 %v1025_v35, %v508_v31  ;;  %v380_v47 = vld [vmem:[%s10887_s14 + $0x60] sm:$0xff]  ;;  %v898_v48 = vadd.f32 %v513_v41, %v512_v37  ;;  %v515_v51 = vld [vmem:[%s10887_s14 + $0x498] sm:$0xff]  ;;  %s10553_s15 = scalar_lea.vmem %s10552_s7, 128  ;;  %p10554_p6 = scmp.lt.s32.totalorder %s14127_s17, %s10552_s7 }
  0x9c   : > { %v1216_v38 = vadd.f32 %v1152_v29, %v502_v19  ;;  %v1136_v44 = vadd.f32 %v1072_v34, %v373_v30  ;;  %v1009_v50 = vadd.f32 %v945_v40, %v379_v36  ;;  %v384_v52 = vld [vmem:[%s10887_s14 + $0x80] sm:$0xff]  ;;  %v385_v53 = vld [vmem:[%s10887_s14 + $0x88] sm:$0xff]  ;;  %v511_v55 = vld [vmem:[%s10887_s14 + $0x478] sm:$0xff]  ;;  %p10549_p1 = pnand %p10548_p12, %p10825_p2  ;;  %p10555_p8 = scmp.lt.s32.totalorder %s10553_s15, %s10547_s21 }
  0x9d   : > { %v1153_v56 = vadd.f32 %v1089_v46, %v509_v39  ;;  %v381_v57 = vld [vmem:[%s10887_s14 + $0x68] sm:$0xff]  ;;  %v962_v58 = vadd.f32 %v898_v48, %v514_v42  ;;  %v386_v59 = vld [vmem:[%s10887_s14 + $0x90] sm:$0xff]  ;;  %v882_v60 = vadd.f32 %v385_v53, %v384_v52  ;;  %v516_v63 = vld [vmem:[%s10887_s14 + $0x4a0] sm:$0xff] }
  0x9e   : > { %v1280_v49 = vadd.f32 %v1216_v38, %v503_v28  ;;  %v1200_v54 = vadd.f32 %v1136_v44, %v374_v33  ;;  %v382_v61 = vld [vmem:[%s10887_s14 + $0x70] sm:$0xff]  ;;  %v1073_v62 = vadd.f32 %v1009_v50, %v380_v47  ;;  %v387_v0 = vld [vmem:[%s10887_s14 + $0x98] sm:$0xff]  ;;  %v520_v5 = vld [vmem:[%s10887_s14 + $0x4c0] sm:$0xff]  ;;  %p10550_p4 = pneg %p10549_p1  ;;  %p10556_p0 = por %p10555_p8, %p10554_p6 }
  0x9f   : > { %v1217_v2 = vadd.f32 %v1153_v56, %v510_v45  ;;  %v1026_v3 = vadd.f32 %v962_v58, %v515_v51  ;;  %v946_v4 = vadd.f32 %v882_v60, %v386_v59  ;;  %v521_v6 = vld [vmem:[%s10887_s14 + $0x4c8] sm:$0xff]  ;;  %v522_v7 = vld [vmem:[%s10887_s14 + $0x4d0] sm:$0xff]  ;;  %v383_v8 = vld [vmem:[%s10887_s14 + $0x78] sm:$0xff] }
  0xa0   : > { %1619 = vadd.xlane.f32.xlu0 %v1280_v49  ;;  %v1264_v1 = vadd.f32 %v1200_v54, %v375_v43  ;;  %v1137_v9 = vadd.f32 %v1073_v62, %v381_v57  ;;  %v517_v10 = vld [vmem:[%s10887_s14 + $0x4a8] sm:$0xff]  ;;  %v388_v11 = vld [vmem:[%s10887_s14 + $0xa0] sm:$0xff]  ;;  %v899_v12 = vadd.f32 %v521_v6, %v520_v5  ;;  %v518_v14 = vld [vmem:[%s10887_s14 + $0x4b0] sm:$0xff]  ;;  %p10557_p5 = pnand %p10556_p0, %p10550_p4 }
  0xa1   : > { %v1281_v13 = vadd.f32 %v1217_v2, %v511_v55  ;;  %v1090_v15 = vadd.f32 %v1026_v3, %v516_v63  ;;  %v1010_v16 = vadd.f32 %v946_v4, %v387_v0  ;;  %v523_v17 = vld [vmem:[%s10887_s14 + $0x4d8] sm:$0xff]  ;;  %v752_v18 = vld [vmem:[%s10887_s14 + $0xc00] sm:$0xff]  ;;  %v389_v20 = vld [vmem:[%s10887_s14 + $0xa8] sm:$0xff] }
  0xa2   : > { %1587 = vadd.xlane.f32.xlu1 %v1264_v1  ;;  %v1201_v19 = vadd.f32 %v1137_v9, %v382_v61  ;;  %v963_v21 = vadd.f32 %v899_v12, %v522_v7  ;;  %v753_v22 = vld [vmem:[%s10887_s14 + $0xc08] sm:$0xff]  ;;  %v754_v23 = vld [vmem:[%s10887_s14 + $0xc10] sm:$0xff]  ;;  %v519_v24 = vld [vmem:[%s10887_s14 + $0x4b8] sm:$0xff] }
  0xa3   : > { %v1154_v25 = vadd.f32 %v1090_v15, %v517_v10  ;;  %v390_v26 = vld [vmem:[%s10887_s14 + $0xb0] sm:$0xff]  ;;  %v1074_v27 = vadd.f32 %v1010_v16, %v388_v11  ;;  %v524_v28 = vld [vmem:[%s10887_s14 + $0x4e0] sm:$0xff]  ;;  %v928_v29 = vadd.f32 %v753_v22, %v752_v18  ;;  %v755_v32 = vld [vmem:[%s10887_s14 + $0xc18] sm:$0xff] }
  0xa4   : > { %1621 = vadd.xlane.f32.xlu0 %v1281_v13  ;;  %v1265_v30 = vadd.f32 %v1201_v19, %v383_v8  ;;  %v1027_v31 = vadd.f32 %v963_v21, %v523_v17  ;;  %v760_v33 = vld [vmem:[%s10887_s14 + $0xc40] sm:$0xff]  ;;  %v761_v34 = vld [vmem:[%s10887_s14 + $0xc48] sm:$0xff]  ;;  %v391_v36 = vld [vmem:[%s10887_s14 + $0xb8] sm:$0xff] }
  0xa5   : > { %v1218_v35 = vadd.f32 %v1154_v25, %v518_v14  ;;  %v1138_v37 = vadd.f32 %v1074_v27, %v389_v20  ;;  %v525_v38 = vld [vmem:[%s10887_s14 + $0x4e8] sm:$0xff]  ;;  %v992_v39 = vadd.f32 %v928_v29, %v754_v23  ;;  %v762_v40 = vld [vmem:[%s10887_s14 + $0xc50] sm:$0xff]  ;;  %v929_v41 = vadd.f32 %v761_v34, %v760_v33  ;;  %v756_v44 = vld [vmem:[%s10887_s14 + $0xc20] sm:$0xff] }
  0xa6   : > { %1589 = vadd.xlane.f32.xlu1 %v1265_v30  ;;  %v526_v42 = vld [vmem:[%s10887_s14 + $0x4f0] sm:$0xff]  ;;  %v1091_v43 = vadd.f32 %v1027_v31, %v524_v28  ;;  %v763_v45 = vld [vmem:[%s10887_s14 + $0xc58] sm:$0xff]  ;;  %v392_v50 = vld [vmem:[%s10887_s14 + $0xc0] sm:$0xff] }
  0xa7   : > { %v1282_v46 = vadd.f32 %v1218_v35, %v519_v24  ;;  %v1202_v47 = vadd.f32 %v1138_v37, %v390_v26  ;;  %v1056_v48 = vadd.f32 %v992_v39, %v755_v32  ;;  %v993_v49 = vadd.f32 %v929_v41, %v762_v40  ;;  %v393_v51 = vld [vmem:[%s10887_s14 + $0xc8] sm:$0xff]  ;;  %v394_v52 = vld [vmem:[%s10887_s14 + $0xd0] sm:$0xff]  ;;  %v527_v53 = vld [vmem:[%s10887_s14 + $0x4f8] sm:$0xff] }
  0xa8   : > { %v1155_v54 = vadd.f32 %v1091_v43, %v525_v38  ;;  %v757_v55 = vld [vmem:[%s10887_s14 + $0xc28] sm:$0xff]  ;;  %v764_v56 = vld [vmem:[%s10887_s14 + $0xc60] sm:$0xff]  ;;  %v883_v57 = vadd.f32 %v393_v51, %v392_v50  ;;  %v758_v59 = vld [vmem:[%s10887_s14 + $0xc30] sm:$0xff] }
  0xa9   : > { %1623 = vadd.xlane.f32.xlu0 %v1282_v46  ;;  %v1266_v58 = vadd.f32 %v1202_v47, %v391_v36  ;;  %v1120_v60 = vadd.f32 %v1056_v48, %v756_v44  ;;  %v1057_v61 = vadd.f32 %v993_v49, %v763_v45  ;;  %v395_v62 = vld [vmem:[%s10887_s14 + $0xd8] sm:$0xff]  ;;  %v528_v63 = vld [vmem:[%s10887_s14 + $0x500] sm:$0xff]  ;;  %v765_v1 = vld [vmem:[%s10887_s14 + $0xc68] sm:$0xff] }
  0xaa   : > { %v1219_v0 = vadd.f32 %v1155_v54, %v526_v42  ;;  %v947_v2 = vadd.f32 %v883_v57, %v394_v52  ;;  %v529_v3 = vld [vmem:[%s10887_s14 + $0x508] sm:$0xff]  ;;  %v530_v4 = vld [vmem:[%s10887_s14 + $0x510] sm:$0xff]  ;;  %v759_v5 = vld [vmem:[%s10887_s14 + $0xc38] sm:$0xff] }
  0xab   : > { %1591 = vadd.xlane.f32.xlu1 %v1266_v58  ;;  %v1184_v6 = vadd.f32 %v1120_v60, %v757_v55  ;;  %v766_v7 = vld [vmem:[%s10887_s14 + $0xc70] sm:$0xff]  ;;  %v1121_v8 = vadd.f32 %v1057_v61, %v764_v56  ;;  %v396_v9 = vld [vmem:[%s10887_s14 + $0xe0] sm:$0xff]  ;;  %v900_v10 = vadd.f32 %v529_v3, %v528_v63  ;;  %v531_v13 = vld [vmem:[%s10887_s14 + $0x518] sm:$0xff] }
  0xac   : > { %v1283_v11 = vadd.f32 %v1219_v0, %v527_v53  ;;  %v1011_v12 = vadd.f32 %v947_v2, %v395_v62  ;;  %v624_v14 = vld [vmem:[%s10887_s14 + $0x800] sm:$0xff]  ;;  %v625_v15 = vld [vmem:[%s10887_s14 + $0x808] sm:$0xff]  ;;  %v767_v17 = vld [vmem:[%s10887_s14 + $0xc78] sm:$0xff] }
  0xad   : > { %v1248_v16 = vadd.f32 %v1184_v6, %v758_v59  ;;  %v1185_v18 = vadd.f32 %v1121_v8, %v765_v1  ;;  %v397_v19 = vld [vmem:[%s10887_s14 + $0xe8] sm:$0xff]  ;;  %v964_v20 = vadd.f32 %v900_v10, %v530_v4  ;;  %v626_v21 = vld [vmem:[%s10887_s14 + $0x810] sm:$0xff]  ;;  %v912_v22 = vadd.f32 %v625_v15, %v624_v14  ;;  %v532_v25 = vld [vmem:[%s10887_s14 + $0x520] sm:$0xff] }
  0xae   : > { %1625 = vadd.xlane.f32.xlu0 %v1283_v11  ;;  %v398_v23 = vld [vmem:[%s10887_s14 + $0xf0] sm:$0xff]  ;;  %v1075_v24 = vadd.f32 %v1011_v12, %v396_v9  ;;  %v627_v26 = vld [vmem:[%s10887_s14 + $0x818] sm:$0xff]  ;;  %v632_v31 = vld [vmem:[%s10887_s14 + $0x840] sm:$0xff] }
  0xaf   : > { %v1312_v27 = vadd.f32 %v1248_v16, %v759_v5  ;;  %v1249_v28 = vadd.f32 %v1185_v18, %v766_v7  ;;  %v1028_v29 = vadd.f32 %v964_v20, %v531_v13  ;;  %v976_v30 = vadd.f32 %v912_v22, %v626_v21  ;;  %v633_v32 = vld [vmem:[%s10887_s14 + $0x848] sm:$0xff]  ;;  %v634_v33 = vld [vmem:[%s10887_s14 + $0x850] sm:$0xff]  ;;  %v399_v34 = vld [vmem:[%s10887_s14 + $0xf8] sm:$0xff] }
  0xb0   : > { %v1139_v35 = vadd.f32 %v1075_v24, %v397_v19  ;;  %v533_v36 = vld [vmem:[%s10887_s14 + $0x528] sm:$0xff]  ;;  %v628_v37 = vld [vmem:[%s10887_s14 + $0x820] sm:$0xff]  ;;  %v913_v38 = vadd.f32 %v633_v32, %v632_v31  ;;  %v534_v40 = vld [vmem:[%s10887_s14 + $0x530] sm:$0xff] }
  0xb1   : > { %1683 = vadd.xlane.f32.xlu1 %v1312_v27  ;;  %v1313_v39 = vadd.f32 %v1249_v28, %v767_v17  ;;  %v1092_v41 = vadd.f32 %v1028_v29, %v532_v25  ;;  %v1040_v42 = vadd.f32 %v976_v30, %v627_v26  ;;  %v635_v43 = vld [vmem:[%s10887_s14 + $0x858] sm:$0xff]  ;;  %v768_v44 = vld [vmem:[%s10887_s14 + $0xc80] sm:$0xff]  ;;  %v629_v46 = vld [vmem:[%s10887_s14 + $0x828] sm:$0xff] }
  0xb2   : > { %v1203_v45 = vadd.f32 %v1139_v35, %v398_v23  ;;  %v977_v47 = vadd.f32 %v913_v38, %v634_v33  ;;  %v769_v48 = vld [vmem:[%s10887_s14 + $0xc88] sm:$0xff]  ;;  %v770_v49 = vld [vmem:[%s10887_s14 + $0xc90] sm:$0xff]  ;;  %v535_v50 = vld [vmem:[%s10887_s14 + $0x538] sm:$0xff] }
  0xb3   : > { %1685 = vadd.xlane.f32.xlu0 %v1313_v39  ;;  %v1156_v51 = vadd.f32 %v1092_v41, %v533_v36  ;;  %v630_v52 = vld [vmem:[%s10887_s14 + $0x830] sm:$0xff]  ;;  %v1104_v53 = vadd.f32 %v1040_v42, %v628_v37  ;;  %v636_v54 = vld [vmem:[%s10887_s14 + $0x860] sm:$0xff]  ;;  %v930_v55 = vadd.f32 %v769_v48, %v768_v44  ;;  %v771_v58 = vld [vmem:[%s10887_s14 + $0xc98] sm:$0xff] }
  0xb4   : > { %v1267_v56 = vadd.f32 %v1203_v45, %v399_v34  ;;  %v1041_v57 = vadd.f32 %v977_v47, %v635_v43  ;;  %v400_v59 = vld [vmem:[%s10887_s14 + $0x100] sm:$0xff]  ;;  %v401_v60 = vld [vmem:[%s10887_s14 + $0x108] sm:$0xff]  ;;  %v631_v62 = vld [vmem:[%s10887_s14 + $0x838] sm:$0xff] }
  0xb5   : > { %v1220_v61 = vadd.f32 %v1156_v51, %v534_v40  ;;  %v1168_v63 = vadd.f32 %v1104_v53, %v629_v46  ;;  %v637_v0 = vld [vmem:[%s10887_s14 + $0x868] sm:$0xff]  ;;  %v994_v1 = vadd.f32 %v930_v55, %v770_v49  ;;  %v402_v2 = vld [vmem:[%s10887_s14 + $0x110] sm:$0xff]  ;;  %v884_v3 = vadd.f32 %v401_v60, %v400_v59  ;;  %v772_v6 = vld [vmem:[%s10887_s14 + $0xca0] sm:$0xff] }
  0xb6   : > { %1593 = vadd.xlane.f32.xlu1 %v1267_v56  ;;  %v638_v4 = vld [vmem:[%s10887_s14 + $0x870] sm:$0xff]  ;;  %v1105_v5 = vadd.f32 %v1041_v57, %v636_v54  ;;  %v403_v7 = vld [vmem:[%s10887_s14 + $0x118] sm:$0xff]  ;;  %v536_v12 = vld [vmem:[%s10887_s14 + $0x540] sm:$0xff] }
  0xb7   : > { %v1284_v8 = vadd.f32 %v1220_v61, %v535_v50  ;;  %v1232_v9 = vadd.f32 %v1168_v63, %v630_v52  ;;  %v1058_v10 = vadd.f32 %v994_v1, %v771_v58  ;;  %v948_v11 = vadd.f32 %v884_v3, %v402_v2  ;;  %v537_v13 = vld [vmem:[%s10887_s14 + $0x548] sm:$0xff]  ;;  %v538_v14 = vld [vmem:[%s10887_s14 + $0x550] sm:$0xff]  ;;  %v639_v15 = vld [vmem:[%s10887_s14 + $0x878] sm:$0xff] }
  0xb8   : > { %v1169_v16 = vadd.f32 %v1105_v5, %v637_v0  ;;  %v773_v17 = vld [vmem:[%s10887_s14 + $0xca8] sm:$0xff]  ;;  %v404_v18 = vld [vmem:[%s10887_s14 + $0x120] sm:$0xff]  ;;  %v901_v19 = vadd.f32 %v537_v13, %v536_v12  ;;  %v774_v21 = vld [vmem:[%s10887_s14 + $0xcb0] sm:$0xff] }
  0xb9   : > { %1627 = vadd.xlane.f32.xlu0 %v1284_v8  ;;  %v1296_v20 = vadd.f32 %v1232_v9, %v631_v62  ;;  %v1122_v22 = vadd.f32 %v1058_v10, %v772_v6  ;;  %v1012_v23 = vadd.f32 %v948_v11, %v403_v7  ;;  %v539_v24 = vld [vmem:[%s10887_s14 + $0x558] sm:$0xff]  ;;  %v640_v25 = vld [vmem:[%s10887_s14 + $0x880] sm:$0xff]  ;;  %v405_v27 = vld [vmem:[%s10887_s14 + $0x128] sm:$0xff] }
  0xba   : > { %v1233_v26 = vadd.f32 %v1169_v16, %v638_v4  ;;  %v965_v28 = vadd.f32 %v901_v19, %v538_v14  ;;  %v641_v29 = vld [vmem:[%s10887_s14 + $0x888] sm:$0xff]  ;;  %v642_v30 = vld [vmem:[%s10887_s14 + $0x890] sm:$0xff]  ;;  %v775_v31 = vld [vmem:[%s10887_s14 + $0xcb8] sm:$0xff] }
  0xbb   : > { %1651 = vadd.xlane.f32.xlu1 %v1296_v20  ;;  %v1186_v32 = vadd.f32 %v1122_v22, %v773_v17  ;;  %v406_v33 = vld [vmem:[%s10887_s14 + $0x130] sm:$0xff]  ;;  %v1076_v34 = vadd.f32 %v1012_v23, %v404_v18  ;;  %v540_v35 = vld [vmem:[%s10887_s14 + $0x560] sm:$0xff]  ;;  %v914_v36 = vadd.f32 %v641_v29, %v640_v25  ;;  %v643_v39 = vld [vmem:[%s10887_s14 + $0x898] sm:$0xff] }
  0xbc   : > { %v1297_v37 = vadd.f32 %v1233_v26, %v639_v15  ;;  %v1029_v38 = vadd.f32 %v965_v28, %v539_v24  ;;  %v776_v40 = vld [vmem:[%s10887_s14 + $0xcc0] sm:$0xff]  ;;  %v777_v41 = vld [vmem:[%s10887_s14 + $0xcc8] sm:$0xff]  ;;  %v407_v43 = vld [vmem:[%s10887_s14 + $0x138] sm:$0xff] }
  0xbd   : > { %v1250_v42 = vadd.f32 %v1186_v32, %v774_v21  ;;  %v1140_v44 = vadd.f32 %v1076_v34, %v405_v27  ;;  %v541_v45 = vld [vmem:[%s10887_s14 + $0x568] sm:$0xff]  ;;  %v978_v46 = vadd.f32 %v914_v36, %v642_v30  ;;  %v778_v47 = vld [vmem:[%s10887_s14 + $0xcd0] sm:$0xff]  ;;  %v931_v48 = vadd.f32 %v777_v41, %v776_v40  ;;  %v644_v51 = vld [vmem:[%s10887_s14 + $0x8a0] sm:$0xff] }
  0xbe   : > { %1653 = vadd.xlane.f32.xlu0 %v1297_v37  ;;  %v542_v49 = vld [vmem:[%s10887_s14 + $0x570] sm:$0xff]  ;;  %v1093_v50 = vadd.f32 %v1029_v38, %v540_v35  ;;  %v779_v52 = vld [vmem:[%s10887_s14 + $0xcd8] sm:$0xff]  ;;  %v408_v57 = vld [vmem:[%s10887_s14 + $0x140] sm:$0xff] }
  0xbf   : > { %v1314_v53 = vadd.f32 %v1250_v42, %v775_v31  ;;  %v1204_v54 = vadd.f32 %v1140_v44, %v406_v33  ;;  %v1042_v55 = vadd.f32 %v978_v46, %v643_v39  ;;  %v995_v56 = vadd.f32 %v931_v48, %v778_v47  ;;  %v409_v58 = vld [vmem:[%s10887_s14 + $0x148] sm:$0xff]  ;;  %v410_v59 = vld [vmem:[%s10887_s14 + $0x150] sm:$0xff]  ;;  %v543_v60 = vld [vmem:[%s10887_s14 + $0x578] sm:$0xff] }
  0xc0   : > { %v1157_v61 = vadd.f32 %v1093_v50, %v541_v45  ;;  %v645_v62 = vld [vmem:[%s10887_s14 + $0x8a8] sm:$0xff]  ;;  %v780_v63 = vld [vmem:[%s10887_s14 + $0xce0] sm:$0xff]  ;;  %v885_v0 = vadd.f32 %v409_v58, %v408_v57  ;;  %v646_v2 = vld [vmem:[%s10887_s14 + $0x8b0] sm:$0xff] }
  0xc1   : > { %1687 = vadd.xlane.f32.xlu1 %v1314_v53  ;;  %v1268_v1 = vadd.f32 %v1204_v54, %v407_v43  ;;  %v1106_v3 = vadd.f32 %v1042_v55, %v644_v51  ;;  %v1059_v4 = vadd.f32 %v995_v56, %v779_v52  ;;  %v411_v5 = vld [vmem:[%s10887_s14 + $0x158] sm:$0xff]  ;;  %v544_v6 = vld [vmem:[%s10887_s14 + $0x580] sm:$0xff]  ;;  %v781_v8 = vld [vmem:[%s10887_s14 + $0xce8] sm:$0xff] }
  0xc2   : > { %v1221_v7 = vadd.f32 %v1157_v61, %v542_v49  ;;  %v949_v9 = vadd.f32 %v885_v0, %v410_v59  ;;  %v545_v10 = vld [vmem:[%s10887_s14 + $0x588] sm:$0xff]  ;;  %v546_v11 = vld [vmem:[%s10887_s14 + $0x590] sm:$0xff]  ;;  %v647_v12 = vld [vmem:[%s10887_s14 + $0x8b8] sm:$0xff] }
  0xc3   : > { %1595 = vadd.xlane.f32.xlu0 %v1268_v1  ;;  %v1170_v13 = vadd.f32 %v1106_v3, %v645_v62  ;;  %v782_v14 = vld [vmem:[%s10887_s14 + $0xcf0] sm:$0xff]  ;;  %v1123_v15 = vadd.f32 %v1059_v4, %v780_v63  ;;  %v412_v16 = vld [vmem:[%s10887_s14 + $0x160] sm:$0xff]  ;;  %v902_v17 = vadd.f32 %v545_v10, %v544_v6  ;;  %v547_v20 = vld [vmem:[%s10887_s14 + $0x598] sm:$0xff] }
  0xc4   : > { %v1285_v18 = vadd.f32 %v1221_v7, %v543_v60  ;;  %v1013_v19 = vadd.f32 %v949_v9, %v411_v5  ;;  %v648_v21 = vld [vmem:[%s10887_s14 + $0x8c0] sm:$0xff]  ;;  %v649_v22 = vld [vmem:[%s10887_s14 + $0x8c8] sm:$0xff]  ;;  %v783_v24 = vld [vmem:[%s10887_s14 + $0xcf8] sm:$0xff] }
  0xc5   : > { %v1234_v23 = vadd.f32 %v1170_v13, %v646_v2  ;;  %v1187_v25 = vadd.f32 %v1123_v15, %v781_v8  ;;  %v413_v26 = vld [vmem:[%s10887_s14 + $0x168] sm:$0xff]  ;;  %v966_v27 = vadd.f32 %v902_v17, %v546_v11  ;;  %v650_v28 = vld [vmem:[%s10887_s14 + $0x8d0] sm:$0xff]  ;;  %v915_v29 = vadd.f32 %v649_v22, %v648_v21  ;;  %v548_v32 = vld [vmem:[%s10887_s14 + $0x5a0] sm:$0xff] }
  0xc6   : > { %1629 = vadd.xlane.f32.xlu1 %v1285_v18  ;;  %v414_v30 = vld [vmem:[%s10887_s14 + $0x170] sm:$0xff]  ;;  %v1077_v31 = vadd.f32 %v1013_v19, %v412_v16  ;;  %v651_v33 = vld [vmem:[%s10887_s14 + $0x8d8] sm:$0xff]  ;;  %v784_v38 = vld [vmem:[%s10887_s14 + $0xd00] sm:$0xff] }
  0xc7   : > { %v1298_v34 = vadd.f32 %v1234_v23, %v647_v12  ;;  %v1251_v35 = vadd.f32 %v1187_v25, %v782_v14  ;;  %v1030_v36 = vadd.f32 %v966_v27, %v547_v20  ;;  %v979_v37 = vadd.f32 %v915_v29, %v650_v28  ;;  %v785_v39 = vld [vmem:[%s10887_s14 + $0xd08] sm:$0xff]  ;;  %v786_v40 = vld [vmem:[%s10887_s14 + $0xd10] sm:$0xff]  ;;  %v415_v41 = vld [vmem:[%s10887_s14 + $0x178] sm:$0xff] }
  0xc8   : > { %v1141_v42 = vadd.f32 %v1077_v31, %v413_v26  ;;  %v549_v43 = vld [vmem:[%s10887_s14 + $0x5a8] sm:$0xff]  ;;  %v652_v44 = vld [vmem:[%s10887_s14 + $0x8e0] sm:$0xff]  ;;  %v932_v45 = vadd.f32 %v785_v39, %v784_v38  ;;  %v550_v47 = vld [vmem:[%s10887_s14 + $0x5b0] sm:$0xff] }
  0xc9   : > { %1655 = vadd.xlane.f32.xlu0 %v1298_v34  ;;  %v1315_v46 = vadd.f32 %v1251_v35, %v783_v24  ;;  %v1094_v48 = vadd.f32 %v1030_v36, %v548_v32  ;;  %v1043_v49 = vadd.f32 %v979_v37, %v651_v33  ;;  %v787_v50 = vld [vmem:[%s10887_s14 + $0xd18] sm:$0xff]  ;;  %v416_v51 = vld [vmem:[%s10887_s14 + $0x180] sm:$0xff]  ;;  %v653_v53 = vld [vmem:[%s10887_s14 + $0x8e8] sm:$0xff] }
  0xca   : > { %v1205_v52 = vadd.f32 %v1141_v42, %v414_v30  ;;  %v996_v54 = vadd.f32 %v932_v45, %v786_v40  ;;  %v417_v55 = vld [vmem:[%s10887_s14 + $0x188] sm:$0xff]  ;;  %v418_v56 = vld [vmem:[%s10887_s14 + $0x190] sm:$0xff]  ;;  %v551_v57 = vld [vmem:[%s10887_s14 + $0x5b8] sm:$0xff] }
  0xcb   : > { %1689 = vadd.xlane.f32.xlu1 %v1315_v46  ;;  %v1158_v58 = vadd.f32 %v1094_v48, %v549_v43  ;;  %v654_v59 = vld [vmem:[%s10887_s14 + $0x8f0] sm:$0xff]  ;;  %v1107_v60 = vadd.f32 %v1043_v49, %v652_v44  ;;  %v788_v61 = vld [vmem:[%s10887_s14 + $0xd20] sm:$0xff]  ;;  %v886_v62 = vadd.f32 %v417_v55, %v416_v51  ;;  %v419_v1 = vld [vmem:[%s10887_s14 + $0x198] sm:$0xff] }
  0xcc   : > { %v1269_v63 = vadd.f32 %v1205_v52, %v415_v41  ;;  %v1060_v0 = vadd.f32 %v996_v54, %v787_v50  ;;  %v552_v2 = vld [vmem:[%s10887_s14 + $0x5c0] sm:$0xff]  ;;  %v553_v3 = vld [vmem:[%s10887_s14 + $0x5c8] sm:$0xff]  ;;  %v655_v5 = vld [vmem:[%s10887_s14 + $0x8f8] sm:$0xff] }
  0xcd   : > { %v1222_v4 = vadd.f32 %v1158_v58, %v550_v47  ;;  %v1171_v6 = vadd.f32 %v1107_v60, %v653_v53  ;;  %v789_v7 = vld [vmem:[%s10887_s14 + $0xd28] sm:$0xff]  ;;  %v950_v8 = vadd.f32 %v886_v62, %v418_v56  ;;  %v554_v9 = vld [vmem:[%s10887_s14 + $0x5d0] sm:$0xff]  ;;  %v903_v10 = vadd.f32 %v553_v3, %v552_v2  ;;  %v420_v13 = vld [vmem:[%s10887_s14 + $0x1a0] sm:$0xff] }
  0xce   : > { %1597 = vadd.xlane.f32.xlu0 %v1269_v63  ;;  %v790_v11 = vld [vmem:[%s10887_s14 + $0xd30] sm:$0xff]  ;;  %v1124_v12 = vadd.f32 %v1060_v0, %v788_v61  ;;  %v555_v14 = vld [vmem:[%s10887_s14 + $0x5d8] sm:$0xff]  ;;  %v656_v19 = vld [vmem:[%s10887_s14 + $0x900] sm:$0xff] }
  0xcf   : > { %v1286_v15 = vadd.f32 %v1222_v4, %v551_v57  ;;  %v1235_v16 = vadd.f32 %v1171_v6, %v654_v59  ;;  %v1014_v17 = vadd.f32 %v950_v8, %v419_v1  ;;  %v967_v18 = vadd.f32 %v903_v10, %v554_v9  ;;  %v657_v20 = vld [vmem:[%s10887_s14 + $0x908] sm:$0xff]  ;;  %v658_v21 = vld [vmem:[%s10887_s14 + $0x910] sm:$0xff]  ;;  %v791_v22 = vld [vmem:[%s10887_s14 + $0xd38] sm:$0xff] }
  0xd0   : > { %v1188_v23 = vadd.f32 %v1124_v12, %v789_v7  ;;  %v421_v24 = vld [vmem:[%s10887_s14 + $0x1a8] sm:$0xff]  ;;  %v556_v25 = vld [vmem:[%s10887_s14 + $0x5e0] sm:$0xff]  ;;  %v916_v26 = vadd.f32 %v657_v20, %v656_v19  ;;  %v422_v28 = vld [vmem:[%s10887_s14 + $0x1b0] sm:$0xff] }
  0xd1   : > { %1631 = vadd.xlane.f32.xlu1 %v1286_v15  ;;  %v1299_v27 = vadd.f32 %v1235_v16, %v655_v5  ;;  %v1078_v29 = vadd.f32 %v1014_v17, %v420_v13  ;;  %v1031_v30 = vadd.f32 %v967_v18, %v555_v14  ;;  %v659_v31 = vld [vmem:[%s10887_s14 + $0x918] sm:$0xff]  ;;  %v792_v32 = vld [vmem:[%s10887_s14 + $0xd40] sm:$0xff]  ;;  %v557_v34 = vld [vmem:[%s10887_s14 + $0x5e8] sm:$0xff] }
  0xd2   : > { %v1252_v33 = vadd.f32 %v1188_v23, %v790_v11  ;;  %v980_v35 = vadd.f32 %v916_v26, %v658_v21  ;;  %v793_v36 = vld [vmem:[%s10887_s14 + $0xd48] sm:$0xff]  ;;  %v794_v37 = vld [vmem:[%s10887_s14 + $0xd50] sm:$0xff]  ;;  %v423_v38 = vld [vmem:[%s10887_s14 + $0x1b8] sm:$0xff] }
  0xd3   : > { %1657 = vadd.xlane.f32.xlu0 %v1299_v27  ;;  %v1142_v39 = vadd.f32 %v1078_v29, %v421_v24  ;;  %v558_v40 = vld [vmem:[%s10887_s14 + $0x5f0] sm:$0xff]  ;;  %v1095_v41 = vadd.f32 %v1031_v30, %v556_v25  ;;  %v660_v42 = vld [vmem:[%s10887_s14 + $0x920] sm:$0xff]  ;;  %v933_v43 = vadd.f32 %v793_v36, %v792_v32  ;;  %v795_v46 = vld [vmem:[%s10887_s14 + $0xd58] sm:$0xff] }
  0xd4   : > { %v1316_v44 = vadd.f32 %v1252_v33, %v791_v22  ;;  %v1044_v45 = vadd.f32 %v980_v35, %v659_v31  ;;  %v424_v47 = vld [vmem:[%s10887_s14 + $0x1c0] sm:$0xff]  ;;  %v425_v48 = vld [vmem:[%s10887_s14 + $0x1c8] sm:$0xff]  ;;  %v559_v50 = vld [vmem:[%s10887_s14 + $0x5f8] sm:$0xff] }
  0xd5   : > { %v1206_v49 = vadd.f32 %v1142_v39, %v422_v28  ;;  %v1159_v51 = vadd.f32 %v1095_v41, %v557_v34  ;;  %v661_v52 = vld [vmem:[%s10887_s14 + $0x928] sm:$0xff]  ;;  %v997_v53 = vadd.f32 %v933_v43, %v794_v37  ;;  %v426_v54 = vld [vmem:[%s10887_s14 + $0x1d0] sm:$0xff]  ;;  %v887_v55 = vadd.f32 %v425_v48, %v424_v47  ;;  %v796_v58 = vld [vmem:[%s10887_s14 + $0xd60] sm:$0xff] }
  0xd6   : > { %1691 = vadd.xlane.f32.xlu1 %v1316_v44  ;;  %v662_v56 = vld [vmem:[%s10887_s14 + $0x930] sm:$0xff]  ;;  %v1108_v57 = vadd.f32 %v1044_v45, %v660_v42  ;;  %v427_v59 = vld [vmem:[%s10887_s14 + $0x1d8] sm:$0xff]  ;;  %v560_v0 = vld [vmem:[%s10887_s14 + $0x600] sm:$0xff] }
  0xd7   : > { %v1270_v60 = vadd.f32 %v1206_v49, %v423_v38  ;;  %v1223_v61 = vadd.f32 %v1159_v51, %v558_v40  ;;  %v1061_v62 = vadd.f32 %v997_v53, %v795_v46  ;;  %v951_v63 = vadd.f32 %v887_v55, %v426_v54  ;;  %v561_v1 = vld [vmem:[%s10887_s14 + $0x608] sm:$0xff]  ;;  %v562_v2 = vld [vmem:[%s10887_s14 + $0x610] sm:$0xff]  ;;  %v663_v3 = vld [vmem:[%s10887_s14 + $0x938] sm:$0xff] }
  0xd8   : > { %v1172_v4 = vadd.f32 %v1108_v57, %v661_v52  ;;  %v797_v5 = vld [vmem:[%s10887_s14 + $0xd68] sm:$0xff]  ;;  %v428_v6 = vld [vmem:[%s10887_s14 + $0x1e0] sm:$0xff]  ;;  %v904_v7 = vadd.f32 %v561_v1, %v560_v0  ;;  %v798_v9 = vld [vmem:[%s10887_s14 + $0xd70] sm:$0xff] }
  0xd9   : > { %1599 = vadd.xlane.f32.xlu0 %v1270_v60  ;;  %v1287_v8 = vadd.f32 %v1223_v61, %v559_v50  ;;  %v1125_v10 = vadd.f32 %v1061_v62, %v796_v58  ;;  %v1015_v11 = vadd.f32 %v951_v63, %v427_v59  ;;  %v563_v12 = vld [vmem:[%s10887_s14 + $0x618] sm:$0xff]  ;;  %v664_v13 = vld [vmem:[%s10887_s14 + $0x940] sm:$0xff]  ;;  %v429_v15 = vld [vmem:[%s10887_s14 + $0x1e8] sm:$0xff] }
  0xda   : > { %v1236_v14 = vadd.f32 %v1172_v4, %v662_v56  ;;  %v968_v16 = vadd.f32 %v904_v7, %v562_v2  ;;  %v665_v17 = vld [vmem:[%s10887_s14 + $0x948] sm:$0xff]  ;;  %v666_v18 = vld [vmem:[%s10887_s14 + $0x950] sm:$0xff]  ;;  %v799_v19 = vld [vmem:[%s10887_s14 + $0xd78] sm:$0xff] }
  0xdb   : > { %1633 = vadd.xlane.f32.xlu1 %v1287_v8  ;;  %v1189_v20 = vadd.f32 %v1125_v10, %v797_v5  ;;  %v430_v21 = vld [vmem:[%s10887_s14 + $0x1f0] sm:$0xff]  ;;  %v1079_v22 = vadd.f32 %v1015_v11, %v428_v6  ;;  %v564_v23 = vld [vmem:[%s10887_s14 + $0x620] sm:$0xff]  ;;  %v917_v24 = vadd.f32 %v665_v17, %v664_v13  ;;  %v667_v27 = vld [vmem:[%s10887_s14 + $0x958] sm:$0xff] }
  0xdc   : > { %v1300_v25 = vadd.f32 %v1236_v14, %v663_v3  ;;  %v1032_v26 = vadd.f32 %v968_v16, %v563_v12  ;;  %v800_v28 = vld [vmem:[%s10887_s14 + $0xd80] sm:$0xff]  ;;  %v801_v29 = vld [vmem:[%s10887_s14 + $0xd88] sm:$0xff]  ;;  %v431_v31 = vld [vmem:[%s10887_s14 + $0x1f8] sm:$0xff] }
  0xdd   : > { %v1253_v30 = vadd.f32 %v1189_v20, %v798_v9  ;;  %v1143_v32 = vadd.f32 %v1079_v22, %v429_v15  ;;  %v565_v33 = vld [vmem:[%s10887_s14 + $0x628] sm:$0xff]  ;;  %v981_v34 = vadd.f32 %v917_v24, %v666_v18  ;;  %v802_v35 = vld [vmem:[%s10887_s14 + $0xd90] sm:$0xff]  ;;  %v934_v36 = vadd.f32 %v801_v29, %v800_v28  ;;  %v668_v39 = vld [vmem:[%s10887_s14 + $0x960] sm:$0xff] }
  0xde   : > { %1659 = vadd.xlane.f32.xlu0 %v1300_v25  ;;  %v566_v37 = vld [vmem:[%s10887_s14 + $0x630] sm:$0xff]  ;;  %v1096_v38 = vadd.f32 %v1032_v26, %v564_v23  ;;  %v803_v40 = vld [vmem:[%s10887_s14 + $0xd98] sm:$0xff]  ;;  %v432_v45 = vld [vmem:[%s10887_s14 + $0x200] sm:$0xff] }
  0xdf   : > { %v1317_v41 = vadd.f32 %v1253_v30, %v799_v19  ;;  %v1207_v42 = vadd.f32 %v1143_v32, %v430_v21  ;;  %v1045_v43 = vadd.f32 %v981_v34, %v667_v27  ;;  %v998_v44 = vadd.f32 %v934_v36, %v802_v35  ;;  %v433_v46 = vld [vmem:[%s10887_s14 + $0x208] sm:$0xff]  ;;  %v434_v47 = vld [vmem:[%s10887_s14 + $0x210] sm:$0xff]  ;;  %v567_v48 = vld [vmem:[%s10887_s14 + $0x638] sm:$0xff] }
  0xe0   : > { %v1160_v49 = vadd.f32 %v1096_v38, %v565_v33  ;;  %v669_v50 = vld [vmem:[%s10887_s14 + $0x968] sm:$0xff]  ;;  %v804_v51 = vld [vmem:[%s10887_s14 + $0xda0] sm:$0xff]  ;;  %v888_v52 = vadd.f32 %v433_v46, %v432_v45  ;;  %v670_v54 = vld [vmem:[%s10887_s14 + $0x970] sm:$0xff] }
  0xe1   : > { %1693 = vadd.xlane.f32.xlu1 %v1317_v41  ;;  %v1271_v53 = vadd.f32 %v1207_v42, %v431_v31  ;;  %v1109_v55 = vadd.f32 %v1045_v43, %v668_v39  ;;  %v1062_v56 = vadd.f32 %v998_v44, %v803_v40  ;;  %v435_v57 = vld [vmem:[%s10887_s14 + $0x218] sm:$0xff]  ;;  %v568_v58 = vld [vmem:[%s10887_s14 + $0x640] sm:$0xff]  ;;  %v805_v60 = vld [vmem:[%s10887_s14 + $0xda8] sm:$0xff] }
  0xe2   : > { %v1224_v59 = vadd.f32 %v1160_v49, %v566_v37  ;;  %v952_v61 = vadd.f32 %v888_v52, %v434_v47  ;;  %v569_v62 = vld [vmem:[%s10887_s14 + $0x648] sm:$0xff]  ;;  %v570_v63 = vld [vmem:[%s10887_s14 + $0x650] sm:$0xff]  ;;  %v671_v0 = vld [vmem:[%s10887_s14 + $0x978] sm:$0xff] }
  0xe3   : > { %1601 = vadd.xlane.f32.xlu0 %v1271_v53  ;;  %v1173_v1 = vadd.f32 %v1109_v55, %v669_v50  ;;  %v806_v2 = vld [vmem:[%s10887_s14 + $0xdb0] sm:$0xff]  ;;  %v1126_v3 = vadd.f32 %v1062_v56, %v804_v51  ;;  %v436_v4 = vld [vmem:[%s10887_s14 + $0x220] sm:$0xff]  ;;  %v905_v5 = vadd.f32 %v569_v62, %v568_v58  ;;  %v571_v8 = vld [vmem:[%s10887_s14 + $0x658] sm:$0xff] }
  0xe4   : > { %v1288_v6 = vadd.f32 %v1224_v59, %v567_v48  ;;  %v1016_v7 = vadd.f32 %v952_v61, %v435_v57  ;;  %v672_v9 = vld [vmem:[%s10887_s14 + $0x980] sm:$0xff]  ;;  %v673_v10 = vld [vmem:[%s10887_s14 + $0x988] sm:$0xff]  ;;  %v807_v12 = vld [vmem:[%s10887_s14 + $0xdb8] sm:$0xff] }
  0xe5   : > { %v1237_v11 = vadd.f32 %v1173_v1, %v670_v54  ;;  %v1190_v13 = vadd.f32 %v1126_v3, %v805_v60  ;;  %v437_v14 = vld [vmem:[%s10887_s14 + $0x228] sm:$0xff]  ;;  %v969_v15 = vadd.f32 %v905_v5, %v570_v63  ;;  %v674_v16 = vld [vmem:[%s10887_s14 + $0x990] sm:$0xff]  ;;  %v918_v17 = vadd.f32 %v673_v10, %v672_v9  ;;  %v572_v20 = vld [vmem:[%s10887_s14 + $0x660] sm:$0xff] }
  0xe6   : > { %1635 = vadd.xlane.f32.xlu1 %v1288_v6  ;;  %v438_v18 = vld [vmem:[%s10887_s14 + $0x230] sm:$0xff]  ;;  %v1080_v19 = vadd.f32 %v1016_v7, %v436_v4  ;;  %v675_v21 = vld [vmem:[%s10887_s14 + $0x998] sm:$0xff]  ;;  %v808_v26 = vld [vmem:[%s10887_s14 + $0xdc0] sm:$0xff] }
  0xe7   : > { %v1301_v22 = vadd.f32 %v1237_v11, %v671_v0  ;;  %v1254_v23 = vadd.f32 %v1190_v13, %v806_v2  ;;  %v1033_v24 = vadd.f32 %v969_v15, %v571_v8  ;;  %v982_v25 = vadd.f32 %v918_v17, %v674_v16  ;;  %v809_v27 = vld [vmem:[%s10887_s14 + $0xdc8] sm:$0xff]  ;;  %v810_v28 = vld [vmem:[%s10887_s14 + $0xdd0] sm:$0xff]  ;;  %v439_v29 = vld [vmem:[%s10887_s14 + $0x238] sm:$0xff] }
  0xe8   : > { %v1144_v30 = vadd.f32 %v1080_v19, %v437_v14  ;;  %v573_v31 = vld [vmem:[%s10887_s14 + $0x668] sm:$0xff]  ;;  %v676_v32 = vld [vmem:[%s10887_s14 + $0x9a0] sm:$0xff]  ;;  %v935_v33 = vadd.f32 %v809_v27, %v808_v26  ;;  %v574_v35 = vld [vmem:[%s10887_s14 + $0x670] sm:$0xff] }
  0xe9   : > { %1661 = vadd.xlane.f32.xlu0 %v1301_v22  ;;  %v1318_v34 = vadd.f32 %v1254_v23, %v807_v12  ;;  %v1097_v36 = vadd.f32 %v1033_v24, %v572_v20  ;;  %v1046_v37 = vadd.f32 %v982_v25, %v675_v21  ;;  %v811_v38 = vld [vmem:[%s10887_s14 + $0xdd8] sm:$0xff]  ;;  %v440_v39 = vld [vmem:[%s10887_s14 + $0x240] sm:$0xff]  ;;  %v677_v41 = vld [vmem:[%s10887_s14 + $0x9a8] sm:$0xff] }
  0xea   : > { %v1208_v40 = vadd.f32 %v1144_v30, %v438_v18  ;;  %v999_v42 = vadd.f32 %v935_v33, %v810_v28  ;;  %v441_v43 = vld [vmem:[%s10887_s14 + $0x248] sm:$0xff]  ;;  %v442_v44 = vld [vmem:[%s10887_s14 + $0x250] sm:$0xff]  ;;  %v575_v45 = vld [vmem:[%s10887_s14 + $0x678] sm:$0xff] }
  0xeb   : > { %1695 = vadd.xlane.f32.xlu1 %v1318_v34  ;;  %v1161_v46 = vadd.f32 %v1097_v36, %v573_v31  ;;  %v678_v47 = vld [vmem:[%s10887_s14 + $0x9b0] sm:$0xff]  ;;  %v1110_v48 = vadd.f32 %v1046_v37, %v676_v32  ;;  %v812_v49 = vld [vmem:[%s10887_s14 + $0xde0] sm:$0xff]  ;;  %v889_v50 = vadd.f32 %v441_v43, %v440_v39  ;;  %v443_v53 = vld [vmem:[%s10887_s14 + $0x258] sm:$0xff] }
  0xec   : > { %v1272_v51 = vadd.f32 %v1208_v40, %v439_v29  ;;  %v1063_v52 = vadd.f32 %v999_v42, %v811_v38  ;;  %v576_v54 = vld [vmem:[%s10887_s14 + $0x680] sm:$0xff]  ;;  %v577_v55 = vld [vmem:[%s10887_s14 + $0x688] sm:$0xff]  ;;  %v679_v57 = vld [vmem:[%s10887_s14 + $0x9b8] sm:$0xff] }
  0xed   : > { %v1225_v56 = vadd.f32 %v1161_v46, %v574_v35  ;;  %v1174_v58 = vadd.f32 %v1110_v48, %v677_v41  ;;  %v813_v59 = vld [vmem:[%s10887_s14 + $0xde8] sm:$0xff]  ;;  %v953_v60 = vadd.f32 %v889_v50, %v442_v44  ;;  %v578_v61 = vld [vmem:[%s10887_s14 + $0x690] sm:$0xff]  ;;  %v906_v62 = vadd.f32 %v577_v55, %v576_v54  ;;  %v444_v1 = vld [vmem:[%s10887_s14 + $0x260] sm:$0xff] }
  0xee   : > { %1603 = vadd.xlane.f32.xlu0 %v1272_v51  ;;  %v814_v63 = vld [vmem:[%s10887_s14 + $0xdf0] sm:$0xff]  ;;  %v1127_v0 = vadd.f32 %v1063_v52, %v812_v49  ;;  %v579_v2 = vld [vmem:[%s10887_s14 + $0x698] sm:$0xff]  ;;  %v680_v7 = vld [vmem:[%s10887_s14 + $0x9c0] sm:$0xff] }
  0xef   : > { %v1289_v3 = vadd.f32 %v1225_v56, %v575_v45  ;;  %v1238_v4 = vadd.f32 %v1174_v58, %v678_v47  ;;  %v1017_v5 = vadd.f32 %v953_v60, %v443_v53  ;;  %v970_v6 = vadd.f32 %v906_v62, %v578_v61  ;;  %v681_v8 = vld [vmem:[%s10887_s14 + $0x9c8] sm:$0xff]  ;;  %v682_v9 = vld [vmem:[%s10887_s14 + $0x9d0] sm:$0xff]  ;;  %v815_v10 = vld [vmem:[%s10887_s14 + $0xdf8] sm:$0xff] }
  0xf0   : > { %v1191_v11 = vadd.f32 %v1127_v0, %v813_v59  ;;  %v445_v12 = vld [vmem:[%s10887_s14 + $0x268] sm:$0xff]  ;;  %v580_v13 = vld [vmem:[%s10887_s14 + $0x6a0] sm:$0xff]  ;;  %v919_v14 = vadd.f32 %v681_v8, %v680_v7  ;;  %v446_v16 = vld [vmem:[%s10887_s14 + $0x270] sm:$0xff] }
  0xf1   : > { %1637 = vadd.xlane.f32.xlu1 %v1289_v3  ;;  %v1302_v15 = vadd.f32 %v1238_v4, %v679_v57  ;;  %v1081_v17 = vadd.f32 %v1017_v5, %v444_v1  ;;  %v1034_v18 = vadd.f32 %v970_v6, %v579_v2  ;;  %v683_v19 = vld [vmem:[%s10887_s14 + $0x9d8] sm:$0xff]  ;;  %v816_v20 = vld [vmem:[%s10887_s14 + $0xe00] sm:$0xff]  ;;  %v581_v22 = vld [vmem:[%s10887_s14 + $0x6a8] sm:$0xff] }
  0xf2   : > { %v1255_v21 = vadd.f32 %v1191_v11, %v814_v63  ;;  %v983_v23 = vadd.f32 %v919_v14, %v682_v9  ;;  %v817_v24 = vld [vmem:[%s10887_s14 + $0xe08] sm:$0xff]  ;;  %v818_v25 = vld [vmem:[%s10887_s14 + $0xe10] sm:$0xff]  ;;  %v447_v26 = vld [vmem:[%s10887_s14 + $0x278] sm:$0xff] }
  0xf3   : > { %1663 = vadd.xlane.f32.xlu0 %v1302_v15  ;;  %v1145_v27 = vadd.f32 %v1081_v17, %v445_v12  ;;  %v582_v28 = vld [vmem:[%s10887_s14 + $0x6b0] sm:$0xff]  ;;  %v1098_v29 = vadd.f32 %v1034_v18, %v580_v13  ;;  %v684_v30 = vld [vmem:[%s10887_s14 + $0x9e0] sm:$0xff]  ;;  %v936_v31 = vadd.f32 %v817_v24, %v816_v20  ;;  %v819_v34 = vld [vmem:[%s10887_s14 + $0xe18] sm:$0xff] }
  0xf4   : > { %v1319_v32 = vadd.f32 %v1255_v21, %v815_v10  ;;  %v1047_v33 = vadd.f32 %v983_v23, %v683_v19  ;;  %v448_v35 = vld [vmem:[%s10887_s14 + $0x280] sm:$0xff]  ;;  %v449_v36 = vld [vmem:[%s10887_s14 + $0x288] sm:$0xff]  ;;  %v583_v38 = vld [vmem:[%s10887_s14 + $0x6b8] sm:$0xff] }
  0xf5   : > { %v1209_v37 = vadd.f32 %v1145_v27, %v446_v16  ;;  %v1162_v39 = vadd.f32 %v1098_v29, %v581_v22  ;;  %v685_v40 = vld [vmem:[%s10887_s14 + $0x9e8] sm:$0xff]  ;;  %v1000_v41 = vadd.f32 %v936_v31, %v818_v25  ;;  %v450_v42 = vld [vmem:[%s10887_s14 + $0x290] sm:$0xff]  ;;  %v890_v43 = vadd.f32 %v449_v36, %v448_v35  ;;  %v820_v46 = vld [vmem:[%s10887_s14 + $0xe20] sm:$0xff] }
  0xf6   : > { %1697 = vadd.xlane.f32.xlu1 %v1319_v32  ;;  %v686_v44 = vld [vmem:[%s10887_s14 + $0x9f0] sm:$0xff]  ;;  %v1111_v45 = vadd.f32 %v1047_v33, %v684_v30  ;;  %v451_v47 = vld [vmem:[%s10887_s14 + $0x298] sm:$0xff]  ;;  %v584_v52 = vld [vmem:[%s10887_s14 + $0x6c0] sm:$0xff] }
  0xf7   : > { %v1273_v48 = vadd.f32 %v1209_v37, %v447_v26  ;;  %v1226_v49 = vadd.f32 %v1162_v39, %v582_v28  ;;  %v1064_v50 = vadd.f32 %v1000_v41, %v819_v34  ;;  %v954_v51 = vadd.f32 %v890_v43, %v450_v42  ;;  %v585_v53 = vld [vmem:[%s10887_s14 + $0x6c8] sm:$0xff]  ;;  %v586_v54 = vld [vmem:[%s10887_s14 + $0x6d0] sm:$0xff]  ;;  %v687_v55 = vld [vmem:[%s10887_s14 + $0x9f8] sm:$0xff] }
  0xf8   : > { %v1175_v56 = vadd.f32 %v1111_v45, %v685_v40  ;;  %v821_v57 = vld [vmem:[%s10887_s14 + $0xe28] sm:$0xff]  ;;  %v452_v58 = vld [vmem:[%s10887_s14 + $0x2a0] sm:$0xff]  ;;  %v907_v59 = vadd.f32 %v585_v53, %v584_v52  ;;  %v822_v61 = vld [vmem:[%s10887_s14 + $0xe30] sm:$0xff] }
  0xf9   : > { %1605 = vadd.xlane.f32.xlu0 %v1273_v48  ;;  %v1290_v60 = vadd.f32 %v1226_v49, %v583_v38  ;;  %v1128_v62 = vadd.f32 %v1064_v50, %v820_v46  ;;  %v1018_v63 = vadd.f32 %v954_v51, %v451_v47  ;;  %v587_v0 = vld [vmem:[%s10887_s14 + $0x6d8] sm:$0xff]  ;;  %v688_v1 = vld [vmem:[%s10887_s14 + $0xa00] sm:$0xff]  ;;  %v453_v3 = vld [vmem:[%s10887_s14 + $0x2a8] sm:$0xff] }
  0xfa   : > { %v1239_v2 = vadd.f32 %v1175_v56, %v686_v44  ;;  %v971_v4 = vadd.f32 %v907_v59, %v586_v54  ;;  %v689_v5 = vld [vmem:[%s10887_s14 + $0xa08] sm:$0xff]  ;;  %v690_v6 = vld [vmem:[%s10887_s14 + $0xa10] sm:$0xff]  ;;  %v823_v7 = vld [vmem:[%s10887_s14 + $0xe38] sm:$0xff] }
  0xfb   : > { %1639 = vadd.xlane.f32.xlu1 %v1290_v60  ;;  %v1192_v8 = vadd.f32 %v1128_v62, %v821_v57  ;;  %v454_v9 = vld [vmem:[%s10887_s14 + $0x2b0] sm:$0xff]  ;;  %v1082_v10 = vadd.f32 %v1018_v63, %v452_v58  ;;  %v588_v11 = vld [vmem:[%s10887_s14 + $0x6e0] sm:$0xff]  ;;  %v920_v12 = vadd.f32 %v689_v5, %v688_v1  ;;  %v691_v15 = vld [vmem:[%s10887_s14 + $0xa18] sm:$0xff] }
  0xfc   : > { %v1303_v13 = vadd.f32 %v1239_v2, %v687_v55  ;;  %v1035_v14 = vadd.f32 %v971_v4, %v587_v0  ;;  %v824_v16 = vld [vmem:[%s10887_s14 + $0xe40] sm:$0xff]  ;;  %v825_v17 = vld [vmem:[%s10887_s14 + $0xe48] sm:$0xff]  ;;  %v455_v19 = vld [vmem:[%s10887_s14 + $0x2b8] sm:$0xff] }
  0xfd   : > { %v1256_v18 = vadd.f32 %v1192_v8, %v822_v61  ;;  %v1146_v20 = vadd.f32 %v1082_v10, %v453_v3  ;;  %v589_v21 = vld [vmem:[%s10887_s14 + $0x6e8] sm:$0xff]  ;;  %v984_v22 = vadd.f32 %v920_v12, %v690_v6  ;;  %v826_v23 = vld [vmem:[%s10887_s14 + $0xe50] sm:$0xff]  ;;  %v937_v24 = vadd.f32 %v825_v17, %v824_v16  ;;  %v692_v27 = vld [vmem:[%s10887_s14 + $0xa20] sm:$0xff] }
  0xfe   : > { %1665 = vadd.xlane.f32.xlu0 %v1303_v13  ;;  %v590_v25 = vld [vmem:[%s10887_s14 + $0x6f0] sm:$0xff]  ;;  %v1099_v26 = vadd.f32 %v1035_v14, %v588_v11  ;;  %v827_v28 = vld [vmem:[%s10887_s14 + $0xe58] sm:$0xff]  ;;  %v456_v33 = vld [vmem:[%s10887_s14 + $0x2c0] sm:$0xff] }
  0xff   : > { %v1320_v29 = vadd.f32 %v1256_v18, %v823_v7  ;;  %v1210_v30 = vadd.f32 %v1146_v20, %v454_v9  ;;  %v1048_v31 = vadd.f32 %v984_v22, %v691_v15  ;;  %v1001_v32 = vadd.f32 %v937_v24, %v826_v23  ;;  %v457_v34 = vld [vmem:[%s10887_s14 + $0x2c8] sm:$0xff]  ;;  %v458_v35 = vld [vmem:[%s10887_s14 + $0x2d0] sm:$0xff]  ;;  %v591_v36 = vld [vmem:[%s10887_s14 + $0x6f8] sm:$0xff] }
 0x100   : > { %v1163_v37 = vadd.f32 %v1099_v26, %v589_v21  ;;  %v693_v38 = vld [vmem:[%s10887_s14 + $0xa28] sm:$0xff]  ;;  %v828_v39 = vld [vmem:[%s10887_s14 + $0xe60] sm:$0xff]  ;;  %v891_v40 = vadd.f32 %v457_v34, %v456_v33  ;;  %v694_v42 = vld [vmem:[%s10887_s14 + $0xa30] sm:$0xff] }
 0x101   : > { %1699 = vadd.xlane.f32.xlu1 %v1320_v29  ;;  %v1274_v41 = vadd.f32 %v1210_v30, %v455_v19  ;;  %v1112_v43 = vadd.f32 %v1048_v31, %v692_v27  ;;  %v1065_v44 = vadd.f32 %v1001_v32, %v827_v28  ;;  %v459_v45 = vld [vmem:[%s10887_s14 + $0x2d8] sm:$0xff]  ;;  %v592_v46 = vld [vmem:[%s10887_s14 + $0x700] sm:$0xff]  ;;  %v829_v48 = vld [vmem:[%s10887_s14 + $0xe68] sm:$0xff] }
 0x102   : > { %v1227_v47 = vadd.f32 %v1163_v37, %v590_v25  ;;  %v955_v49 = vadd.f32 %v891_v40, %v458_v35  ;;  %v593_v50 = vld [vmem:[%s10887_s14 + $0x708] sm:$0xff]  ;;  %v594_v51 = vld [vmem:[%s10887_s14 + $0x710] sm:$0xff]  ;;  %v695_v52 = vld [vmem:[%s10887_s14 + $0xa38] sm:$0xff] }
 0x103   : > { %1607 = vadd.xlane.f32.xlu0 %v1274_v41  ;;  %v1176_v53 = vadd.f32 %v1112_v43, %v693_v38  ;;  %v830_v54 = vld [vmem:[%s10887_s14 + $0xe70] sm:$0xff]  ;;  %v1129_v55 = vadd.f32 %v1065_v44, %v828_v39  ;;  %v460_v56 = vld [vmem:[%s10887_s14 + $0x2e0] sm:$0xff]  ;;  %v908_v57 = vadd.f32 %v593_v50, %v592_v46  ;;  %v595_v60 = vld [vmem:[%s10887_s14 + $0x718] sm:$0xff] }
 0x104   : > { %v1291_v58 = vadd.f32 %v1227_v47, %v591_v36  ;;  %v1019_v59 = vadd.f32 %v955_v49, %v459_v45  ;;  %v696_v61 = vld [vmem:[%s10887_s14 + $0xa40] sm:$0xff]  ;;  %v697_v62 = vld [vmem:[%s10887_s14 + $0xa48] sm:$0xff]  ;;  %v831_v0 = vld [vmem:[%s10887_s14 + $0xe78] sm:$0xff] }
 0x105   : > { %v1240_v63 = vadd.f32 %v1176_v53, %v694_v42  ;;  %v1193_v1 = vadd.f32 %v1129_v55, %v829_v48  ;;  %v461_v2 = vld [vmem:[%s10887_s14 + $0x2e8] sm:$0xff]  ;;  %v972_v3 = vadd.f32 %v908_v57, %v594_v51  ;;  %v698_v4 = vld [vmem:[%s10887_s14 + $0xa50] sm:$0xff]  ;;  %v921_v5 = vadd.f32 %v697_v62, %v696_v61  ;;  %v596_v8 = vld [vmem:[%s10887_s14 + $0x720] sm:$0xff] }
 0x106   : > { %1641 = vadd.xlane.f32.xlu1 %v1291_v58  ;;  %v462_v6 = vld [vmem:[%s10887_s14 + $0x2f0] sm:$0xff]  ;;  %v1083_v7 = vadd.f32 %v1019_v59, %v460_v56  ;;  %v699_v9 = vld [vmem:[%s10887_s14 + $0xa58] sm:$0xff]  ;;  %v832_v14 = vld [vmem:[%s10887_s14 + $0xe80] sm:$0xff] }
 0x107   : > { %v1304_v10 = vadd.f32 %v1240_v63, %v695_v52  ;;  %v1257_v11 = vadd.f32 %v1193_v1, %v830_v54  ;;  %v1036_v12 = vadd.f32 %v972_v3, %v595_v60  ;;  %v985_v13 = vadd.f32 %v921_v5, %v698_v4  ;;  %v833_v15 = vld [vmem:[%s10887_s14 + $0xe88] sm:$0xff]  ;;  %v834_v16 = vld [vmem:[%s10887_s14 + $0xe90] sm:$0xff]  ;;  %v463_v17 = vld [vmem:[%s10887_s14 + $0x2f8] sm:$0xff] }
 0x108   : > { %v1147_v18 = vadd.f32 %v1083_v7, %v461_v2  ;;  %v597_v19 = vld [vmem:[%s10887_s14 + $0x728] sm:$0xff]  ;;  %v700_v20 = vld [vmem:[%s10887_s14 + $0xa60] sm:$0xff]  ;;  %v938_v21 = vadd.f32 %v833_v15, %v832_v14  ;;  %v598_v23 = vld [vmem:[%s10887_s14 + $0x730] sm:$0xff] }
 0x109   : > { %1667 = vadd.xlane.f32.xlu0 %v1304_v10  ;;  %v1321_v22 = vadd.f32 %v1257_v11, %v831_v0  ;;  %v1100_v24 = vadd.f32 %v1036_v12, %v596_v8  ;;  %v1049_v25 = vadd.f32 %v985_v13, %v699_v9  ;;  %v835_v26 = vld [vmem:[%s10887_s14 + $0xe98] sm:$0xff]  ;;  %v464_v27 = vld [vmem:[%s10887_s14 + $0x300] sm:$0xff]  ;;  %v701_v29 = vld [vmem:[%s10887_s14 + $0xa68] sm:$0xff] }
 0x10a   : > { %v1211_v28 = vadd.f32 %v1147_v18, %v462_v6  ;;  %v1002_v30 = vadd.f32 %v938_v21, %v834_v16  ;;  %v465_v31 = vld [vmem:[%s10887_s14 + $0x308] sm:$0xff]  ;;  %v466_v32 = vld [vmem:[%s10887_s14 + $0x310] sm:$0xff]  ;;  %v599_v33 = vld [vmem:[%s10887_s14 + $0x738] sm:$0xff] }
 0x10b   : > { %1701 = vadd.xlane.f32.xlu1 %v1321_v22  ;;  %v1164_v34 = vadd.f32 %v1100_v24, %v597_v19  ;;  %v702_v35 = vld [vmem:[%s10887_s14 + $0xa70] sm:$0xff]  ;;  %v1113_v36 = vadd.f32 %v1049_v25, %v700_v20  ;;  %v836_v37 = vld [vmem:[%s10887_s14 + $0xea0] sm:$0xff]  ;;  %v892_v38 = vadd.f32 %v465_v31, %v464_v27  ;;  %v467_v41 = vld [vmem:[%s10887_s14 + $0x318] sm:$0xff] }
 0x10c   : > { %v1275_v39 = vadd.f32 %v1211_v28, %v463_v17  ;;  %v1066_v40 = vadd.f32 %v1002_v30, %v835_v26  ;;  %v600_v42 = vld [vmem:[%s10887_s14 + $0x740] sm:$0xff]  ;;  %v601_v43 = vld [vmem:[%s10887_s14 + $0x748] sm:$0xff]  ;;  %v703_v45 = vld [vmem:[%s10887_s14 + $0xa78] sm:$0xff] }
 0x10d   : > { %v1228_v44 = vadd.f32 %v1164_v34, %v598_v23  ;;  %v1177_v46 = vadd.f32 %v1113_v36, %v701_v29  ;;  %v837_v47 = vld [vmem:[%s10887_s14 + $0xea8] sm:$0xff]  ;;  %v956_v48 = vadd.f32 %v892_v38, %v466_v32  ;;  %v602_v49 = vld [vmem:[%s10887_s14 + $0x750] sm:$0xff]  ;;  %v909_v50 = vadd.f32 %v601_v43, %v600_v42  ;;  %v468_v53 = vld [vmem:[%s10887_s14 + $0x320] sm:$0xff] }
 0x10e   : > { %1609 = vadd.xlane.f32.xlu0 %v1275_v39  ;;  %v838_v51 = vld [vmem:[%s10887_s14 + $0xeb0] sm:$0xff]  ;;  %v1130_v52 = vadd.f32 %v1066_v40, %v836_v37  ;;  %v603_v54 = vld [vmem:[%s10887_s14 + $0x758] sm:$0xff]  ;;  %v704_v59 = vld [vmem:[%s10887_s14 + $0xa80] sm:$0xff] }
 0x10f   : > { %v1292_v55 = vadd.f32 %v1228_v44, %v599_v33  ;;  %v1241_v56 = vadd.f32 %v1177_v46, %v702_v35  ;;  %v1020_v57 = vadd.f32 %v956_v48, %v467_v41  ;;  %v973_v58 = vadd.f32 %v909_v50, %v602_v49  ;;  %v705_v60 = vld [vmem:[%s10887_s14 + $0xa88] sm:$0xff]  ;;  %v706_v61 = vld [vmem:[%s10887_s14 + $0xa90] sm:$0xff]  ;;  %v839_v62 = vld [vmem:[%s10887_s14 + $0xeb8] sm:$0xff] }
 0x110   : > { %v1194_v63 = vadd.f32 %v1130_v52, %v837_v47  ;;  %v469_v0 = vld [vmem:[%s10887_s14 + $0x328] sm:$0xff]  ;;  %v604_v1 = vld [vmem:[%s10887_s14 + $0x760] sm:$0xff]  ;;  %v922_v2 = vadd.f32 %v705_v60, %v704_v59  ;;  %v470_v4 = vld [vmem:[%s10887_s14 + $0x330] sm:$0xff] }
 0x111   : > { %1643 = vadd.xlane.f32.xlu1 %v1292_v55  ;;  %v1305_v3 = vadd.f32 %v1241_v56, %v703_v45  ;;  %v1084_v5 = vadd.f32 %v1020_v57, %v468_v53  ;;  %v1037_v6 = vadd.f32 %v973_v58, %v603_v54  ;;  %v707_v7 = vld [vmem:[%s10887_s14 + $0xa98] sm:$0xff]  ;;  %v840_v8 = vld [vmem:[%s10887_s14 + $0xec0] sm:$0xff]  ;;  %v605_v10 = vld [vmem:[%s10887_s14 + $0x768] sm:$0xff] }
 0x112   : > { %v1258_v9 = vadd.f32 %v1194_v63, %v838_v51  ;;  %v986_v11 = vadd.f32 %v922_v2, %v706_v61  ;;  %v841_v12 = vld [vmem:[%s10887_s14 + $0xec8] sm:$0xff]  ;;  %v842_v13 = vld [vmem:[%s10887_s14 + $0xed0] sm:$0xff]  ;;  %v471_v14 = vld [vmem:[%s10887_s14 + $0x338] sm:$0xff] }
 0x113   : > { %1669 = vadd.xlane.f32.xlu0 %v1305_v3  ;;  %v1148_v15 = vadd.f32 %v1084_v5, %v469_v0  ;;  %v606_v16 = vld [vmem:[%s10887_s14 + $0x770] sm:$0xff]  ;;  %v1101_v17 = vadd.f32 %v1037_v6, %v604_v1  ;;  %v708_v18 = vld [vmem:[%s10887_s14 + $0xaa0] sm:$0xff]  ;;  %v939_v19 = vadd.f32 %v841_v12, %v840_v8  ;;  %v843_v22 = vld [vmem:[%s10887_s14 + $0xed8] sm:$0xff] }
 0x114   : > { %v1322_v20 = vadd.f32 %v1258_v9, %v839_v62  ;;  %v1050_v21 = vadd.f32 %v986_v11, %v707_v7  ;;  %v472_v23 = vld [vmem:[%s10887_s14 + $0x340] sm:$0xff]  ;;  %v473_v24 = vld [vmem:[%s10887_s14 + $0x348] sm:$0xff]  ;;  %v607_v26 = vld [vmem:[%s10887_s14 + $0x778] sm:$0xff] }
 0x115   : > { %v1212_v25 = vadd.f32 %v1148_v15, %v470_v4  ;;  %v1165_v27 = vadd.f32 %v1101_v17, %v605_v10  ;;  %v709_v28 = vld [vmem:[%s10887_s14 + $0xaa8] sm:$0xff]  ;;  %v1003_v29 = vadd.f32 %v939_v19, %v842_v13  ;;  %v474_v30 = vld [vmem:[%s10887_s14 + $0x350] sm:$0xff]  ;;  %v893_v31 = vadd.f32 %v473_v24, %v472_v23  ;;  %v844_v34 = vld [vmem:[%s10887_s14 + $0xee0] sm:$0xff] }
 0x116   : > { %1703 = vadd.xlane.f32.xlu1 %v1322_v20  ;;  %v710_v32 = vld [vmem:[%s10887_s14 + $0xab0] sm:$0xff]  ;;  %v1114_v33 = vadd.f32 %v1050_v21, %v708_v18  ;;  %v475_v35 = vld [vmem:[%s10887_s14 + $0x358] sm:$0xff]  ;;  %v608_v40 = vld [vmem:[%s10887_s14 + $0x780] sm:$0xff] }
 0x117   : > { %v1276_v36 = vadd.f32 %v1212_v25, %v471_v14  ;;  %v1229_v37 = vadd.f32 %v1165_v27, %v606_v16  ;;  %v1067_v38 = vadd.f32 %v1003_v29, %v843_v22  ;;  %v957_v39 = vadd.f32 %v893_v31, %v474_v30  ;;  %v609_v41 = vld [vmem:[%s10887_s14 + $0x788] sm:$0xff]  ;;  %v610_v42 = vld [vmem:[%s10887_s14 + $0x790] sm:$0xff]  ;;  %v711_v43 = vld [vmem:[%s10887_s14 + $0xab8] sm:$0xff] }
 0x118   : > { %v1178_v44 = vadd.f32 %v1114_v33, %v709_v28  ;;  %v845_v45 = vld [vmem:[%s10887_s14 + $0xee8] sm:$0xff]  ;;  %v476_v46 = vld [vmem:[%s10887_s14 + $0x360] sm:$0xff]  ;;  %v910_v47 = vadd.f32 %v609_v41, %v608_v40  ;;  %v846_v49 = vld [vmem:[%s10887_s14 + $0xef0] sm:$0xff] }
 0x119   : > { %1611 = vadd.xlane.f32.xlu0 %v1276_v36  ;;  %v1293_v48 = vadd.f32 %v1229_v37, %v607_v26  ;;  %v1131_v50 = vadd.f32 %v1067_v38, %v844_v34  ;;  %v1021_v51 = vadd.f32 %v957_v39, %v475_v35  ;;  %v611_v52 = vld [vmem:[%s10887_s14 + $0x798] sm:$0xff]  ;;  %v712_v53 = vld [vmem:[%s10887_s14 + $0xac0] sm:$0xff]  ;;  %v477_v55 = vld [vmem:[%s10887_s14 + $0x368] sm:$0xff] }
 0x11a   : > { %v1242_v54 = vadd.f32 %v1178_v44, %v710_v32  ;;  %v974_v56 = vadd.f32 %v910_v47, %v610_v42  ;;  %v713_v57 = vld [vmem:[%s10887_s14 + $0xac8] sm:$0xff]  ;;  %v714_v58 = vld [vmem:[%s10887_s14 + $0xad0] sm:$0xff]  ;;  %v847_v59 = vld [vmem:[%s10887_s14 + $0xef8] sm:$0xff] }
 0x11b   : > { %1645 = vadd.xlane.f32.xlu1 %v1293_v48  ;;  %v1195_v60 = vadd.f32 %v1131_v50, %v845_v45  ;;  %v478_v61 = vld [vmem:[%s10887_s14 + $0x370] sm:$0xff]  ;;  %v1085_v62 = vadd.f32 %v1021_v51, %v476_v46  ;;  %v612_v63 = vld [vmem:[%s10887_s14 + $0x7a0] sm:$0xff]  ;;  %v923_v0 = vadd.f32 %v713_v57, %v712_v53  ;;  %v715_v3 = vld [vmem:[%s10887_s14 + $0xad8] sm:$0xff] }
 0x11c   : > { %v1306_v1 = vadd.f32 %v1242_v54, %v711_v43  ;;  %v1038_v2 = vadd.f32 %v974_v56, %v611_v52  ;;  %v848_v4 = vld [vmem:[%s10887_s14 + $0xf00] sm:$0xff]  ;;  %v849_v5 = vld [vmem:[%s10887_s14 + $0xf08] sm:$0xff]  ;;  %v479_v7 = vld [vmem:[%s10887_s14 + $0x378] sm:$0xff] }
 0x11d   : > { %v1259_v6 = vadd.f32 %v1195_v60, %v846_v49  ;;  %v1149_v8 = vadd.f32 %v1085_v62, %v477_v55  ;;  %v613_v9 = vld [vmem:[%s10887_s14 + $0x7a8] sm:$0xff]  ;;  %v987_v10 = vadd.f32 %v923_v0, %v714_v58  ;;  %v850_v11 = vld [vmem:[%s10887_s14 + $0xf10] sm:$0xff]  ;;  %v940_v12 = vadd.f32 %v849_v5, %v848_v4  ;;  %v716_v15 = vld [vmem:[%s10887_s14 + $0xae0] sm:$0xff] }
 0x11e   : > { %1671 = vadd.xlane.f32.xlu0 %v1306_v1  ;;  %v614_v13 = vld [vmem:[%s10887_s14 + $0x7b0] sm:$0xff]  ;;  %v1102_v14 = vadd.f32 %v1038_v2, %v612_v63  ;;  %v851_v16 = vld [vmem:[%s10887_s14 + $0xf18] sm:$0xff]  ;;  %v480_v21 = vld [vmem:[%s10887_s14 + $0x380] sm:$0xff] }
 0x11f   : > { %v1323_v17 = vadd.f32 %v1259_v6, %v847_v59  ;;  %v1213_v18 = vadd.f32 %v1149_v8, %v478_v61  ;;  %v1051_v19 = vadd.f32 %v987_v10, %v715_v3  ;;  %v1004_v20 = vadd.f32 %v940_v12, %v850_v11  ;;  %v481_v22 = vld [vmem:[%s10887_s14 + $0x388] sm:$0xff]  ;;  %v482_v23 = vld [vmem:[%s10887_s14 + $0x390] sm:$0xff]  ;;  %v615_v24 = vld [vmem:[%s10887_s14 + $0x7b8] sm:$0xff] }
 0x120   : > { %v1166_v25 = vadd.f32 %v1102_v14, %v613_v9  ;;  %v717_v26 = vld [vmem:[%s10887_s14 + $0xae8] sm:$0xff]  ;;  %v852_v27 = vld [vmem:[%s10887_s14 + $0xf20] sm:$0xff]  ;;  %v894_v28 = vadd.f32 %v481_v22, %v480_v21  ;;  %v718_v30 = vld [vmem:[%s10887_s14 + $0xaf0] sm:$0xff] }
 0x121   : > { %1705 = vadd.xlane.f32.xlu1 %v1323_v17  ;;  %v1277_v29 = vadd.f32 %v1213_v18, %v479_v7  ;;  %v1115_v31 = vadd.f32 %v1051_v19, %v716_v15  ;;  %v1068_v32 = vadd.f32 %v1004_v20, %v851_v16  ;;  %v483_v33 = vld [vmem:[%s10887_s14 + $0x398] sm:$0xff]  ;;  %v616_v34 = vld [vmem:[%s10887_s14 + $0x7c0] sm:$0xff]  ;;  %v853_v36 = vld [vmem:[%s10887_s14 + $0xf28] sm:$0xff] }
 0x122   : > { %v1230_v35 = vadd.f32 %v1166_v25, %v614_v13  ;;  %v958_v37 = vadd.f32 %v894_v28, %v482_v23  ;;  %v617_v38 = vld [vmem:[%s10887_s14 + $0x7c8] sm:$0xff]  ;;  %v618_v39 = vld [vmem:[%s10887_s14 + $0x7d0] sm:$0xff]  ;;  %v719_v40 = vld [vmem:[%s10887_s14 + $0xaf8] sm:$0xff] }
 0x123   : > { %1613 = vadd.xlane.f32.xlu0 %v1277_v29  ;;  %v1179_v41 = vadd.f32 %v1115_v31, %v717_v26  ;;  %v854_v42 = vld [vmem:[%s10887_s14 + $0xf30] sm:$0xff]  ;;  %v1132_v43 = vadd.f32 %v1068_v32, %v852_v27  ;;  %v484_v44 = vld [vmem:[%s10887_s14 + $0x3a0] sm:$0xff]  ;;  %v911_v45 = vadd.f32 %v617_v38, %v616_v34  ;;  %v619_v48 = vld [vmem:[%s10887_s14 + $0x7d8] sm:$0xff] }
 0x124   : > { %v1294_v46 = vadd.f32 %v1230_v35, %v615_v24  ;;  %v1022_v47 = vadd.f32 %v958_v37, %v483_v33  ;;  %v720_v49 = vld [vmem:[%s10887_s14 + $0xb00] sm:$0xff]  ;;  %v721_v50 = vld [vmem:[%s10887_s14 + $0xb08] sm:$0xff]  ;;  %v855_v52 = vld [vmem:[%s10887_s14 + $0xf38] sm:$0xff] }
 0x125   : > { %v1243_v51 = vadd.f32 %v1179_v41, %v718_v30  ;;  %v1196_v53 = vadd.f32 %v1132_v43, %v853_v36  ;;  %v485_v54 = vld [vmem:[%s10887_s14 + $0x3a8] sm:$0xff]  ;;  %v975_v55 = vadd.f32 %v911_v45, %v618_v39  ;;  %v722_v56 = vld [vmem:[%s10887_s14 + $0xb10] sm:$0xff]  ;;  %v924_v57 = vadd.f32 %v721_v50, %v720_v49  ;;  %v620_v60 = vld [vmem:[%s10887_s14 + $0x7e0] sm:$0xff] }
 0x126   : > { %1647 = vadd.xlane.f32.xlu1 %v1294_v46  ;;  %v486_v58 = vld [vmem:[%s10887_s14 + $0x3b0] sm:$0xff]  ;;  %v1086_v59 = vadd.f32 %v1022_v47, %v484_v44  ;;  %v723_v61 = vld [vmem:[%s10887_s14 + $0xb18] sm:$0xff]  ;;  %v856_v2 = vld [vmem:[%s10887_s14 + $0xf40] sm:$0xff] }
 0x127   : > { %v1307_v62 = vadd.f32 %v1243_v51, %v719_v40  ;;  %v1260_v63 = vadd.f32 %v1196_v53, %v854_v42  ;;  %v1039_v0 = vadd.f32 %v975_v55, %v619_v48  ;;  %v988_v1 = vadd.f32 %v924_v57, %v722_v56  ;;  %v857_v3 = vld [vmem:[%s10887_s14 + $0xf48] sm:$0xff]  ;;  %v858_v4 = vld [vmem:[%s10887_s14 + $0xf50] sm:$0xff]  ;;  %v487_v5 = vld [vmem:[%s10887_s14 + $0x3b8] sm:$0xff] }
 0x128   : > { %v1150_v6 = vadd.f32 %v1086_v59, %v485_v54  ;;  %v621_v7 = vld [vmem:[%s10887_s14 + $0x7e8] sm:$0xff]  ;;  %v724_v8 = vld [vmem:[%s10887_s14 + $0xb20] sm:$0xff]  ;;  %v941_v9 = vadd.f32 %v857_v3, %v856_v2  ;;  %v622_v11 = vld [vmem:[%s10887_s14 + $0x7f0] sm:$0xff] }
 0x129   : > { %1673 = vadd.xlane.f32.xlu0 %v1307_v62  ;;  %v1324_v10 = vadd.f32 %v1260_v63, %v855_v52  ;;  %v1103_v12 = vadd.f32 %v1039_v0, %v620_v60  ;;  %v1052_v13 = vadd.f32 %v988_v1, %v723_v61  ;;  %v859_v14 = vld [vmem:[%s10887_s14 + $0xf58] sm:$0xff]  ;;  %v488_v15 = vld [vmem:[%s10887_s14 + $0x3c0] sm:$0xff]  ;;  %v725_v17 = vld [vmem:[%s10887_s14 + $0xb28] sm:$0xff] }
 0x12a   : > { %v1214_v16 = vadd.f32 %v1150_v6, %v486_v58  ;;  %v1005_v18 = vadd.f32 %v941_v9, %v858_v4  ;;  %v489_v19 = vld [vmem:[%s10887_s14 + $0x3c8] sm:$0xff]  ;;  %v490_v20 = vld [vmem:[%s10887_s14 + $0x3d0] sm:$0xff]  ;;  %v623_v21 = vld [vmem:[%s10887_s14 + $0x7f8] sm:$0xff] }
 0x12b   : > { %1707 = vadd.xlane.f32.xlu1 %v1324_v10  ;;  %v1167_v22 = vadd.f32 %v1103_v12, %v621_v7  ;;  %v726_v23 = vld [vmem:[%s10887_s14 + $0xb30] sm:$0xff]  ;;  %v1116_v24 = vadd.f32 %v1052_v13, %v724_v8  ;;  %v860_v25 = vld [vmem:[%s10887_s14 + $0xf60] sm:$0xff]  ;;  %v895_v26 = vadd.f32 %v489_v19, %v488_v15  ;;  %v491_v30 = vld [vmem:[%s10887_s14 + $0x3d8] sm:$0xff] }
 0x12c   : > { %v1278_v28 = vadd.f32 %v1214_v16, %v487_v5  ;;  %v1069_v29 = vadd.f32 %v1005_v18, %v859_v14  ;;  %v728_v31 = vld [vmem:[%s10887_s14 + $0xb40] sm:$0xff]  ;;  %v729_v32 = vld [vmem:[%s10887_s14 + $0xb48] sm:$0xff]  ;;  %v727_v34 = vld [vmem:[%s10887_s14 + $0xb38] sm:$0xff] }
 0x12d   : > { %v11364_v27 = vpop.xlane.xlu0 %1619  ;;  %v1231_v33 = vadd.f32 %v1167_v22, %v622_v11  ;;  %v1180_v35 = vadd.f32 %v1116_v24, %v725_v17  ;;  %v861_v36 = vld [vmem:[%s10887_s14 + $0xf68] sm:$0xff]  ;;  %v959_v37 = vadd.f32 %v895_v26, %v490_v20  ;;  %v730_v38 = vld [vmem:[%s10887_s14 + $0xb50] sm:$0xff]  ;;  %v925_v39 = vadd.f32 %v729_v32, %v728_v31  ;;  %v492_v42 = vld [vmem:[%s10887_s14 + $0x3e0] sm:$0xff] }
 0x12e   : > { %1615 = vadd.xlane.f32.xlu0 %v1278_v28  ;;  %v862_v40 = vld [vmem:[%s10887_s14 + $0xf70] sm:$0xff]  ;;  %v1133_v41 = vadd.f32 %v1069_v29, %v860_v25  ;;  %v731_v43 = vld [vmem:[%s10887_s14 + $0xb58] sm:$0xff]  ;;  %v864_v49 = vld [vmem:[%s10887_s14 + $0xf80] sm:$0xff] }
 0x12f   : > { %v11375_v44 = vpop.xlane.xlu1 %1587  ;;  %v1295_v45 = vadd.f32 %v1231_v33, %v623_v21  ;;  %v1244_v46 = vadd.f32 %v1180_v35, %v726_v23  ;;  %v1023_v47 = vadd.f32 %v959_v37, %v491_v30  ;;  %v989_v48 = vadd.f32 %v925_v39, %v730_v38  ;;  %v865_v50 = vld [vmem:[%s10887_s14 + $0xf88] sm:$0xff]  ;;  %v866_v51 = vld [vmem:[%s10887_s14 + $0xf90] sm:$0xff]  ;;  %v863_v52 = vld [vmem:[%s10887_s14 + $0xf78] sm:$0xff] }
 0x130   : > { %v1197_v53 = vadd.f32 %v1133_v41, %v861_v36  ;;  %v493_v54 = vld [vmem:[%s10887_s14 + $0x3e8] sm:$0xff]  ;;  %v732_v55 = vld [vmem:[%s10887_s14 + $0xb60] sm:$0xff]  ;;  %v942_v56 = vadd.f32 %v865_v50, %v864_v49  ;;  %v494_v59 = vld [vmem:[%s10887_s14 + $0x3f0] sm:$0xff] }
 0x131   : > { %v11383_v57 = vpop.xlane.xlu0 %1621  ;;  %1649 = vadd.xlane.f32.xlu1 %v1295_v45  ;;  %v1308_v58 = vadd.f32 %v1244_v46, %v727_v34  ;;  %v1087_v60 = vadd.f32 %v1023_v47, %v492_v42  ;;  %v1053_v61 = vadd.f32 %v989_v48, %v731_v43  ;;  %v867_v62 = vld [vmem:[%s10887_s14 + $0xf98] sm:$0xff]  ;;  %v736_v63 = vld [vmem:[%s10887_s14 + $0xb80] sm:$0xff]  ;;  %v733_v1 = vld [vmem:[%s10887_s14 + $0xb68] sm:$0xff] }
 0x132   : > { %v1261_v0 = vadd.f32 %v1197_v53, %v862_v40  ;;  %v1006_v2 = vadd.f32 %v942_v56, %v866_v51  ;;  %v737_v3 = vld [vmem:[%s10887_s14 + $0xb88] sm:$0xff]  ;;  %v738_v4 = vld [vmem:[%s10887_s14 + $0xb90] sm:$0xff]  ;;  %v495_v5 = vld [vmem:[%s10887_s14 + $0x3f8] sm:$0xff] }
 0x133   : > { %1675 = vadd.xlane.f32.xlu0 %v1308_v58  ;;  %v1151_v6 = vadd.f32 %v1087_v60, %v493_v54  ;;  %v734_v7 = vld [vmem:[%s10887_s14 + $0xb70] sm:$0xff]  ;;  %v1117_v8 = vadd.f32 %v1053_v61, %v732_v55  ;;  %v868_v9 = vld [vmem:[%s10887_s14 + $0xfa0] sm:$0xff]  ;;  %v926_v10 = vadd.f32 %v737_v3, %v736_v63  ;;  %v11394_v11 = vpop.xlane.xlu1 %1589  ;;  %v739_v14 = vld [vmem:[%s10887_s14 + $0xb98] sm:$0xff] }
 0x134   : > { %v1325_v12 = vadd.f32 %v1261_v0, %v863_v52  ;;  %v1070_v13 = vadd.f32 %v1006_v2, %v867_v62  ;;  %v872_v15 = vld [vmem:[%s10887_s14 + $0xfc0] sm:$0xff]  ;;  %v873_v16 = vld [vmem:[%s10887_s14 + $0xfc8] sm:$0xff]  ;;  %v735_v18 = vld [vmem:[%s10887_s14 + $0xb78] sm:$0xff] }
 0x135   : > { %v1215_v17 = vadd.f32 %v1151_v6, %v494_v59  ;;  %v1181_v19 = vadd.f32 %v1117_v8, %v733_v1  ;;  %v869_v20 = vld [vmem:[%s10887_s14 + $0xfa8] sm:$0xff]  ;;  %v990_v21 = vadd.f32 %v926_v10, %v738_v4  ;;  %v874_v22 = vld [vmem:[%s10887_s14 + $0xfd0] sm:$0xff]  ;;  %v943_v23 = vadd.f32 %v873_v16, %v872_v15  ;;  %v740_v26 = vld [vmem:[%s10887_s14 + $0xba0] sm:$0xff] }
 0x136   : > { %1709 = vadd.xlane.f32.xlu1 %v1325_v12  ;;  %v870_v24 = vld [vmem:[%s10887_s14 + $0xfb0] sm:$0xff]  ;;  %v1134_v25 = vadd.f32 %v1070_v13, %v868_v9  ;;  %v875_v28 = vld [vmem:[%s10887_s14 + $0xfd8] sm:$0xff]  ;;  %v11405_v29 = vpop.xlane.xlu0 %1623  ;;  %v744_v35 = vld [vmem:[%s10887_s14 + $0xbc0] sm:$0xff] }
 0x137   : > { %v1279_v30 = vadd.f32 %v1215_v17, %v495_v5  ;;  %v1245_v31 = vadd.f32 %v1181_v19, %v734_v7  ;;  %v871_v32 = vld [vmem:[%s10887_s14 + $0xfb8] sm:$0xff]  ;;  %v1054_v33 = vadd.f32 %v990_v21, %v739_v14  ;;  %v1007_v34 = vadd.f32 %v943_v23, %v874_v22  ;;  %v745_v36 = vld [vmem:[%s10887_s14 + $0xbc8] sm:$0xff]  ;;  %v746_v37 = vld [vmem:[%s10887_s14 + $0xbd0] sm:$0xff] }
 0x138   : > { %v1198_v38 = vadd.f32 %v1134_v25, %v869_v20  ;;  %v741_v39 = vld [vmem:[%s10887_s14 + $0xba8] sm:$0xff]  ;;  %v742_v40 = vld [vmem:[%s10887_s14 + $0xbb0] sm:$0xff]  ;;  %v876_v41 = vld [vmem:[%s10887_s14 + $0xfe0] sm:$0xff]  ;;  %v927_v42 = vadd.f32 %v745_v36, %v744_v35  ;;  %v11414_v43 = vpop.xlane.xlu1 %1591 }
 0x139   : > { %1617 = vadd.xlane.f32.xlu0 %v1279_v30  ;;  %v1309_v45 = vadd.f32 %v1245_v31, %v735_v18  ;;  %v1118_v46 = vadd.f32 %v1054_v33, %v740_v26  ;;  %v877_v47 = vld [vmem:[%s10887_s14 + $0xfe8] sm:$0xff]  ;;  %v1071_v48 = vadd.f32 %v1007_v34, %v875_v28  ;;  %v747_v49 = vld [vmem:[%s10887_s14 + $0xbd8] sm:$0xff]  ;;  %v1795_v50 = vld [vmem:[%s14175_s1 + $0x80] sm:$0xff] }
 0x13a   : > { %v1262_v51 = vadd.f32 %v1198_v38, %v870_v24  ;;  %v743_v52 = vld [vmem:[%s10887_s14 + $0xbb8] sm:$0xff]  ;;  %v878_v53 = vld [vmem:[%s10887_s14 + $0xff0] sm:$0xff]  ;;  %v991_v54 = vadd.f32 %v927_v42, %v746_v37  ;;  %v1796_v55 = vld [vmem:[%s14175_s1 + $0x88] sm:$0xff] }
 0x13b   : > { %v1779_v56 = vld [vmem:[%s14175_s1] sm:$0xff]  ;;  %v1780_v58 = vld [vmem:[%s14175_s1 + $0x8] sm:$0xff]  ;;  %1677 = vadd.xlane.f32.xlu1 %v1309_v45  ;;  %v1182_v59 = vadd.f32 %v1118_v46, %v741_v39  ;;  %v1135_v60 = vadd.f32 %v1071_v48, %v876_v41  ;;  %v11433_v62 = vpop.xlane.xlu0 %1625  ;;  %v10235_v63 = vpack.c.bf16 %v1796_v55, %v1795_v50  ;;  %v1797_v0 = vld [vmem:[%s14175_s1 + $0x90] sm:$0xff] }
 0x13c   : > { %v748_v61 = vld [vmem:[%s10887_s14 + $0xbe0] sm:$0xff]  ;;  %v1798_v1 = vld [vmem:[%s14175_s1 + $0x98] sm:$0xff]  ;;  %v1326_v2 = vadd.f32 %v1262_v51, %v871_v32  ;;  %v749_v4 = vld [vmem:[%s10887_s14 + $0xbe8] sm:$0xff]  ;;  %v1055_v5 = vadd.f32 %v991_v54, %v747_v49  ;;  %v10237_v12 = vpack.c.bf16 %v1780_v58, %v1779_v56 }
 0x13d   : > { %v879_v3 = vld [vmem:[%s10887_s14 + $0xff8] sm:$0xff]  ;;  %v1781_v6 = vld [vmem:[%s14175_s1 + $0x10] sm:$0xff]  ;;  %v1246_v8 = vadd.f32 %v1182_v59, %v742_v40  ;;  %v1199_v9 = vadd.f32 %v1135_v60, %v877_v47  ;;  %10236 = vmatprep.subr.bf16.mxu0 %v10235_v63  ;;  %v1799_v13 = vld [vmem:[%s14175_s1 + $0xa0] sm:$0xff]  ;;  %v10239_v18 = vpack.c.bf16 %v1798_v1, %v1797_v0 }
 0x13e   : > { %v1782_v7 = vld [vmem:[%s14175_s1 + $0x18] sm:$0xff]  ;;  %v750_v10 = vld [vmem:[%s10887_s14 + $0xbf0] sm:$0xff]  ;;  %v1800_v14 = vld [vmem:[%s14175_s1 + $0xa8] sm:$0xff]  ;;  %1711 = vadd.xlane.f32.xlu0 %v1326_v2  ;;  %v1119_v16 = vadd.f32 %v1055_v5, %v748_v61  ;;  %v11459_v17 = vpop.xlane.xlu1 %1683  ;;  %10238 = vmatpush3.bf16.msra.mxu0 %v10237_v12 }
 0x13f   : > { %v1827_v15 = vld [vmem:[%s14175_s1 + $0x180] sm:$0xff]  ;;  %v1828_v19 = vld [vmem:[%s14175_s1 + $0x188] sm:$0xff]  ;;  %v1310_v22 = vadd.f32 %v1246_v8, %v743_v52  ;;  %v1263_v23 = vadd.f32 %v1199_v9, %v878_v53  ;;  %v751_v24 = vld [vmem:[%s10887_s14 + $0xbf8] sm:$0xff]  ;;  %v10241_v25 = vpack.c.bf16 %v1782_v7, %v1781_v6  ;;  %10240 = vmatprep.subr.bf16.mxu0 %v10239_v18  ;;  %v10243_v32 = vpack.c.bf16 %v1800_v14, %v1799_v13 }
 0x140   : > { %v1811_v20 = vld [vmem:[%s14175_s1 + $0x100] sm:$0xff]  ;;  %v1812_v21 = vld [vmem:[%s14175_s1 + $0x108] sm:$0xff]  ;;  %v1183_v30 = vadd.f32 %v1119_v16, %v749_v4  ;;  %v11477_v31 = vpop.xlane.xlu0 %1685  ;;  %v10267_v33 = vpack.c.bf16 %v1828_v19, %v1827_v15  ;;  %v1801_v34 = vld [vmem:[%s14175_s1 + $0xb0] sm:$0xff] }
 0x141   : > { %v1783_v26 = vld [vmem:[%s14175_s1 + $0x20] sm:$0xff]  ;;  %v1784_v28 = vld [vmem:[%s14175_s1 + $0x28] sm:$0xff]  ;;  %v1829_v35 = vld [vmem:[%s14175_s1 + $0x190] sm:$0xff]  ;;  %1679 = vadd.xlane.f32.xlu1 %v1310_v22  ;;  %v1327_v37 = vadd.f32 %v1263_v23, %v879_v3  ;;  %v10269_v38 = vpack.c.bf16 %v1812_v21, %v1811_v20 }
 0x142   : > { %v1830_v36 = vld [vmem:[%s14175_s1 + $0x198] sm:$0xff]  ;;  %v1813_v40 = vld [vmem:[%s14175_s1 + $0x110] sm:$0xff]  ;;  %v1247_v42 = vadd.f32 %v1183_v30, %v750_v10  ;;  %10268 = vmatprep.subr.bf16.mxu1 %v10267_v33  ;;  %10242 = vmatpush3.bf16.msra.mxu0 %v10241_v25  ;;  %v10245_v47 = vpack.c.bf16 %v1784_v28, %v1783_v26  ;;  %v1831_v48 = vld [vmem:[%s14175_s1 + $0x1a0] sm:$0xff] }
 0x143   : > { %v1802_v39 = vld [vmem:[%s14175_s1 + $0xb8] sm:$0xff]  ;;  %v10271_v45 = vpack.c.bf16 %v1830_v36, %v1829_v35  ;;  %1713 = vadd.xlane.f32.xlu0 %v1327_v37  ;;  %v11497_v46 = vpop.xlane.xlu1 %1593  ;;  %v1832_v49 = vld [vmem:[%s14175_s1 + $0x1a8] sm:$0xff]  ;;  %10244 = vmatprep.subr.bf16.mxu0 %v10243_v32  ;;  %v1785_v52 = vld [vmem:[%s14175_s1 + $0x30] sm:$0xff] }
 0x144   : > { %v1814_v41 = vld [vmem:[%s14175_s1 + $0x118] sm:$0xff]  ;;  %v1311_v50 = vadd.f32 %v1247_v42, %v751_v24  ;;  %10270 = vmatpush3.bf16.msra.mxu1 %v10269_v38  ;;  %v10247_v51 = vpack.c.bf16 %v1802_v39, %v1801_v34  ;;  %v1803_v55 = vld [vmem:[%s14175_s1 + $0xc0] sm:$0xff]  ;;  %v1804_v56 = vld [vmem:[%s14175_s1 + $0xc8] sm:$0xff]  ;;  %v10275_v58 = vpack.c.bf16 %v1832_v49, %v1831_v48 }
 0x145   : > { %v1786_v53 = vld [vmem:[%s14175_s1 + $0x38] sm:$0xff]  ;;  %v10273_v54 = vpack.c.bf16 %v1814_v41, %v1813_v40  ;;  %10272 = vmatprep.subr.bf16.mxu1 %v10271_v45  ;;  %v1815_v59 = vld [vmem:[%s14175_s1 + $0x120] sm:$0xff]  ;;  %v1816_v60 = vld [vmem:[%s14175_s1 + $0x128] sm:$0xff]  ;;  %v10251_v3 = vpack.c.bf16 %v1804_v56, %v1803_v55 }
 0x146   : > { %1681 = vadd.xlane.f32.xlu1 %v1311_v50  ;;  %v11523_v61 = vpop.xlane.xlu0 %1627  ;;  %v1833_v63 = vld [vmem:[%s14175_s1 + $0x1b0] sm:$0xff]  ;;  %v1834_v0 = vld [vmem:[%s14175_s1 + $0x1b8] sm:$0xff]  ;;  %10246 = vmatpush3.bf16.msra.mxu0 %v10245_v47  ;;  %v10249_v1 = vpack.c.bf16 %v1786_v53, %v1785_v52  ;;  %v1787_v4 = vld [vmem:[%s14175_s1 + $0x40] sm:$0xff]  ;;  %v10277_v6 = vpack.c.bf16 %v1816_v60, %v1815_v59 }
 0x147   : > { %10248 = vmatprep.subr.bf16.mxu0 %v10247_v51  ;;  %v1788_v5 = vld [vmem:[%s14175_s1 + $0x48] sm:$0xff]  ;;  %v1805_v7 = vld [vmem:[%s14175_s1 + $0xd0] sm:$0xff]  ;;  %v1806_v8 = vld [vmem:[%s14175_s1 + $0xd8] sm:$0xff]  ;;  %v10279_v9 = vpack.c.bf16 %v1834_v0, %v1833_v63 }
 0x148   : > { %v11531_v2 = vpop.xlane.xlu1 %1651  ;;  %10274 = vmatpush3.bf16.msra.mxu1 %v10273_v54  ;;  %v1817_v10 = vld [vmem:[%s14175_s1 + $0x130] sm:$0xff]  ;;  %v1818_v12 = vld [vmem:[%s14175_s1 + $0x138] sm:$0xff]  ;;  %v1835_v13 = vld [vmem:[%s14175_s1 + $0x1c0] sm:$0xff]  ;;  %v10253_v16 = vpack.c.bf16 %v1788_v5, %v1787_v4  ;;  %v10255_v18 = vpack.c.bf16 %v1806_v8, %v1805_v7 }
 0x149   : > { %10276 = vmatprep.subr.bf16.mxu1 %v10275_v58  ;;  %v1836_v14 = vld [vmem:[%s14175_s1 + $0x1c8] sm:$0xff]  ;;  %v1789_v19 = vld [vmem:[%s14175_s1 + $0x50] sm:$0xff]  ;;  %v1790_v20 = vld [vmem:[%s14175_s1 + $0x58] sm:$0xff]  ;;  %v10281_v21 = vpack.c.bf16 %v1818_v12, %v1817_v10 }
 0x14a   : > { %10250 = vmatpush3.bf16.msra.mxu0 %v10249_v1  ;;  %v1807_v22 = vld [vmem:[%s14175_s1 + $0xe0] sm:$0xff]  ;;  %v1808_v23 = vld [vmem:[%s14175_s1 + $0xe8] sm:$0xff]  ;;  %v10283_v24 = vpack.c.bf16 %v1836_v14, %v1835_v13  ;;  %v1837_v30 = vld [vmem:[%s14175_s1 + $0x1d0] sm:$0xff]  ;;  %v10257_v33 = vpack.c.bf16 %v1790_v20, %v1789_v19 }
 0x14b   : > { %v11557_v15 = vpop.xlane.xlu0 %1653  ;;  %10252 = vmatprep.subr.bf16.mxu0 %v10251_v3  ;;  %v1819_v25 = vld [vmem:[%s14175_s1 + $0x140] sm:$0xff]  ;;  %v1820_v26 = vld [vmem:[%s14175_s1 + $0x148] sm:$0xff]  ;;  %v1838_v32 = vld [vmem:[%s14175_s1 + $0x1d8] sm:$0xff]  ;;  %v10259_v35 = vpack.c.bf16 %v1808_v23, %v1807_v22 }
 0x14c   : > { %10278 = vmatpush3.bf16.msra.mxu1 %v10277_v6  ;;  %v1791_v36 = vld [vmem:[%s14175_s1 + $0x60] sm:$0xff]  ;;  %v1792_v37 = vld [vmem:[%s14175_s1 + $0x68] sm:$0xff]  ;;  %v10285_v38 = vpack.c.bf16 %v1820_v26, %v1819_v25  ;;  %v1809_v39 = vld [vmem:[%s14175_s1 + $0xf0] sm:$0xff]  ;;  %v10287_v41 = vpack.c.bf16 %v1838_v32, %v1837_v30 }
 0x14d   : > { %10280 = vmatprep.subr.bf16.mxu1 %v10279_v9  ;;  %v1810_v40 = vld [vmem:[%s14175_s1 + $0xf8] sm:$0xff]  ;;  %v1821_v42 = vld [vmem:[%s14175_s1 + $0x150] sm:$0xff]  ;;  %v1839_v47 = vld [vmem:[%s14175_s1 + $0x1e0] sm:$0xff]  ;;  %v10261_v50 = vpack.c.bf16 %v1792_v37, %v1791_v36 }
 0x14e   : > { %v11577_v28 = vpop.xlane.xlu1 %1687  ;;  %10254 = vmatpush3.bf16.msra.mxu0 %v10253_v16  ;;  %v1822_v45 = vld [vmem:[%s14175_s1 + $0x158] sm:$0xff]  ;;  %v1840_v48 = vld [vmem:[%s14175_s1 + $0x1e8] sm:$0xff]  ;;  %v10263_v51 = vpack.c.bf16 %v1810_v40, %v1809_v39  ;;  %v1793_v52 = vld [vmem:[%s14175_s1 + $0x70] sm:$0xff]  ;;  %v14184_v39 = vlaneseq }
 0x14f   : > { %10256 = vmatprep.subr.bf16.mxu0 %v10255_v18  ;;  %v1794_v53 = vld [vmem:[%s14175_s1 + $0x78] sm:$0xff]  ;;  %v10289_v54 = vpack.c.bf16 %v1822_v45, %v1821_v42  ;;  %v10291_v55 = vpack.c.bf16 %v1840_v48, %v1839_v47  ;;  %v1823_v56 = vld [vmem:[%s14175_s1 + $0x160] sm:$0xff]  ;;  %v1824_v58 = vld [vmem:[%s14175_s1 + $0x168] sm:$0xff] }
 0x150   : > { %v11585_v34 = vpop.xlane.xlu0 %1595  ;;  %10282 = vmatpush3.bf16.msra.mxu1 %v10281_v21  ;;  %v1841_v60 = vld [vmem:[%s14175_s1 + $0x1f0] sm:$0xff]  ;;  %v1842_v63 = vld [vmem:[%s14175_s1 + $0x1f8] sm:$0xff]  ;;  %v10265_v0 = vpack.c.bf16 %v1794_v53, %v1793_v52  ;;  %v10293_v3 = vpack.c.bf16 %v1824_v58, %v1823_v56  ;;  %v11695_v45 = vshrl.u32 %v14184_v39, 7 }
 0x151   : > { %10284 = vmatprep.subr.bf16.mxu1 %v10283_v24  ;;  %v10295_v4 = vpack.c.bf16 %v1842_v63, %v1841_v60  ;;  %v1825_v5 = vld [vmem:[%s14175_s1 + $0x170] sm:$0xff]  ;;  %v1826_v6 = vld [vmem:[%s14175_s1 + $0x178] sm:$0xff]  ;;  %v11715_v60 = vmul.f32 0.0009765625, %v11383_v57  ;;  %v11732_v57 = vmul.f32 0.0009765625, %v11364_v27 }
 0x152   : > { %10258 = vmatpush3.bf16.msra.mxu0 %v10257_v33  ;;  %v10297_v8 = vpack.c.bf16 %v1826_v6, %v1825_v5 }
 0x153   : > { %v11611_v49 = vpop.xlane.xlu1 %1629  ;;  %10260 = vmatprep.subr.bf16.mxu0 %v10259_v35  ;;  %14294 = vst [vmem:[#allocation24_spill] sm:$0xff] %v11715_v60  ;;  %14299 = vst [vmem:[#allocation29_spill] sm:$0xff] %v11732_v57 }
 0x154   : > { %10286 = vmatpush3.bf16.msra.mxu1 %v10285_v38 }
 0x155   : > { %10288 = vmatprep.subr.bf16.mxu1 %v10287_v41  ;;  %v11690_v41 = vand.u32 127, %v14184_v39 }
 0x156   : > { %v11625_v59 = vpop.xlane.xlu0 %1655  ;;  %10262 = vmatpush3.bf16.msra.mxu0 %v10261_v50 }
 0x157   : > { %10264 = vmatprep.subr.bf16.mxu0 %v10263_v51  ;;  %v1914_v47 = vadd.s32 4294967288, %v11690_v41  ;;  %v1921_v48 = vadd.s32 4294967280, %v11690_v41  ;;  %v1928_v50 = vadd.s32 4294967272, %v11690_v41  ;;  %v1935_v51 = vadd.s32 4294967264, %v11690_v41 }
 0x158   : > { %v11633_v1 = vpop.xlane.xlu1 %1689  ;;  %10290 = vmatpush3.bf16.msra.mxu1 %v10289_v54  ;;  %v1942_v52 = vadd.s32 4294967256, %v11690_v41  ;;  %v1949_v54 = vadd.s32 4294967248, %v11690_v41  ;;  %v1963_v6 = vadd.s32 4294967232, %v11690_v41  ;;  %v1984_v39 = vadd.s32 4294967208, %v11690_v41 }
 0x159   : > { %10292 = vmatprep.subr.bf16.mxu1 %v10291_v55  ;;  %v11707_v55 = vsub.s32 %v11690_v41, %v11695_v45  ;;  %v11712_v58 = vsub.s32 %v1914_v47, %v11695_v45  ;;  %v11718_v63 = vsub.s32 %v1921_v48, %v11695_v45  ;;  %v1970_v47 = vadd.s32 4294967224, %v11690_v41 }
 0x15a   : > { %10266 = vmatpush3.bf16.msra.mxu0 %v10265_v0  ;;  %v1956_v0 = vadd.s32 4294967240, %v11690_v41  ;;  %v11728_v5 = vsub.s32 %v1942_v52, %v11695_v45  ;;  %v1977_v48 = vadd.s32 4294967216, %v11690_v41  ;;  %v11745_v52 = vmul.f32 0.0009765625, %v11405_v29 }
 0x15b   : > { %v11641_v7 = vpop.xlane.xlu0 %1597  ;;  %14291 = vst [vmem:[#allocation21_spill] sm:$0xff] %v11707_v55  ;;  %14293 = vst [vmem:[#allocation23_spill] sm:$0xff] %v11712_v58  ;;  %v1991_v27 = vadd.s32 4294967200, %v11690_v41  ;;  %v11762_v29 = vmul.f32 0.0009765625, %v11433_v62 }
 0x15c   : > { %10294 = vmatpush3.bf16.msra.mxu1 %v10293_v3  ;;  %14295 = vst [vmem:[#allocation25_spill] sm:$0xff] %v11718_v63  ;;  %v11722_v3 = vsub.s32 %v1928_v50, %v11695_v45  ;;  %14298 = vst [vmem:[#allocation28_spill] sm:$0xff] %v11728_v5 }
 0x15d   : > { %10296 = vmatprep.subr.bf16.mxu1 %v10295_v4  ;;  %v11725_v4 = vsub.s32 %v1935_v51, %v11695_v45  ;;  %v11742_v51 = vmul.f32 0.0009765625, %v11394_v11  ;;  %14303 = vst [vmem:[#allocation33_spill] sm:$0xff] %v11745_v52  ;;  %v11759_v11 = vmul.f32 0.0009765625, %v11414_v43  ;;  %14307 = vst [vmem:[#allocation37_spill] sm:$0xff] %v11762_v29  ;;  %v11779_v43 = vsub.s32 %v1977_v48, %v11695_v45 }
 0x15e   : > { %v11643_v9 = vpop.xlane.xlu1 %1631  ;;  %14296 = vst [vmem:[#allocation26_spill] sm:$0xff] %v11722_v3 }
 0x15f   : > { %14297 = vst [vmem:[#allocation27_spill] sm:$0xff] %v11725_v4  ;;  %14302 = vst [vmem:[#allocation32_spill] sm:$0xff] %v11742_v51  ;;  %v1918_v62 = vrot.slane %v11742_v51, %v11712_v58 }
 0x160   : > { %v11645_v10 = vpop.xlane.xlu0 %1657  ;;  %10298 = vmatpush3.bf16.msra.mxu1 %v10297_v8  ;;  %v11735_v8 = vsub.s32 %v1949_v54, %v11695_v45  ;;  %v2026_v54 = vrot.slane %v11715_v60, %v11712_v58  ;;  %14306 = vst [vmem:[#allocation36_spill] sm:$0xff] %v11759_v11  ;;  %v2022_v60 = vrot.slane %v11732_v57, %v11707_v55  ;;  %14312 = vst [vmem:[#allocation42_spill] sm:$0xff] %v11779_v43 }
 0x161   : > { %v11789_v57 = vsub.s32 %v1991_v27, %v11695_v45  ;;  %v2036_v27 = vrot.slane %v11762_v29, %v11722_v3 }
 0x162   : > { %14300 = vst [vmem:[#allocation30_spill] sm:$0xff] %v11735_v8  ;;  %v2027_v48 = vsel %vm1919_vm0, %v2026_v54, %v2022_v60  ;;  %v11815_v60 = vmul.f32 0.0009765625, %v11523_v61  ;;  %v11821_v54 = vmul.f32 0.0009765625, %v11577_v28  ;;  %v11837_v28 = vmul.f32 0.0009765625, %v11611_v49 }
 0x163   : > { %v11647_v12 = vpop.xlane.xlu1 %1691  ;;  %14314 = vst [vmem:[#allocation44_spill] sm:$0xff] %v11789_v57 }
 0x164   : > { %14318 = vst [vmem:[#allocation48_spill] sm:$0xff] %v11815_v60  ;;  %14319 = vst [vmem:[#allocation49_spill] sm:$0xff] %v11821_v54  ;;  %v2041_v49 = vrot.slane %v11815_v60, %v11725_v4 }
 0x165   : > { %14321 = vst [vmem:[#allocation51_spill] sm:$0xff] %v11837_v28 }
 0x166   : > { %v11649_v13 = vpop.xlane.xlu0 %1599 }
 0x168   : > { %v11651_v14 = vpop.xlane.xlu1 %1633 }
 0x16b   : > { %v11653_v16 = vpop.xlane.xlu0 %1659 }
 0x16e   : > { %v11655_v18 = vpop.xlane.xlu1 %1693 }
 0x170   : > { %v11657_v19 = vpop.xlane.xlu0 %1601 }
 0x173   : > { %v11659_v20 = vpop.xlane.xlu1 %1635 }
 0x176   : > { %v11661_v21 = vpop.xlane.xlu0 %1661 }
 0x178   : > { %v11663_v22 = vpop.xlane.xlu1 %1695 }
 0x17b   : > { %v11665_v23 = vpop.xlane.xlu0 %1603 }
 0x17e   : > { %v11667_v24 = vpop.xlane.xlu1 %1637 }
 0x180   : > { %v11669_v25 = vpop.xlane.xlu0 %1663 }
 0x183   : > { %v11671_v26 = vpop.xlane.xlu1 %1697 }
 0x184   : > { %14286 = vst [vmem:[#allocation16_spill] sm:$0xff] %v11671_v26  ;;  %v11786_v26 = vsub.s32 %v1984_v39, %v11695_v45  ;;  %v1925_v39 = vrot.slane %v11759_v11, %v11718_v63 }
 0x186   : > { %v11673_v30 = vpop.xlane.xlu0 %1605  ;;  %14313 = vst [vmem:[#allocation43_spill] sm:$0xff] %v11786_v26 }
 0x188   : > { %v11675_v32 = vpop.xlane.xlu1 %1639 }
 0x18b   : > { %v11677_v33 = vpop.xlane.xlu0 %1665 }
 0x18c   : > { %14287 = vst [vmem:[#allocation17_spill] sm:$0xff] %v11677_v33  ;;  %v11765_v33 = vsub.s32 %v1963_v6, %v11695_v45  ;;  %v2031_v6 = vrot.slane %v11745_v52, %v11718_v63  ;;  %v11807_v52 = vmul.f32 0.0009765625, %v11497_v46 }
 0x18e   : > { %v11679_v35 = vpop.xlane.xlu1 %1699  ;;  %14308 = vst [vmem:[#allocation38_spill] sm:$0xff] %v11765_v33  ;;  %v2032_v11 = vsel %vm1926_vm1, %v2031_v6, %v2027_v48  ;;  %v11847_v6 = vmul.f32 0.0009765625, %v11633_v1  ;;  %v2189_v48 = vrot.slane %v11821_v54, %v11718_v63  ;;  %v11864_v1 = vmul.f32 0.0009765625, %v11643_v9 }
 0x18f   : > { %14288 = vst [vmem:[#allocation18_spill] sm:$0xff] %v11679_v35  ;;  %v11776_v35 = vsub.s32 %v1970_v47, %v11695_v45 }
 0x190   : > { %v11681_v36 = vpop.xlane.xlu0 %1607  ;;  %14322 = vst [vmem:[#allocation52_spill] sm:$0xff] %v11847_v6  ;;  %14323 = vst [vmem:[#allocation53_spill] sm:$0xff] %v11864_v1  ;;  %v2194_v54 = vrot.slane %v11847_v6, %v11722_v3  ;;  %v11901_v6 = vmul.f32 0.0009765625, %v11659_v20 }
 0x191   : > { %14311 = vst [vmem:[#allocation41_spill] sm:$0xff] %v11776_v35 }
 0x192   : > { %14327 = vst [vmem:[#allocation57_spill] sm:$0xff] %v11901_v6 }
 0x193   : > { %v11683_v37 = vpop.xlane.xlu1 %1641 }
 0x196   : > { %v11685_v38 = vpop.xlane.xlu0 %1667 }
 0x197   : > { %14289 = vst [vmem:[#allocation19_spill] sm:$0xff] %v11685_v38  ;;  %v11755_v38 = vsub.s32 %v1956_v0, %v11695_v45  ;;  %v11773_v0 = vmul.f32 0.0009765625, %v11477_v31 }
 0x198   : > { %v11687_v40 = vpop.xlane.xlu1 %1701 }
 0x199   : > { %14290 = vst [vmem:[#allocation20_spill] sm:$0xff] %v11687_v40  ;;  %14305 = vst [vmem:[#allocation35_spill] sm:$0xff] %v11755_v38 }
 0x19a   : > { %14310 = vst [vmem:[#allocation40_spill] sm:$0xff] %v11773_v0 }
 0x19b   : > { %v11692_v42 = vpop.xlane.xlu0 %1609 }
 0x19e   : > { %v11702_v53 = vpop.xlane.xlu1 %1643 }
 0x1a0   : > { %v11709_v56 = vpop.xlane.xlu0 %1669 }
 0x1a1   : > { %14292 = vst [vmem:[#allocation22_spill] sm:$0xff] %v11709_v56  ;;  %v11750_v56 = vmul.f32 0.0009765625, %v11375_v44  ;;  %v2005_v44 = vadd.s32 4294967184, %v11690_v41 }
 0x1a3   : > { %v11739_v50 = vpop.xlane.xlu1 %1703  ;;  %14304 = vst [vmem:[#allocation34_spill] sm:$0xff] %v11750_v56  ;;  %v1913_v47 = vrot.slane %v11750_v56, %v11707_v55  ;;  %v11810_v56 = vsub.s32 %v2005_v44, %v11695_v45  ;;  %v11828_v44 = vmul.f32 0.0009765625, %v11585_v34  ;;  %v2037_v34 = vsel %vm1933_vm2, %v2036_v27, %v2032_v11 }
 0x1a4   : > { %14301 = vst [vmem:[#allocation31_spill] sm:$0xff] %v11739_v50  ;;  %v1998_v50 = vadd.s32 4294967192, %v11690_v41 }
 0x1a5   : > { %14317 = vst [vmem:[#allocation47_spill] sm:$0xff] %v11810_v56  ;;  %v1920_v46 = vsel %vm1919_vm0, %v1918_v62, %v1913_v47  ;;  %v1939_v11 = vrot.slane %v11828_v44, %v11725_v4 }
 0x1a6   : > { %v11767_v40 = vpop.xlane.xlu0 %1611  ;;  %v11800_v51 = vsub.s32 %v1998_v50, %v11695_v45  ;;  %v11818_v50 = vmul.f32 0.0009765625, %v11557_v15  ;;  %v11834_v15 = vmul.f32 0.0009765625, %v11531_v2  ;;  %v1927_v62 = vsel %vm1926_vm1, %v1925_v39, %v1920_v46 }
 0x1a7   : > { %14309 = vst [vmem:[#allocation39_spill] sm:$0xff] %v11767_v40  ;;  %v11797_v40 = vmul.f32 0.0009765625, %v11459_v17  ;;  %v2184_v17 = vrot.slane %v11773_v0, %v11712_v58  ;;  %v2012_v0 = vadd.s32 4294967176, %v11690_v41  ;;  %v1932_v41 = vrot.slane %v11807_v52, %v11722_v3 }
 0x1a8   : > { %v11791_v31 = vpop.xlane.xlu1 %1645  ;;  %14316 = vst [vmem:[#allocation46_spill] sm:$0xff] %v11800_v51  ;;  %v11861_v39 = vmul.f32 0.0009765625, %v11641_v7  ;;  %v2101_v46 = vrot.slane %v11834_v15, %v11707_v55  ;;  %v11878_v7 = vmul.f32 0.0009765625, %v11645_v10 }
 0x1a9   : > { %14315 = vst [vmem:[#allocation45_spill] sm:$0xff] %v11797_v40  ;;  %v2180_v61 = vrot.slane %v11797_v40, %v11707_v55  ;;  %v1934_v9 = vsel %vm1933_vm2, %v1932_v41, %v1927_v62  ;;  %v11887_v55 = vmul.f32 0.0009765625, %v11649_v13  ;;  %v2042_v40 = vsel %vm1940_vm3, %v2041_v49, %v2037_v34 }
 0x1aa   : > { %v1941_v41 = vsel %vm1940_vm3, %v1939_v11, %v1934_v9  ;;  %v2051_v13 = vrot.slane %v11864_v1, %v11735_v8  ;;  %v11908_v49 = vmul.f32 0.0009765625, %v11667_v24  ;;  %v11916_v11 = vmul.f32 0.0009765625, %v11675_v32 }
 0x1ab   : > { %v11823_v29 = vpop.xlane.xlu0 %1671  ;;  %v2185_v2 = vsel %vm1919_vm0, %v2184_v17, %v2180_v61  ;;  %v11869_v17 = vsub.s32 %v2012_v0, %v11695_v45  ;;  %v2046_v61 = vrot.slane %v11837_v28, %v11728_v5  ;;  %v11884_v0 = vmul.f32 0.0009765625, %v11647_v12 }
 0x1ac   : > { %14320 = vst [vmem:[#allocation50_spill] sm:$0xff] %v11823_v29  ;;  %v11840_v29 = vmul.f32 0.0009765625, %v11625_v59  ;;  %v2105_v59 = vrot.slane %v11818_v50, %v11712_v58  ;;  %v2190_v10 = vsel %vm1926_vm1, %v2189_v48, %v2185_v2  ;;  %v11893_v28 = vmul.f32 0.0009765625, %v11651_v14  ;;  %14328 = vst [vmem:[#allocation58_spill] sm:$0xff] %v11908_v49 }
 0x1ad   : > { %14324 = vst [vmem:[#allocation54_spill] sm:$0xff] %v11869_v17  ;;  %14325 = vst [vmem:[#allocation55_spill] sm:$0xff] %v11884_v0  ;;  %v1946_v12 = vrot.slane %v11861_v39, %v11728_v5  ;;  %v2047_v34 = vsel %vm1947_vm4, %v2046_v61, %v2042_v40  ;;  %v2115_v14 = vrot.slane %v11878_v7, %v11722_v3  ;;  %v11923_v24 = vmul.f32 0.0009765625, %v11653_v16 }
 0x1ae   : > { %v11849_v47 = vpop.xlane.xlu1 %1705  ;;  %v2110_v58 = vrot.slane %v11840_v29, %v11718_v63  ;;  %v2106_v63 = vsel %vm1919_vm0, %v2105_v59, %v2101_v46  ;;  %14326 = vst [vmem:[#allocation56_spill] sm:$0xff] %v11893_v28  ;;  %v2195_v59 = vsel %vm1933_vm2, %v2194_v54, %v2190_v10  ;;  %v2199_v48 = vrot.slane %v11884_v0, %v11725_v4 }
 0x1af   : > { %v1953_v20 = vrot.slane %v11887_v55, %v11735_v8  ;;  %14329 = vst [vmem:[#allocation59_spill] sm:$0xff] %v11916_v11  ;;  %v11929_v54 = vmul.f32 0.0009765625, %v11683_v37  ;;  %v1948_v46 = vsel %vm1947_vm4, %v1946_v12, %v1941_v41  ;;  %v2052_v32 = vsel %vm1954_vm5, %v2051_v13, %v2047_v34 }
 0x1b0   : > { %v11866_v27 = vpop.xlane.xlu0 %1613  ;;  %v2111_v2 = vsel %vm1926_vm1, %v2110_v58, %v2106_v63  ;;  %v2056_v58 = vrot.slane %v11893_v28, %v11755_v38  ;;  %v11926_v63 = vmul.f32 0.0009765625, %v11655_v18  ;;  %v2061_v61 = vrot.slane %v11901_v6, %v11765_v33 }
 0x1b1   : > { %14331 = vst [vmem:[#allocation61_spill] sm:$0xff] %v11929_v54  ;;  %v11936_v9 = vmul.f32 0.0009765625, %v11702_v53  ;;  %v2116_v16 = vsel %vm1933_vm2, %v2115_v14, %v2111_v2  ;;  %v11942_v18 = vmul.f32 0.0009765625, %v11657_v19  ;;  %v2066_v37 = vrot.slane %v11908_v49, %v11776_v35 }
 0x1b2   : > { %14330 = vst [vmem:[#allocation60_spill] sm:$0xff] %v11926_v63  ;;  %v11947_v41 = vmul.f32 0.0009765625, %v11791_v31  ;;  %v2200_v12 = vsel %vm1940_vm3, %v2199_v48, %v2195_v59  ;;  %v1955_v13 = vsel %vm1954_vm5, %v1953_v20, %v1948_v46  ;;  %v2071_v53 = vrot.slane %v11916_v11, %v11779_v43 }
 0x1b3   : > { %v1648_v62 = vpop.xlane.xlu1 %1647  ;;  %14332 = vst [vmem:[#allocation62_spill] sm:$0xff] %v11936_v9  ;;  %v2057_v2 = vsel %vm1961_vm6, %v2056_v58, %v2052_v32  ;;  %v2120_v19 = vrot.slane %v11923_v24, %v11725_v4  ;;  %v2204_v14 = vrot.slane %v11926_v63, %v11728_v5  ;;  %v2076_v31 = vrot.slane %v11929_v54, %v11786_v26 }
 0x1b4   : > { %14333 = vst [vmem:[#allocation63_spill] sm:$0xff] %v11947_v41  ;;  %v11953_v34 = vmul.f32 0.0009765625, %v1648_v62  ;;  %v2062_v59 = vsel %vm1968_vm7, %v2061_v61, %v2057_v2  ;;  %v11964_v48 = vmul.f32 0.0009765625, %v11661_v21  ;;  %v11967_v62 = vmul.f32 0.0009765625, %v11665_v23 }
 0x1b5   : > { %v2081_v20 = vrot.slane %v11936_v9, %v11789_v57  ;;  %v1960_v58 = vrot.slane %v11942_v18, %v11755_v38  ;;  %v2067_v46 = vsel %vm1975_vm8, %v2066_v37, %v2062_v59  ;;  %v11975_v32 = vmul.f32 0.0009765625, %v11673_v30  ;;  %v14339_v9 = vld [vmem:[#allocation16_spill] sm:$0xff] }
 0x1b6   : > { %v11918_v40 = vpop.xlane.xlu0 %1673  ;;  %14334 = vst [vmem:[#allocation64_spill] sm:$0xff] %v11953_v34  ;;  %14335 = vst [vmem:[#allocation65_spill] sm:$0xff] %v11964_v48  ;;  %v2086_v61 = vrot.slane %v11947_v41, %v11800_v51  ;;  %v11980_v21 = vmul.f32 0.0009765625, %v11663_v22  ;;  %v2072_v23 = vsel %vm1982_vm9, %v2071_v53, %v2067_v46  ;;  %v11984_v2 = vmul.f32 0.0009765625, %v11681_v36  ;;  %v14338_v53 = vld [vmem:[#allocation39_spill] sm:$0xff] }
 0x1b7   : > { %v2091_v4 = vrot.slane %v11953_v34, %v11810_v56  ;;  %v11989_v37 = vmul.f32 0.0009765625, %v11669_v25  ;;  %v2077_v30 = vsel %vm1989_vm10, %v2076_v31, %v2072_v23  ;;  %v11993_v59 = vmul.f32 0.0009765625, %v11692_v42 }
 0x1b8   : > { %v11938_v10 = vpop.xlane.xlu1 %1707  ;;  %14336 = vst [vmem:[#allocation66_spill] sm:$0xff] %v11980_v21  ;;  %v2125_v22 = vrot.slane %v11964_v48, %v11728_v5  ;;  %v1967_v36 = vrot.slane %v11967_v62, %v11765_v33  ;;  %v12002_v46 = vmul.f32 0.0009765625, %v14338_v53  ;;  %v2082_v25 = vsel %vm1996_vm11, %v2081_v20, %v2077_v30 }
 0x1b9   : > { %v1974_v31 = vrot.slane %v11975_v32, %v11776_v35  ;;  %v12008_v42 = vmul.f32 0.0009765625, %v11866_v27  ;;  %v2087_v23 = vsel %vm2003_vm12, %v2086_v61, %v2082_v25  ;;  %v2209_v5 = vrot.slane %v11980_v21, %v11735_v8 }
 0x1ba   : > { %v1981_v53 = vrot.slane %v11984_v2, %v11779_v43  ;;  %v2092_v20 = vsel %vm2010_vm13, %v2091_v4, %v2087_v23  ;;  %v1962_v30 = vsel %vm1961_vm6, %v1960_v58, %v1955_v13  ;;  %v2130_v27 = vrot.slane %v11989_v37, %v11735_v8 }
 0x1bb   : > { %v1616_v3 = vpop.xlane.xlu0 %1615  ;;  %v2121_v25 = vsel %vm1940_vm3, %v2120_v19, %v2116_v16  ;;  %v1969_v21 = vsel %vm1968_vm7, %v1967_v36, %v1962_v30  ;;  %v1995_v4 = vrot.slane %v12002_v46, %v11789_v57  ;;  %v2205_v13 = vsel %vm1947_vm4, %v2204_v14, %v2200_v12  ;;  %v14341_v19 = vld [vmem:[#allocation18_spill] sm:$0xff]  ;;  %v14343_v14 = vld [vmem:[#allocation20_spill] sm:$0xff] }
 0x1bc   : > { %v12017_v34 = vmul.f32 0.0009765625, %v1616_v3  ;;  %v12029_v3 = vmul.f32 0.0009765625, %v14339_v9  ;;  %v2126_v58 = vsel %vm1947_vm4, %v2125_v22, %v2121_v25  ;;  %v1976_v23 = vsel %vm1975_vm8, %v1974_v31, %v1969_v21 }
 0x1bd   : > { %v2210_v16 = vsel %vm1954_vm5, %v2209_v5, %v2205_v13  ;;  %v12040_v36 = vmul.f32 0.0009765625, %v14341_v19  ;;  %v1983_v9 = vsel %vm1982_vm9, %v1981_v53, %v1976_v23  ;;  %v2131_v12 = vsel %vm1954_vm5, %v2130_v27, %v2126_v58  ;;  %v14347_v53 = vld [vmem:[#allocation31_spill] sm:$0xff] }
 0x1be   : > { %v1650_v63 = vpop.xlane.xlu1 %1649  ;;  %14340 = vst [vmem:[#allocation39_spill] sm:$0xff] %v12029_v3  ;;  %v12047_v22 = vmul.f32 0.0009765625, %v14343_v14  ;;  %v2214_v5 = vrot.slane %v12029_v3, %v11755_v38  ;;  %v12058_v13 = vmul.f32 0.0009765625, %v14347_v53  ;;  %v14349_v27 = vld [vmem:[#allocation19_spill] sm:$0xff]  ;;  %v12065_v14 = vmul.f32 0.0009765625, %v11849_v47 }
 0x1bf   : > { %v11995_v0 = vmul.f32 0.0009765625, %v1650_v63  ;;  %14342 = vst [vmem:[#allocation16_spill] sm:$0xff] %v12040_v36  ;;  %v12062_v58 = vmul.f32 0.0009765625, %v14349_v27  ;;  %v14355_v27 = vld [vmem:[#allocation50_spill] sm:$0xff] }
 0x1c0   : > { %v1676_v41 = vpop.xlane.xlu0 %1675  ;;  %14344 = vst [vmem:[#allocation18_spill] sm:$0xff] %v12047_v22  ;;  %14351 = vst [vmem:[#allocation19_spill] sm:$0xff] %v12065_v14  ;;  %v2224_v47 = vrot.slane %v12047_v22, %v11776_v35  ;;  %v12082_v8 = vmul.f32 0.0009765625, %v14355_v27 }
 0x1c1   : > { %14337 = vst [vmem:[#allocation67_spill] sm:$0xff] %v11995_v0  ;;  %v2096_v63 = vrot.slane %v11995_v0, %v11869_v17  ;;  %v1988_v0 = vrot.slane %v11993_v59, %v11786_v26  ;;  %14350 = vst [vmem:[#allocation31_spill] sm:$0xff] %v12062_v58 }
 0x1c2   : > { %14356 = vst [vmem:[#allocation50_spill] sm:$0xff] %v12082_v8 }
 0x1c3   : > { %v1710_v54 = vpop.xlane.xlu1 %1709  ;;  %v2097_v61 = vsel %vm2017_vm14, %v2096_v63, %v2092_v20  ;;  %v2002_v63 = vrot.slane %v12008_v42, %v11800_v51  ;;  %v2009_v20 = vrot.slane %v12017_v34, %v11810_v56  ;;  %v1990_v21 = vsel %vm1989_vm10, %v1988_v0, %v1983_v9 }
 0x1c4   : > { %2324 = vmatprep.mubr.f32.mxu0 %v2097_v61  ;;  %v14345_v61 = vld [vmem:[#allocation17_spill] sm:$0xff]  ;;  %v1997_v23 = vsel %vm1996_vm11, %v1995_v4, %v1990_v21  ;;  %v12076_v4 = vmul.f32 0.0009765625, %v11938_v10  ;;  %v12084_v3 = vmul.f32 0.0009765625, %v1710_v54  ;;  %v2229_v10 = vrot.slane %v12058_v13, %v11779_v43 }
 0x1c5   : > { %v12055_v25 = vmul.f32 0.0009765625, %v14345_v61  ;;  %14348 = vst [vmem:[#allocation17_spill] sm:$0xff] %v12058_v13  ;;  %v2004_v9 = vsel %vm2003_vm12, %v2002_v63, %v1997_v23  ;;  %v14352_v61 = vld [vmem:[#allocation22_spill] sm:$0xff]  ;;  %v2140_v54 = vrot.slane %v12062_v58, %v11765_v33 }
 0x1c6   : > { %v1618_v30 = vpop.xlane.xlu0 %1617  ;;  %v12073_v53 = vmul.f32 0.0009765625, %v14352_v61  ;;  %14354 = vst [vmem:[#allocation68_spill] sm:$0xff] %v12076_v4  ;;  %v2011_v21 = vsel %vm2010_vm13, %v2009_v20, %v2004_v9  ;;  %14357 = vst [vmem:[#allocation69_spill] sm:$0xff] %v12084_v3  ;;  %v2215_v9 = vsel %vm1961_vm6, %v2214_v5, %v2210_v16  ;;  %v2150_v5 = vrot.slane %v12082_v8, %v11779_v43 }
 0x1c7   : > { %v12050_v31 = vmul.f32 0.0009765625, %v1618_v30  ;;  %14346 = vst [vmem:[#allocation20_spill] sm:$0xff] %v12055_v25  ;;  %v2219_v30 = vrot.slane %v12040_v36, %v11765_v33  ;;  %v2135_v61 = vrot.slane %v12055_v25, %v11755_v38  ;;  %v12092_v36 = vmul.f32 0.0009765625, %v11918_v40 }
 0x1c8   : > { %v1678_v19 = vpop.xlane.xlu1 %1677  ;;  %14353 = vst [vmem:[#allocation22_spill] sm:$0xff] %v12073_v53  ;;  %v2145_v38 = vrot.slane %v12073_v53, %v11776_v35  ;;  %v2239_v40 = vrot.slane %v12076_v4, %v11789_v57 }
 0x1c9   : > { %v2016_v0 = vrot.slane %v12050_v31, %v11869_v17  ;;  %14358 = vst [vmem:[#allocation70_spill] sm:$0xff] %v12092_v36  ;;  %v2220_v27 = vsel %vm1968_vm7, %v2219_v30, %v2215_v9  ;;  %v2136_v30 = vsel %vm1961_vm6, %v2135_v61, %v2131_v12  ;;  %v2155_v35 = vrot.slane %v12092_v36, %v11786_v26 }
 0x1ca   : > { %v2225_v16 = vsel %vm1975_vm8, %v2224_v47, %v2220_v27  ;;  %v2141_v47 = vsel %vm1968_vm7, %v2140_v54, %v2136_v30 }
 0x1cb   : > { %v1712_v63 = vpop.xlane.xlu0 %1711  ;;  %v2018_v23 = vsel %vm2017_vm14, %v2016_v0, %v2011_v21  ;;  %v2234_v0 = vrot.slane %v12065_v14, %v11786_v26  ;;  %v12101_v21 = vmul.f32 0.0009765625, %v1676_v41  ;;  %v2244_v41 = vrot.slane %v12084_v3, %v11800_v51 }
 0x1cc   : > { %v12094_v20 = vmul.f32 0.0009765625, %v1712_v63  ;;  %2325 = vmatmul.mubr.f32.vlgmr.msra.gmra.mrb[0].mxu0 %v2018_v23  ;;  %v12108_v63 = vmul.f32 0.0009765625, %v1678_v19  ;;  %v2230_v9 = vsel %vm1982_vm9, %v2229_v10, %v2225_v16  ;;  %v2146_v12 = vsel %vm1975_vm8, %v2145_v38, %v2141_v47 }
 0x1cd   : > { %14360 = vst [vmem:[#allocation72_spill] sm:$0xff] %v12101_v21  ;;  %v2235_v27 = vsel %vm1989_vm10, %v2234_v0, %v2230_v9  ;;  %v2160_v43 = vrot.slane %v12101_v21, %v11789_v57  ;;  %v2151_v16 = vsel %vm1982_vm9, %v2150_v5, %v2146_v12 }
 0x1ce   : > { %14359 = vst [vmem:[#allocation71_spill] sm:$0xff] %v12094_v20  ;;  %14361 = vst [vmem:[#allocation73_spill] sm:$0xff] %v12108_v63  ;;  %v1680_v23 = vpop.xlane.xlu1 %1679  ;;  %v2249_v19 = vrot.slane %v12094_v20, %v11810_v56  ;;  %v2165_v61 = vrot.slane %v12108_v63, %v11800_v51  ;;  %v2240_v10 = vsel %vm1996_vm11, %v2239_v40, %v2235_v27  ;;  %v2415_v51 = vld [vmem:[#allocation8 + $0x70] sm:$0xff] }
 0x1cf   : > { %v12115_v33 = vmul.f32 0.0009765625, %v1680_v23  ;;  %v2245_v30 = vsel %vm2003_vm12, %v2244_v41, %v2240_v10  ;;  %v2406_v10 = vld [vmem:[#allocation8 + $0x28] sm:$0xff] }
 0x1d0   : > { %v1714_v14 = vpop.xlane.xlu0 %1713  ;;  %v2250_v38 = vsel %vm2010_vm13, %v2249_v19, %v2245_v30  ;;  %v2408_v19 = vld [vmem:[#allocation8 + $0x38] sm:$0xff]  ;;  %v2401_v30 = vld [vmem:[#allocation8] sm:$0xff] }
 0x1d1   : > { %14362 = vst [vmem:[#allocation74_spill] sm:$0xff] %v12115_v33  ;;  %v12127_v23 = vmul.f32 0.0009765625, %v1714_v14  ;;  %v2170_v26 = vrot.slane %v12115_v33, %v11810_v56  ;;  %v2156_v14 = vsel %vm1989_vm10, %v2155_v35, %v2151_v16  ;;  %v2402_v35 = vld [vmem:[#allocation8 + $0x8] sm:$0xff]  ;;  %v2404_v16 = vld [vmem:[#allocation8 + $0x18] sm:$0xff]  ;;  %v2407_v56 = vld [vmem:[#allocation8 + $0x30] sm:$0xff] }
 0x1d2   : > { %v2161_v47 = vsel %vm1996_vm11, %v2160_v43, %v2156_v14  ;;  %v2405_v43 = vld [vmem:[#allocation8 + $0x20] sm:$0xff]  ;;  %v10307_v14 = vpack.c.bf16 %v2408_v19, %v2404_v16 }
 0x1d3   : > { %14363 = vst [vmem:[#allocation75_spill] sm:$0xff] %v12127_v23  ;;  %v2254_v54 = vrot.slane %v12127_v23, %v11869_v17  ;;  %v1682_v0 = vpop.xlane.xlu1 %1681  ;;  %v2166_v27 = vsel %vm2003_vm12, %v2165_v61, %v2161_v47  ;;  %v2410_v61 = vld [vmem:[#allocation8 + $0x48] sm:$0xff]  ;;  %v2412_v47 = vld [vmem:[#allocation8 + $0x58] sm:$0xff] }
 0x1d4   : > { %v12140_v9 = vmul.f32 0.0009765625, %v1682_v0  ;;  %v2171_v12 = vsel %vm2010_vm13, %v2170_v26, %v2166_v27  ;;  %v10299_v0 = vpack.c.bf16 %v2406_v10, %v2402_v35  ;;  %10308 = vmatprep.subr.bf16.mxu1 %v10307_v14  ;;  %v2414_v26 = vld [vmem:[#allocation8 + $0x68] sm:$0xff]  ;;  %v2416_v27 = vld [vmem:[#allocation8 + $0x78] sm:$0xff] }
 0x1d5   : > { %v2255_v40 = vsel %vm2017_vm14, %v2254_v54, %v2250_v38  ;;  %v10301_v54 = vpack.c.bf16 %v2405_v43, %v2401_v30  ;;  %v2403_v38 = vld [vmem:[#allocation8 + $0x10] sm:$0xff]  ;;  %v10311_v35 = vpack.c.bf16 %v2416_v27, %v2412_v47  ;;  %v1843_v43 = vld [vmem:[#allocation6] sm:$0x1] }
 0x1d6   : > { %14364 = vst [vmem:[#allocation76_spill] sm:$0xff] %v12140_v9  ;;  %v2175_v5 = vrot.slane %v12140_v9, %v11869_v17  ;;  %2394 = vmatprep.mubr.f32.mxu1 %v2255_v40  ;;  %10300 = vmatprep.subr.bf16.mxu0 %v10299_v0  ;;  %v10309_v40 = vpack.c.bf16 %v2407_v56, %v2403_v38  ;;  %v2411_v17 = vld [vmem:[#allocation8 + $0x50] sm:$0xff]  ;;  %v10647_v56 = vmov 0.0  }
 0x1d7   : > { %10302 = vmatpush1.bf16.msra.mxu0 %v10301_v54  ;;  %v10313_v16 = vpack.c.bf16 %v2415_v51, %v2411_v17  ;;  %2507 = vmatprep.mubr.f32.mxu0 %v10647_v56  ;;  %v12151_v51 = vsub.s32 0, %v11695_v45  ;;  %v2417_v17 = vld [vmem:[#allocation9] sm:$0xf] }
 0x1d8   : > { %v2176_v41 = vsel %vm2017_vm14, %v2175_v5, %v2171_v12  ;;  %v10303_v5 = vpack.c.bf16 %v2414_v26, %v2410_v61  ;;  %v2409_v12 = vld [vmem:[#allocation8 + $0x40] sm:$0xff] }
 0x1d9   : > { %2395 = vmatmul.mubr.f32.vlgmr.msra.gmra.mrb[0].mxu1 %v2176_v41  ;;  %v2413_v41 = vld [vmem:[#allocation8 + $0x60] sm:$0xff]  ;;  %v2422_v47 = vrot.slane %v2417_v17, %v12151_v51 }
 0x1da   : > { %10310 = vmatpush1.bf16.msra.mxu1 %v10309_v40  ;;  %v10305_v10 = vpack.c.bf16 %v2413_v41, %v2409_v12  ;;  %10304 = vmatprep.subr.bf16.mxu0 %v10303_v5 }
 0x1db   : > { %10312 = vmatprep.subr.bf16.mxu1 %v10311_v35  ;;  %2578 = vmatprep.mubr.f32.mxu1 %v10647_v56 }
 0x1dc   : > { %10306 = vmatpush1.bf16.msra.mxu0 %v10305_v10 }
 0x1de   : > { %10314 = vmatpush1.bf16.msra.mxu1 %v10313_v16  ;;  %v2429_v16 = vsub.s32 2, %v11695_v45 }
 0x29f   : > { %v10197_v0 = vpop.f32.mrb[0].mxu0 }
 0x2a0   : > { %v10198_v19 = vpop.f32.mrb[1].mxu0 }
 0x2a1   : > { %v10199_v30 = vadd.f32 %v10198_v19, %v10197_v0  ;;  %v2430_v0 = vrot.slane %v2417_v17, %v2429_v16 }
 0x2a3   : > { %v2327_v38 = vadd.f32 %v10199_v30, %v1843_v43 }
 0x2ac   : > { %v10232_v14 = vpop.f32.mrb[0].mxu1 }
 0x2ad   : > { %v10233_v54 = vpop.f32.mrb[1].mxu1 }
 0x2ae   : > { %v10234_v40 = vadd.f32 %v10233_v54, %v10232_v14 }
 0x2b0   : > { %v2397_v61 = vadd.f32 %v10234_v40, %v2327_v38 }
 0x2b2   : > { %v2400_v26 = vmax.f32 %v2397_v61, 0.0  ;;  %v2425_v61 = vsub.s32 1, %v11695_v45 }
 0x2b4   : > { %10024 = vmatmul.mubr.msk.f32.vlgmr.msra.gmra.mrb[2].mxu0 %vm2439_vm15, %v2400_v26  ;;  %10025 = vmatmul.mubr.msk.f32.vlgmr.msra.gmra.mrb[2].mxu1 %vm2439_vm15, %v2400_v26  ;;  %v2426_v26 = vrot.slane %v2417_v17, %v2425_v61 }
 0x387   : > { %v2509_v5 = vpop.f32.mrb[2].mxu0  ;;  %v2580_v27 = vpop.f32.mrb[2].mxu1 }
 0x388   : > { %v2510_v12 = vadd.f32 %v2509_v5, %v2422_v47  ;;  %v2511_v41 = vpop.f32.mrb[3].mxu0  ;;  %v2582_v35 = vpop.f32.mrb[3].mxu1  ;;  %v2581_v30 = vadd.f32 %v2580_v27, %v2430_v0 }
 0x389   : > { %v2512_v47 = vadd.f32 %v2511_v41, %v2426_v26 }
 0x38a   : > { %v10026_v10 = vmul.f32 -1.442695, %v2510_v12  ;;  %v10028_v43 = vmul.f32 -1.442695, %v2581_v30 }
 0x38b   : > { %v10027_v27 = vmul.f32 -1.442695, %v2512_v47 }
 0x38c   : > { %10417 = vpow2.f32 %v10026_v10  ;;  %v10648_v10 = vmov 0  }
 0x38d   : > { %10416 = vset.pattern.permute.xlu1 %v10648_v10  ;;  %10415 = vset.pattern.permute.xlu0 %v10648_v10  ;;  %v14366_v10 = vld [vmem:[#allocation34_spill] sm:$0xff] }
 0x396   : > { %v10418_v56 = vpop.eup %10417 }
 0x397   : > { %v2597_v19 = vadd.f32 1.0, %v10418_v56  ;;  %v2433_v56 = vsub.s32 3, %v11695_v45 }
 0x399   : > { %10419 = vrcp.f32 %v2597_v19  ;;  %v2434_v0 = vrot.slane %v2417_v17, %v2433_v56 }
 0x39a   : > { %10421 = vpow2.f32 %v10028_v43 }
 0x39b   : > { %v2583_v19 = vadd.f32 %v2582_v35, %v2434_v0 }
 0x39d   : > { %v10029_v43 = vmul.f32 -1.442695, %v2583_v19 }
 0x3a3   : > { %v10420_v14 = vpop.eup %10419 }
 0x3a4   : > { %v2616_v54 = vrot.slane %v10420_v14, %v12151_v51  ;;  %v10422_v38 = vpop.eup %10421 }
 0x3a5   : > { %v2599_v40 = vadd.f32 1.0, %v10422_v38 }
 0x3a6   : > { %2622 = vbcast.lane.b32.xlu1 %v2616_v54, 264  ;;  %2618 = vbcast.lane.b32.xlu0 %v2616_v54, 256 }
 0x3a7   : > { %10423 = vrcp.f32 %v2599_v40  ;;  %v10649_v40 = vmov 1966171168  }
 0x3a8   : > { %10425 = vpow2.f32 %v10027_v27  ;;  %v3075_v61 = vunpack.c.l.s4 %v10649_v40  ;;  %v14365_v27 = vld [vmem:[#allocation32_spill] sm:$0xff] }
 0x3aa   : > { %2626 = vbcast.lane.b32.xlu1 %v2616_v54, 272  ;;  %2634 = vbcast.lane.b32.xlu0 %v2616_v54, 288  ;;  %v3076_v26 = vunpack.c.0.s8 %v3075_v61 }
 0x3ae   : > { %2630 = vbcast.lane.b32.xlu1 %v2616_v54, 280  ;;  %2642 = vbcast.lane.b32.xlu0 %v2616_v54, 304 }
 0x3b1   : > { %v10424_v5 = vpop.eup %10423 }
 0x3b2   : > { %2638 = vbcast.lane.b32.xlu1 %v2616_v54, 296  ;;  %2650 = vbcast.lane.b32.xlu0 %v2616_v54, 320  ;;  %v2750_v12 = vrot.slane %v10424_v5, %v12151_v51  ;;  %v10426_v16 = vpop.eup %10425 }
 0x3b3   : > { %v2598_v41 = vadd.f32 1.0, %v10426_v16 }
 0x3b5   : > { %10427 = vrcp.f32 %v2598_v41 }
 0x3b6   : > { %2646 = vbcast.lane.b32.xlu1 %v2616_v54, 312  ;;  %2658 = vbcast.lane.b32.xlu0 %v2616_v54, 336  ;;  %10429 = vpow2.f32 %v10029_v43  ;;  %v14367_v43 = vld [vmem:[#allocation36_spill] sm:$0xff] }
 0x3ba   : > { %2654 = vbcast.lane.b32.xlu1 %v2616_v54, 328  ;;  %2666 = vbcast.lane.b32.xlu0 %v2616_v54, 352 }
 0x3be   : > { %2662 = vbcast.lane.b32.xlu1 %v2616_v54, 344  ;;  %2674 = vbcast.lane.b32.xlu0 %v2616_v54, 368 }
 0x3bf   : > { %v10428_v30 = vpop.eup %10427 }
 0x3c0   : > { %v2683_v14 = vrot.slane %v10428_v30, %v12151_v51 }
 0x3c2   : > { %2670 = vbcast.lane.b32.xlu1 %v2616_v54, 360  ;;  %2752 = vbcast.lane.b32.xlu0 %v2750_v12, 256 }
 0x3c6   : > { %2678 = vbcast.lane.b32.xlu1 %v2616_v54, 376  ;;  %2760 = vbcast.lane.b32.xlu0 %v2750_v12, 272  ;;  %v10430_v54 = vpop.eup %10429 }
 0x3c7   : > { %v2600_v17 = vadd.f32 1.0, %v10430_v54 }
 0x3c9   : > { %10431 = vrcp.f32 %v2600_v17 }
 0x3ca   : > { %2756 = vbcast.lane.b32.xlu1 %v2750_v12, 264  ;;  %2768 = vbcast.lane.b32.xlu0 %v2750_v12, 288 }
 0x3ce   : > { %2764 = vbcast.lane.b32.xlu1 %v2750_v12, 280  ;;  %2776 = vbcast.lane.b32.xlu0 %v2750_v12, 304 }
 0x3d2   : > { %2772 = vbcast.lane.b32.xlu1 %v2750_v12, 296  ;;  %2784 = vbcast.lane.b32.xlu0 %v2750_v12, 320 }
 0x3d3   : > { %v10432_v35 = vpop.eup %10431 }
 0x3d4   : > { %v2817_v38 = vrot.slane %v10432_v35, %v12151_v51  ;;  %v12163_v51 = vsub.s32 %v3076_v26, %v11695_v45 }
 0x3d6   : > { %2780 = vbcast.lane.b32.xlu1 %v2750_v12, 312  ;;  %2792 = vbcast.lane.b32.xlu0 %v2750_v12, 336 }
 0x3da   : > { %2788 = vbcast.lane.b32.xlu1 %v2750_v12, 328  ;;  %2800 = vbcast.lane.b32.xlu0 %v2750_v12, 352 }
 0x3de   : > { %2796 = vbcast.lane.b32.xlu1 %v2750_v12, 344  ;;  %2808 = vbcast.lane.b32.xlu0 %v2750_v12, 368 }
 0x3e2   : > { %2804 = vbcast.lane.b32.xlu1 %v2750_v12, 360  ;;  %2685 = vbcast.lane.b32.xlu0 %v2683_v14, 256 }
 0x3e6   : > { %2812 = vbcast.lane.b32.xlu1 %v2750_v12, 376  ;;  %2693 = vbcast.lane.b32.xlu0 %v2683_v14, 272 }
 0x3ea   : > { %2689 = vbcast.lane.b32.xlu1 %v2683_v14, 264  ;;  %2701 = vbcast.lane.b32.xlu0 %v2683_v14, 288 }
 0x3ee   : > { %2697 = vbcast.lane.b32.xlu1 %v2683_v14, 280  ;;  %2709 = vbcast.lane.b32.xlu0 %v2683_v14, 304 }
 0x3f2   : > { %2705 = vbcast.lane.b32.xlu1 %v2683_v14, 296  ;;  %2717 = vbcast.lane.b32.xlu0 %v2683_v14, 320 }
 0x3f6   : > { %2713 = vbcast.lane.b32.xlu1 %v2683_v14, 312  ;;  %2725 = vbcast.lane.b32.xlu0 %v2683_v14, 336 }
 0x3fa   : > { %2721 = vbcast.lane.b32.xlu1 %v2683_v14, 328  ;;  %2733 = vbcast.lane.b32.xlu0 %v2683_v14, 352 }
 0x3fe   : > { %2729 = vbcast.lane.b32.xlu1 %v2683_v14, 344  ;;  %2741 = vbcast.lane.b32.xlu0 %v2683_v14, 368 }
 0x402   : > { %2737 = vbcast.lane.b32.xlu1 %v2683_v14, 360  ;;  %2819 = vbcast.lane.b32.xlu0 %v2817_v38, 256 }
 0x406   : > { %2745 = vbcast.lane.b32.xlu1 %v2683_v14, 376  ;;  %2827 = vbcast.lane.b32.xlu0 %v2817_v38, 272 }
 0x40a   : > { %2823 = vbcast.lane.b32.xlu1 %v2817_v38, 264  ;;  %2835 = vbcast.lane.b32.xlu0 %v2817_v38, 288 }
 0x40e   : > { %2831 = vbcast.lane.b32.xlu1 %v2817_v38, 280  ;;  %2843 = vbcast.lane.b32.xlu0 %v2817_v38, 304 }
 0x412   : > { %2839 = vbcast.lane.b32.xlu1 %v2817_v38, 296  ;;  %2851 = vbcast.lane.b32.xlu0 %v2817_v38, 320 }
 0x416   : > { %2847 = vbcast.lane.b32.xlu1 %v2817_v38, 312  ;;  %2859 = vbcast.lane.b32.xlu0 %v2817_v38, 336 }
 0x418   : > { %v2623_v47 = vpop.permute.xlu1 %2622  ;;  %v2619_v5 = vpop.permute.xlu0 %2618 }
 0x419   : > { %v2946_v12 = vmul.f32 %v2623_v47, %v14365_v27  ;;  %v2945_v16 = vmul.f32 %v2619_v5, %v14366_v10 }
 0x41a   : > { %2855 = vbcast.lane.b32.xlu1 %v2817_v38, 328  ;;  %2867 = vbcast.lane.b32.xlu0 %v2817_v38, 352 }
 0x41b   : > { %v3122_v41 = vcombine.high %v2946_v12, %v2946_v12  ;;  %v3129_v0 = vrot.slane %v2946_v12, %v12163_v51  ;;  %v3073_v19 = vcombine.high %v2945_v16, %v2945_v16  ;;  %v3080_v30 = vrot.slane %v2945_v16, %v12163_v51 }
 0x41c   : > { %v2627_v56 = vpop.permute.xlu1 %2626  ;;  %v2635_v35 = vpop.permute.xlu0 %2634 }
 0x41d   : > { %v2947_v14 = vmul.f32 %v2627_v56, %v14367_v43  ;;  %v3136_v54 = vrot.slane %v3122_v41, %v12163_v51  ;;  %v3137_v17 = vcombine.high %v3129_v0, %v3129_v0  ;;  %v3087_v45 = vrot.slane %v3073_v19, %v12163_v51 }
 0x41e   : > { %2863 = vbcast.lane.b32.xlu1 %v2817_v38, 344  ;;  %2875 = vbcast.lane.b32.xlu0 %v2817_v38, 368  ;;  %v3088_v40 = vcombine.high %v3080_v30, %v3080_v30  ;;  %v2949_v5 = vmul.f32 %v2635_v35, %v11828_v44  ;;  %v3145_v16 = vrot.slane %v3129_v0, %v12163_v51 }
 0x41f   : > { %v3171_v61 = vcombine.high %v2947_v14, %v2947_v14  ;;  %v3138_v26 = vcombine.high %v3136_v54, %v3136_v54  ;;  %v3178_v47 = vrot.slane %v2947_v14, %v12163_v51  ;;  %v3159_v27 = vrot.slane %v3137_v17, %v12163_v51 }
 0x420   : > { %v3089_v12 = vcombine.high %v3087_v45, %v3087_v45  ;;  %v2631_v10 = vpop.permute.xlu1 %2630  ;;  %v3110_v41 = vrot.slane %v3088_v40, %v12163_v51  ;;  %v3269_v57 = vcombine.high %v2949_v5, %v2949_v5  ;;  %v3096_v14 = vrot.slane %v3080_v30, %v12163_v51  ;;  %v2643_v35 = vpop.permute.xlu0 %2642 }
 0x421   : > { %v3185_v56 = vrot.slane %v3171_v61, %v12163_v51  ;;  %v3166_v19 = vrot.slane %v3138_v26, %v12163_v51  ;;  %v3186_v43 = vcombine.high %v3178_v47, %v3178_v47  ;;  %v6258_v23 = vcombine.low %v3145_v16, %v3159_v27 }
 0x422   : > { %2871 = vbcast.lane.b32.xlu1 %v2817_v38, 360  ;;  %v10032_v3 = vcombine.high %v3145_v16, %v3159_v27  ;;  %v2948_v44 = vmul.f32 %v2631_v10, %v11807_v52  ;;  %v3117_v17 = vrot.slane %v3089_v12, %v12163_v51  ;;  %v3276_v0 = vrot.slane %v2949_v5, %v12163_v51 }
 0x423   : > { %v3103_v40 = vrot.slane %v3087_v45, %v12163_v51  ;;  %v6209_v61 = vcombine.low %v3096_v14, %v3110_v41  ;;  %v10030_v20 = vcombine.high %v3096_v14, %v3110_v41  ;;  %v3187_v26 = vcombine.high %v3185_v56, %v3185_v56 }
 0x424   : > { %v3208_v27 = vrot.slane %v3186_v43, %v12163_v51  ;;  %v3283_v30 = vrot.slane %v3269_v57, %v12163_v51  ;;  %v2639_v16 = vpop.permute.xlu1 %2638  ;;  %v12187_v52 = vrot.slane %v6258_v23, %v12163_v51  ;;  %v3220_v5 = vcombine.high %v2948_v44, %v2948_v44 }
 0x425   : > { %v2951_v12 = vmul.f32 %v2643_v35, %v11887_v55  ;;  %v6211_v45 = vcombine.low %v3103_v40, %v3117_v17  ;;  %v3194_v10 = vrot.slane %v3178_v47, %v12163_v51  ;;  %v3284_v41 = vcombine.high %v3276_v0, %v3276_v0 }
 0x426   : > { %2879 = vbcast.lane.b32.xlu1 %v2817_v38, 376  ;;  %v3152_v38 = vrot.slane %v3136_v54, %v12163_v51  ;;  %v12190_v54 = vrot.slane %v10032_v3, %v12163_v51  ;;  %v10031_v14 = vcombine.high %v3103_v40, %v3117_v17  ;;  %v12196_v43 = vrot.slane %v6209_v61, %v12163_v51 }
 0x427   : > { %v3215_v57 = vrot.slane %v3187_v26, %v12163_v51  ;;  %v2950_v23 = vmul.f32 %v2639_v16, %v11861_v39  ;;  %v6307_v55 = vcombine.low %v3194_v10, %v3208_v27  ;;  %v3285_v35 = vcombine.high %v3283_v30, %v3283_v30  ;;  %v2651_v26 = vpop.permute.xlu0 %2650 }
 0x428   : > { %v6260_v4 = vcombine.low %v3152_v38, %v3166_v19  ;;  %v10033_v22 = vcombine.high %v3152_v38, %v3166_v19  ;;  %v3227_v19 = vrot.slane %v2948_v44, %v12163_v51  ;;  %v12204_v38 = vrot.slane %v10030_v20, %v12163_v51  ;;  %v2647_v28 = vpop.permute.xlu1 %2646 }
 0x429   : > { %v3201_v47 = vrot.slane %v3185_v56, %v12163_v51  ;;  %v10034_v13 = vcombine.high %v3194_v10, %v3208_v27  ;;  %v3234_v44 = vrot.slane %v3220_v5, %v12163_v51  ;;  %v3367_v17 = vcombine.high %v2951_v12, %v2951_v12 }
 0x42a   : > { %v12201_v3 = vrot.slane %v6260_v4, %v12163_v51  ;;  %v12209_v40 = vrot.slane %v10033_v22, %v12163_v51  ;;  %v12212_v61 = vrot.slane %v6211_v45, %v12163_v51  ;;  %v3306_v39 = vrot.slane %v3284_v41, %v12163_v51 }
 0x42b   : > { %v3235_v4 = vcombine.high %v3227_v19, %v3227_v19  ;;  %v12216_v20 = vrot.slane %v10031_v14, %v12163_v51  ;;  %v6309_v16 = vcombine.low %v3201_v47, %v3215_v57  ;;  %v3374_v56 = vrot.slane %v2951_v12, %v12163_v51 }
 0x42c   : > { %v3318_v27 = vcombine.high %v2950_v23, %v2950_v23  ;;  %v10035_v10 = vcombine.high %v3201_v47, %v3215_v57  ;;  %v12220_v5 = vrot.slane %v6307_v55, %v12163_v51  ;;  %v3292_v22 = vrot.slane %v3276_v0, %v12163_v51 }
 0x42d   : > { %v3313_v45 = vrot.slane %v3285_v35, %v12163_v51  ;;  %v12225_v49 = vrot.slane %v10034_v13, %v12163_v51  ;;  %v3236_v41 = vcombine.high %v3234_v44, %v3234_v44  ;;  %v3381_v11 = vrot.slane %v3367_v17, %v12163_v51 }
 0x42e   : > { %v2953_v14 = vmul.f32 %v2651_v26, %v11967_v62  ;;  %v3299_v12 = vrot.slane %v3283_v30, %v12163_v51  ;;  %v6405_v6 = vcombine.low %v3292_v22, %v3306_v39  ;;  %v3257_v57 = vrot.slane %v3235_v4, %v12163_v51 }
 0x42f   : > { %v3325_v55 = vrot.slane %v2950_v23, %v12163_v51  ;;  %v12233_v0 = vrot.slane %v6309_v16, %v12163_v51  ;;  %v10038_v35 = vcombine.high %v3292_v22, %v3306_v39  ;;  %v3382_v47 = vcombine.high %v3374_v56, %v3374_v56 }
 0x430   : > { %v3332_v13 = vrot.slane %v3318_v27, %v12163_v51  ;;  %v6407_v1 = vcombine.low %v3299_v12, %v3313_v45  ;;  %v10039_v60 = vcombine.high %v3299_v12, %v3313_v45  ;;  %v3243_v17 = vrot.slane %v3227_v19, %v12163_v51 }
 0x431   : > { %v2952_v62 = vmul.f32 %v2647_v28, %v11942_v18  ;;  %v12239_v30 = vrot.slane %v10035_v10, %v12163_v51  ;;  %v3264_v4 = vrot.slane %v3236_v41, %v12163_v51  ;;  %v3383_v26 = vcombine.high %v3381_v11, %v3381_v11 }
 0x432   : > { %v3465_v23 = vcombine.high %v2953_v14, %v2953_v14  ;;  %v12243_v16 = vrot.slane %v6405_v6, %v12163_v51  ;;  %v3250_v39 = vrot.slane %v3234_v44, %v12163_v51  ;;  %v6356_v22 = vcombine.low %v3243_v17, %v3257_v57 }
 0x433   : > { %v3333_v27 = vcombine.high %v3325_v55, %v3325_v55  ;;  %v10036_v9 = vcombine.high %v3243_v17, %v3257_v57  ;;  %v3404_v45 = vrot.slane %v3382_v47, %v12163_v51  ;;  %v3334_v19 = vcombine.high %v3332_v13, %v3332_v13 }
 0x434   : > { %v3472_v28 = vrot.slane %v2953_v14, %v12163_v51  ;;  %v12249_v18 = vrot.slane %v10038_v35, %v12163_v51  ;;  %v12252_v10 = vrot.slane %v6407_v1, %v12163_v51  ;;  %v12255_v41 = vrot.slane %v10039_v60, %v12163_v51 }
 0x435   : > { %v3416_v6 = vcombine.high %v2952_v62, %v2952_v62  ;;  %v6358_v12 = vcombine.low %v3250_v39, %v3264_v4  ;;  %v3390_v44 = vrot.slane %v3374_v56, %v12163_v51  ;;  %v3411_v57 = vrot.slane %v3383_v26, %v12163_v51 }
 0x436   : > { %v3479_v47 = vrot.slane %v3465_v23, %v12163_v51  ;;  %v10037_v17 = vcombine.high %v3250_v39, %v3264_v4  ;;  %v12261_v14 = vrot.slane %v6356_v22, %v12163_v51  ;;  %v3397_v35 = vrot.slane %v3381_v11, %v12163_v51  ;;  %v2659_v39 = vpop.permute.xlu0 %2658 }
 0x437   : > { %v3355_v1 = vrot.slane %v3333_v27, %v12163_v51  ;;  %v12266_v63 = vrot.slane %v10036_v9, %v12163_v51  ;;  %v6503_v60 = vcombine.low %v3390_v44, %v3404_v45  ;;  %v3362_v33 = vrot.slane %v3334_v19, %v12163_v51 }
 0x438   : > { %v3480_v36 = vcombine.high %v3472_v28, %v3472_v28  ;;  %v10042_v56 = vcombine.high %v3390_v44, %v3404_v45  ;;  %v3341_v26 = vrot.slane %v3325_v55, %v12163_v51  ;;  %v3423_v23 = vrot.slane %v2952_v62, %v12163_v51 }
 0x439   : > { %v3430_v4 = vrot.slane %v3416_v6, %v12163_v51  ;;  %v6505_v22 = vcombine.low %v3397_v35, %v3411_v57  ;;  %v10043_v21 = vcombine.high %v3397_v35, %v3411_v57  ;;  %v3348_v11 = vrot.slane %v3332_v13, %v12163_v51  ;;  %v2655_v57 = vpop.permute.xlu1 %2654 }
 0x43a   : > { %v3481_v27 = vcombine.high %v3479_v47, %v3479_v47  ;;  %v12274_v9 = vrot.slane %v6358_v12, %v12163_v51  ;;  %v12277_v53 = vrot.slane %v10037_v17, %v12163_v51  ;;  %v6454_v19 = vcombine.low %v3341_v26, %v3355_v1 }
 0x43b   : > { %v10040_v45 = vcombine.high %v3341_v26, %v3355_v1  ;;  %v12280_v55 = vrot.slane %v6503_v60, %v12163_v51  ;;  %v6456_v62 = vcombine.low %v3348_v11, %v3362_v33  ;;  %v3502_v6 = vrot.slane %v3480_v36, %v12163_v51 }
 0x43c   : > { %v2955_v44 = vmul.f32 %v2659_v39, %v11984_v2  ;;  %v12285_v13 = vrot.slane %v10042_v56, %v12163_v51  ;;  %v10041_v35 = vcombine.high %v3348_v11, %v3362_v33  ;;  %v3431_v12 = vcombine.high %v3423_v23, %v3423_v23  ;;  %v2667_v39 = vpop.permute.xlu0 %2666 }
 0x43d   : > { %v3432_v8 = vcombine.high %v3430_v4, %v3430_v4  ;;  %v12288_v17 = vrot.slane %v6505_v22, %v12163_v51  ;;  %v12291_v1 = vrot.slane %v10043_v21, %v12163_v51  ;;  %v3488_v60 = vrot.slane %v3472_v28, %v12163_v51 }
 0x43e   : > { %v3509_v26 = vrot.slane %v3481_v27, %v12163_v51  ;;  %v12296_v36 = vrot.slane %v6454_v19, %v12163_v51  ;;  %v12299_v2 = vrot.slane %v10040_v45, %v12163_v51  ;;  %v3495_v33 = vrot.slane %v3479_v47, %v12163_v51 }
 0x43f   : > { %v2954_v56 = vmul.f32 %v2655_v57, %v11975_v32  ;;  %v12304_v22 = vrot.slane %v6456_v62, %v12163_v51  ;;  %v6601_v21 = vcombine.low %v3488_v60, %v3502_v6  ;;  %v3563_v11 = vcombine.high %v2955_v44, %v2955_v44 }
 0x440   : > { %v3570_v28 = vrot.slane %v2955_v44, %v12163_v51  ;;  %v12308_v27 = vrot.slane %v10041_v35, %v12163_v51  ;;  %v10046_v19 = vcombine.high %v3488_v60, %v3502_v6  ;;  %v3453_v25 = vrot.slane %v3431_v12, %v12163_v51 }
 0x441   : > { %v3460_v45 = vrot.slane %v3432_v8, %v12163_v51  ;;  %v6603_v58 = vcombine.low %v3495_v33, %v3509_v26  ;;  %v3439_v47 = vrot.slane %v3423_v23, %v12163_v51  ;;  %v2957_v32 = vmul.f32 %v2667_v39, %v12002_v46 }
 0x442   : > { %v6291_v62 = vcombine.low %v12201_v3, %v12209_v40  ;;  %v10047_v57 = vcombine.high %v3495_v33, %v3509_v26  ;;  %v3446_v48 = vrot.slane %v3430_v4, %v12163_v51  ;;  %v3514_v44 = vcombine.high %v2954_v56, %v2954_v56 }
 0x443   : > { %v6290_v35 = vcombine.low %v12187_v52, %v12190_v54  ;;  %v12320_v6 = vrot.slane %v6601_v21, %v12163_v51  ;;  %v3577_v8 = vrot.slane %v3563_v11, %v12163_v51  ;;  %v3578_v12 = vcombine.high %v3570_v28, %v3570_v28  ;;  %v2663_v11 = vpop.permute.xlu1 %2662 }
 0x444   : > { %v3521_v23 = vrot.slane %v2954_v56, %v12163_v51  ;;  %v12325_v46 = vrot.slane %v10046_v19, %v12163_v51  ;;  %v6552_v60 = vcombine.low %v3439_v47, %v3453_v25  ;;  %v10044_v3 = vcombine.high %v3439_v47, %v3453_v25 }
 0x445   : > { %v6554_v40 = vcombine.low %v3446_v48, %v3460_v45  ;;  %v12328_v4 = vrot.slane %v6603_v58, %v12163_v51  ;;  %v10045_v26 = vcombine.high %v3446_v48, %v3460_v45  ;;  %v3661_v33 = vcombine.high %v2957_v32, %v2957_v32 }
 0x446   : > { %v6305_v52 = vrot.slane %v6291_v62, %v12163_v51  ;;  %v3528_v54 = vrot.slane %v3514_v44, %v12163_v51  ;;  %v6298_v39 = vrot.slane %v6290_v35, %v12163_v51  ;;  %v6241_v56 = vcombine.low %v12196_v43, %v12204_v38 }
 0x447   : > { %v6242_v21 = vcombine.low %v12212_v61, %v12216_v20  ;;  %v12338_v25 = vrot.slane %v10047_v57, %v12163_v51  ;;  %v3579_v58 = vcombine.high %v3577_v8, %v3577_v8  ;;  %v3600_v48 = vrot.slane %v3578_v12, %v12163_v51 }
 0x448   : > { %v3529_v19 = vcombine.high %v3521_v23, %v3521_v23  ;;  %v3668_v45 = vrot.slane %v2957_v32, %v12163_v51  ;;  %v6306_v47 = vcombine.low %v6298_v39, %v6305_v52  ;;  %v6249_v62 = vrot.slane %v6241_v56, %v12163_v51  ;;  %v2675_v39 = vpop.permute.xlu0 %2674 }
 0x449   : > { %v6256_v44 = vrot.slane %v6242_v21, %v12163_v51  ;;  %v12345_v43 = vrot.slane %v6552_v60, %v12163_v51  ;;  %v12348_v38 = vrot.slane %v10044_v3, %v12163_v51  ;;  %v3675_v61 = vrot.slane %v3661_v33, %v12163_v51 }
 0x44a   : > { %v2956_v20 = vmul.f32 %v2663_v11, %v11993_v59  ;;  %v12353_v57 = vrot.slane %v6554_v40, %v12163_v51  ;;  %v3586_v32 = vrot.slane %v3570_v28, %v12163_v51  ;;  %v3530_v35 = vcombine.high %v3528_v54, %v3528_v54  ;;  %9349 = vperm.xlu1 %10416, %v6306_v47  }
 0x44b   : > { %v6257_v12 = vcombine.low %v6249_v62, %v6256_v44  ;;  %v3593_v52 = vrot.slane %v3577_v8, %v12163_v51  ;;  %v3607_v60 = vrot.slane %v3579_v58, %v12163_v51  ;;  %v6339_v3 = vcombine.low %v12220_v5, %v12225_v49 }
 0x44c   : > { %v6340_v33 = vcombine.low %v12233_v0, %v12239_v30  ;;  %v6699_v59 = vcombine.low %v3586_v32, %v3600_v48  ;;  %v10050_v56 = vcombine.high %v3586_v32, %v3600_v48  ;;  %v3551_v40 = vrot.slane %v3529_v19, %v12163_v51  ;;  %v2671_v30 = vpop.permute.xlu1 %2670 }
 0x44d   : > { %v3676_v21 = vcombine.high %v3668_v45, %v3668_v45  ;;  %9346 = vperm.xlu0 %10415, %v6257_v12   ;;  %v3677_v28 = vcombine.high %v3675_v61, %v3675_v61  ;;  %v3612_v11 = vcombine.high %v2956_v20, %v2956_v20  ;;  %v6347_v47 = vrot.slane %v6339_v3, %v12163_v51 }
 0x44e   : > { %v6354_v8 = vrot.slane %v6340_v33, %v12163_v51  ;;  %v12366_v58 = vrot.slane %v10045_v26, %v12163_v51  ;;  %v3537_v49 = vrot.slane %v3521_v23, %v12163_v51  ;;  %v3558_v5 = vrot.slane %v3530_v35, %v12163_v51 }
 0x44f   : > { %v2959_v0 = vmul.f32 %v2675_v39, %v12017_v34  ;;  %v6701_v48 = vcombine.low %v3593_v52, %v3607_v60  ;;  %v3544_v19 = vrot.slane %v3528_v54, %v12163_v51  ;;  %v3619_v62 = vrot.slane %v2956_v20, %v12163_v51 }
 0x450   : > { %v6355_v44 = vcombine.low %v6347_v47, %v6354_v8  ;;  %v10051_v32 = vcombine.high %v3593_v52, %v3607_v60  ;;  %v12374_v12 = vrot.slane %v6699_v59, %v12163_v51  ;;  %v12377_v26 = vrot.slane %v10050_v56, %v12163_v51 }
 0x451   : > { %v3698_v23 = vrot.slane %v3676_v21, %v12163_v51  ;;  %v6650_v3 = vcombine.low %v3537_v49, %v3551_v40  ;;  %v3705_v35 = vrot.slane %v3677_v28, %v12163_v51  ;;  %v3626_v34 = vrot.slane %v3612_v11, %v12163_v51 }
 0x452   : > { %9352 = vperm.xlu1 %10416, %v6355_v44   ;;  %v2958_v54 = vmul.f32 %v2671_v30, %v12008_v42  ;;  %v10048_v39 = vcombine.high %v3537_v49, %v3551_v40  ;;  %v6652_v20 = vcombine.low %v3544_v19, %v3558_v5  ;;  %v3684_v52 = vrot.slane %v3668_v45, %v12163_v51  ;;  %v2753_v44 = vpop.permute.xlu0 %2752 }
 0x453   : > { %v3759_v60 = vcombine.high %v2959_v0, %v2959_v0  ;;  %v12385_v33 = vrot.slane %v6701_v48, %v12163_v51  ;;  %v10049_v59 = vcombine.high %v3544_v19, %v3558_v5  ;;  %v3691_v56 = vrot.slane %v3675_v61, %v12163_v51 }
 0x454   : > { %v3627_v21 = vcombine.high %v3619_v62, %v3619_v62  ;;  %v12389_v47 = vrot.slane %v10051_v32, %v12163_v51  ;;  %v6797_v28 = vcombine.low %v3684_v52, %v3698_v23  ;;  %v10054_v11 = vcombine.high %v3684_v52, %v3698_v23 }
 0x455   : > { %v3766_v8 = vrot.slane %v2959_v0, %v12163_v51  ;;  %v12393_v42 = vrot.slane %v6650_v3, %v12163_v51  ;;  %v6799_v40 = vcombine.low %v3691_v56, %v3705_v35  ;;  %v3628_v45 = vcombine.high %v3626_v34, %v3626_v34 }
 0x456   : > { %v3710_v49 = vcombine.high %v2958_v54, %v2958_v54  ;;  %v12396_v30 = vrot.slane %v10048_v39, %v12163_v51  ;;  %v12399_v5 = vrot.slane %v6652_v20, %v12163_v51  ;;  %v10055_v61 = vcombine.high %v3691_v56, %v3705_v35 }
 0x457   : > { %v3773_v48 = vrot.slane %v3759_v60, %v12163_v51  ;;  %v12403_v19 = vrot.slane %v10049_v59, %v12163_v51  ;;  %v3649_v0 = vrot.slane %v3627_v21, %v12163_v51  ;;  %v6388_v32 = vcombine.low %v12261_v14, %v12266_v63 }
 0x458   : > { %v6389_v23 = vcombine.low %v12274_v9, %v12277_v53  ;;  %v12411_v3 = vrot.slane %v6797_v28, %v12163_v51  ;;  %v12414_v39 = vrot.slane %v10054_v11, %v12163_v51  ;;  %v3774_v35 = vcombine.high %v3766_v8, %v3766_v8 }
 0x459   : > { %v3717_v20 = vrot.slane %v2958_v54, %v12163_v51  ;;  %v12418_v52 = vrot.slane %v6799_v40, %v12163_v51  ;;  %v3635_v60 = vrot.slane %v3619_v62, %v12163_v51  ;;  %v3656_v59 = vrot.slane %v3628_v45, %v12163_v51 }
 0x45a   : > { %v3724_v63 = vrot.slane %v3710_v49, %v12163_v51  ;;  %v12424_v53 = vrot.slane %v10055_v61, %v12163_v51  ;;  %v3642_v14 = vrot.slane %v3626_v34, %v12163_v51  ;;  %v3775_v9 = vcombine.high %v3773_v48, %v3773_v48 }
 0x45b   : > { %14368 = vst [vmem:[#allocation32_spill] sm:$0xff] %v12418_v52  ;;  %v2977_v56 = vmul.f32 %v2753_v44, %v11834_v15  ;;  %v6748_v21 = vcombine.low %v3635_v60, %v3649_v0  ;;  %v10052_v28 = vcombine.high %v3635_v60, %v3649_v0  ;;  %v6396_v54 = vrot.slane %v6388_v32, %v12163_v51  ;;  %v2679_v15 = vpop.permute.xlu1 %2678 }
 0x45c   : > { %14369 = vst [vmem:[#allocation34_spill] sm:$0xff] %v12424_v53  ;;  %v6403_v11 = vrot.slane %v6389_v23, %v12163_v51  ;;  %v3796_v62 = vrot.slane %v3774_v35, %v12163_v51  ;;  %v3725_v40 = vcombine.high %v3717_v20, %v3717_v20  ;;  %v6437_v45 = vcombine.low %v12243_v16, %v12249_v18 }
 0x45d   : > { %v6438_v49 = vcombine.low %v12252_v10, %v12255_v41  ;;  %v6750_v61 = vcombine.low %v3642_v14, %v3656_v59  ;;  %v10053_v34 = vcombine.high %v3642_v14, %v3656_v59  ;;  %v3726_v52 = vcombine.high %v3724_v63, %v3724_v63 }
 0x45e   : > { %v6404_v53 = vcombine.low %v6396_v54, %v6403_v11  ;;  %v3782_v0 = vrot.slane %v3766_v8, %v12163_v51  ;;  %v3803_v44 = vrot.slane %v3775_v9, %v12163_v51  ;;  %v6445_v32 = vrot.slane %v6437_v45, %v12163_v51  ;;  %v2761_v54 = vpop.permute.xlu0 %2760 }
 0x45f   : > { %v6452_v23 = vrot.slane %v6438_v49, %v12163_v51  ;;  %v12440_v35 = vrot.slane %v6748_v21, %v12163_v51  ;;  %v12443_v16 = vrot.slane %v10052_v28, %v12163_v51  ;;  %v3789_v18 = vrot.slane %v3773_v48, %v12163_v51 }
 0x460   : > { %v4641_v10 = vcombine.high %v2977_v56, %v2977_v56  ;;  %9355 = vperm.xlu0 %10415, %v6404_v53   ;;  %v6895_v41 = vcombine.low %v3782_v0, %v3796_v62  ;;  %v3747_v60 = vrot.slane %v3725_v40, %v12163_v51  ;;  %v2960_v59 = vmul.f32 %v2679_v15, %v12050_v31 }
 0x461   : > { %v6453_v8 = vcombine.low %v6445_v32, %v6452_v23  ;;  %v12449_v14 = vrot.slane %v6750_v61, %v12163_v51  ;;  %v12452_v9 = vrot.slane %v10053_v34, %v12163_v51  ;;  %v10058_v21 = vcombine.high %v3782_v0, %v3796_v62 }
 0x462   : > { %v3754_v28 = vrot.slane %v3726_v52, %v12163_v51  ;;  %v6897_v11 = vcombine.low %v3789_v18, %v3803_v44  ;;  %v3733_v48 = vrot.slane %v3717_v20, %v12163_v51  ;;  %v4648_v53 = vrot.slane %v2977_v56, %v12163_v51 }
 0x463   : > { %9358 = vperm.xlu1 %10416, %v6453_v8   ;;  %v6486_v40 = vcombine.low %v12296_v36, %v12299_v2  ;;  %v10059_v31 = vcombine.high %v3789_v18, %v3803_v44  ;;  %v3740_v45 = vrot.slane %v3724_v63, %v12163_v51  ;;  %v4655_v49 = vrot.slane %v4641_v10, %v12163_v51 }
 0x464   : > { %v6487_v62 = vcombine.low %v12304_v22, %v12308_v27  ;;  %v12464_v52 = vrot.slane %v6895_v41, %v12163_v51  ;;  %v6846_v61 = vcombine.low %v3733_v48, %v3747_v60  ;;  %v3808_v34 = vcombine.high %v2960_v59, %v2960_v59 }
 0x465   : > { %v2979_v20 = vmul.f32 %v2761_v54, %v11840_v29  ;;  %v10056_v56 = vcombine.high %v3733_v48, %v3747_v60  ;;  %v6848_v15 = vcombine.low %v3740_v45, %v3754_v28  ;;  %v6494_v0 = vrot.slane %v6486_v40, %v12163_v51 }
 0x466   : > { %v6501_v36 = vrot.slane %v6487_v62, %v12163_v51  ;;  %v12470_v2 = vrot.slane %v10058_v21, %v12163_v51  ;;  %v12473_v63 = vrot.slane %v6897_v11, %v12163_v51  ;;  %v4656_v22 = vcombine.high %v4648_v53, %v4648_v53 }
 0x467   : > { %v3815_v27 = vrot.slane %v2960_v59, %v12163_v51  ;;  %v12477_v44 = vrot.slane %v10059_v31, %v12163_v51  ;;  %v10057_v32 = vcombine.high %v3740_v45, %v3754_v28  ;;  %v4657_v29 = vcombine.high %v4655_v49, %v4655_v49 }
 0x468   : > { %v6502_v23 = vcombine.low %v6494_v0, %v6501_v36  ;;  %v3822_v18 = vrot.slane %v3808_v34, %v12163_v51  ;;  %v4739_v10 = vcombine.high %v2979_v20, %v2979_v20  ;;  %v6535_v41 = vcombine.low %v12280_v55, %v12285_v13  ;;  %v2769_v34 = vpop.permute.xlu0 %2768 }
 0x469   : > { %v6536_v60 = vcombine.low %v12288_v17, %v12291_v1  ;;  %v12485_v8 = vrot.slane %v6846_v61, %v12163_v51  ;;  %v12488_v59 = vrot.slane %v10056_v56, %v12163_v51  ;;  %v12491_v21 = vrot.slane %v6848_v15, %v12163_v51  ;;  %v2757_v17 = vpop.permute.xlu1 %2756 }
 0x46a   : > { %v4664_v28 = vrot.slane %v4648_v53, %v12163_v51  ;;  %9361 = vperm.xlu0 %10415, %v6502_v23   ;;  %v4678_v54 = vrot.slane %v4656_v22, %v12163_v51  ;;  %v3823_v11 = vcombine.high %v3815_v27, %v3815_v27  ;;  %v6543_v55 = vrot.slane %v6535_v41, %v12163_v51 }
 0x46b   : > { %v6550_v13 = vrot.slane %v6536_v60, %v12163_v51  ;;  %v4671_v1 = vrot.slane %v4655_v49, %v12163_v51  ;;  %v4685_v48 = vrot.slane %v4657_v29, %v12163_v51  ;;  %v6584_v40 = vcombine.low %v12345_v43, %v12348_v38 }
 0x46c   : > { %v6585_v31 = vcombine.low %v12353_v57, %v12366_v58  ;;  %v3824_v53 = vcombine.high %v3822_v18, %v3822_v18  ;;  %v4746_v45 = vrot.slane %v2979_v20, %v12163_v51  ;;  %v4753_v62 = vrot.slane %v4739_v10, %v12163_v51 }
 0x46d   : > { %v6551_v61 = vcombine.low %v6543_v55, %v6550_v13  ;;  %v2978_v56 = vmul.f32 %v2757_v17, %v11818_v50  ;;  %v6592_v15 = vrot.slane %v6584_v40, %v12163_v51  ;;  %v6633_v0 = vcombine.low %v12320_v6, %v12325_v46  ;;  %v2765_v40 = vpop.permute.xlu1 %2764 }
 0x46e   : > { %v6599_v49 = vrot.slane %v6585_v31, %v12163_v51  ;;  %v12511_v43 = vrot.slane %v10057_v32, %v12163_v51  ;;  %v7777_v38 = vcombine.low %v4664_v28, %v4678_v54  ;;  %v10094_v57 = vcombine.high %v4664_v28, %v4678_v54 }
 0x46f   : > { %v3845_v58 = vrot.slane %v3823_v11, %v12163_v51  ;;  %9364 = vperm.xlu1 %10416, %v6551_v61   ;;  %v7779_v20 = vcombine.low %v4671_v1, %v4685_v48  ;;  %v2981_v36 = vmul.f32 %v2769_v34, %v11923_v24  ;;  %v6634_v50 = vcombine.low %v12328_v4, %v12338_v25 }
 0x470   : > { %v6600_v22 = vcombine.low %v6592_v15, %v6599_v49  ;;  %v10095_v29 = vcombine.high %v4671_v1, %v4685_v48  ;;  %v3831_v23 = vrot.slane %v3815_v27, %v12163_v51  ;;  %v3852_v6 = vrot.slane %v3824_v53, %v12163_v51 }
 0x471   : > { %v4754_v46 = vcombine.high %v4746_v45, %v4746_v45  ;;  %v4755_v32 = vcombine.high %v4753_v62, %v4753_v62  ;;  %v4690_v10 = vcombine.high %v2978_v56, %v2978_v56  ;;  %v6641_v41 = vrot.slane %v6633_v0, %v12163_v51 }
 0x472   : > { %9367 = vperm.xlu0 %10415, %v6600_v22   ;;  %v6648_v60 = vrot.slane %v6634_v50, %v12163_v51  ;;  %v12522_v28 = vrot.slane %v7777_v38, %v12163_v51  ;;  %v12525_v24 = vrot.slane %v10094_v57, %v12163_v51  ;;  %v6944_v4 = vcombine.low %v3831_v23, %v3845_v58 }
 0x473   : > { %v4697_v25 = vrot.slane %v2978_v56, %v12163_v51  ;;  %v3838_v27 = vrot.slane %v3822_v18, %v12163_v51  ;;  %v10060_v54 = vcombine.high %v3831_v23, %v3845_v58  ;;  %v4837_v11 = vcombine.high %v2981_v36, %v2981_v36 }
 0x474   : > { %v6649_v55 = vcombine.low %v6641_v41, %v6648_v60  ;;  %v12530_v13 = vrot.slane %v7779_v20, %v12163_v51  ;;  %v12533_v17 = vrot.slane %v10095_v29, %v12163_v51  ;;  %v4776_v1 = vrot.slane %v4754_v46, %v12163_v51 }
 0x475   : > { %v4844_v48 = vrot.slane %v2981_v36, %v12163_v51  ;;  %v6946_v31 = vcombine.low %v3838_v27, %v3852_v6  ;;  %v10061_v53 = vcombine.high %v3838_v27, %v3852_v6  ;;  %v4783_v61 = vrot.slane %v4755_v32, %v12163_v51 }
 0x476   : > { %v4704_v18 = vrot.slane %v4690_v10, %v12163_v51  ;;  %9370 = vperm.xlu1 %10416, %v6649_v55   ;;  %v12540_v34 = vrot.slane %v6944_v4, %v12163_v51  ;;  %v4762_v56 = vrot.slane %v4746_v45, %v12163_v51  ;;  %v4769_v15 = vrot.slane %v4753_v62, %v12163_v51 }
 0x477   : > { %v4705_v49 = vcombine.high %v4697_v25, %v4697_v25  ;;  %v12545_v0 = vrot.slane %v10060_v54, %v12163_v51  ;;  %v4851_v38 = vrot.slane %v4837_v11, %v12163_v51  ;;  %v2980_v57 = vmul.f32 %v2765_v40, %v11878_v7 }
 0x478   : > { %v6682_v58 = vcombine.low %v12393_v42, %v12396_v30  ;;  %v7875_v20 = vcombine.low %v4762_v56, %v4776_v1  ;;  %v10098_v36 = vcombine.high %v4762_v56, %v4776_v1  ;;  %v4852_v22 = vcombine.high %v4844_v48, %v4844_v48 }
 0x479   : > { %v6683_v50 = vcombine.low %v12399_v5, %v12403_v19  ;;  %v12554_v45 = vrot.slane %v6946_v31, %v12163_v51  ;;  %v12557_v62 = vrot.slane %v10061_v53, %v12163_v51  ;;  %v7877_v29 = vcombine.low %v4769_v15, %v4783_v61  ;;  %v2777_v5 = vpop.permute.xlu0 %2776 }
 0x47a   : > { %v4706_v23 = vcombine.high %v4704_v18, %v4704_v18  ;;  %v10099_v6 = vcombine.high %v4769_v15, %v4783_v61  ;;  %v4727_v7 = vrot.slane %v4705_v49, %v12163_v51  ;;  %v6690_v46 = vrot.slane %v6682_v58, %v12163_v51 }
 0x47b   : > { %v6697_v42 = vrot.slane %v6683_v50, %v12163_v51  ;;  %v4713_v30 = vrot.slane %v4697_v25, %v12163_v51  ;;  %v4853_v32 = vcombine.high %v4851_v38, %v4851_v38  ;;  %v4788_v10 = vcombine.high %v2980_v57, %v2980_v57 }
 0x47c   : > { %v6732_v19 = vcombine.low %v12385_v33, %v12389_v47  ;;  %v4874_v41 = vrot.slane %v4852_v22, %v12163_v51  ;;  %v4795_v60 = vrot.slane %v2980_v57, %v12163_v51  ;;  %v6731_v27 = vcombine.low %v12374_v12, %v12377_v26 }
 0x47d   : > { %v6698_v4 = vcombine.low %v6690_v46, %v6697_v42  ;;  %v12570_v54 = vrot.slane %v7875_v20, %v12163_v51  ;;  %v12573_v11 = vrot.slane %v10098_v36, %v12163_v51  ;;  %v12576_v25 = vrot.slane %v7877_v29, %v12163_v51  ;;  %v2773_v20 = vpop.permute.xlu1 %2772  ;;  %v2785_v29 = vpop.permute.xlu0 %2784 }
 0x47e   : > { %v4734_v55 = vrot.slane %v4706_v23, %v12163_v51  ;;  %v7826_v33 = vcombine.low %v4713_v30, %v4727_v7  ;;  %v10096_v47 = vcombine.high %v4713_v30, %v4727_v7  ;;  %v4860_v1 = vrot.slane %v4844_v48, %v12163_v51 }
 0x47f   : > { %v2983_v40 = vmul.f32 %v2777_v5, %v11989_v37  ;;  %9373 = vperm.xlu0 %10415, %v6698_v4   ;;  %v4720_v12 = vrot.slane %v4704_v18, %v12163_v51  ;;  %v4881_v26 = vrot.slane %v4853_v32, %v12163_v51  ;;  %v4802_v31 = vrot.slane %v4788_v10, %v12163_v51  ;;  %v14370_v32 = vld [vmem:[#allocation65_spill] sm:$0xff] }
 0x480   : > { %v6746_v53 = vrot.slane %v6732_v19, %v12163_v51  ;;  %v12586_v61 = vrot.slane %v10099_v6, %v12163_v51  ;;  %v7973_v56 = vcombine.low %v4860_v1, %v4874_v41  ;;  %v4803_v15 = vcombine.high %v4795_v60, %v4795_v60 }
 0x481   : > { %v6739_v49 = vrot.slane %v6731_v27, %v12163_v51  ;;  %v7828_v57 = vcombine.low %v4720_v12, %v4734_v55  ;;  %v10097_v48 = vcombine.high %v4720_v12, %v4734_v55  ;;  %v4867_v37 = vrot.slane %v4851_v38, %v12163_v51 }
 0x482   : > { %v10102_v58 = vcombine.high %v4860_v1, %v4874_v41  ;;  %v12591_v18 = vrot.slane %v7826_v33, %v12163_v51  ;;  %v12594_v36 = vrot.slane %v10096_v47, %v12163_v51  ;;  %v4935_v22 = vcombine.high %v2983_v40, %v2983_v40  ;;  %v14371_v41 = vld [vmem:[#allocation31_spill] sm:$0xff] }
 0x483   : > { %v6747_v50 = vcombine.low %v6739_v49, %v6746_v53  ;;  %v7975_v23 = vcombine.low %v4867_v37, %v4881_v26  ;;  %v4804_v6 = vcombine.high %v4802_v31, %v4802_v31  ;;  %v4942_v7 = vrot.slane %v2983_v40, %v12163_v51  ;;  %v14373_v49 = vld [vmem:[#allocation32_spill] sm:$0xff] }
 0x484   : > { %v6780_v46 = vcombine.low %v12440_v35, %v12443_v16  ;;  %v10103_v42 = vcombine.high %v4867_v37, %v4881_v26  ;;  %v12600_v38 = vrot.slane %v7973_v56, %v12163_v51  ;;  %v4825_v30 = vrot.slane %v4803_v15, %v12163_v51 }
 0x485   : > { %9376 = vperm.xlu1 %10416, %v6747_v50   ;;  %v2982_v10 = vmul.f32 %v2773_v20, %v14370_v32  ;;  %v12605_v5 = vrot.slane %v7828_v57, %v12163_v51  ;;  %v12608_v19 = vrot.slane %v10102_v58, %v12163_v51  ;;  %v2985_v4 = vmul.f32 %v2785_v29, %v14371_v41  ;;  %v2781_v41 = vpop.permute.xlu1 %2780 }
 0x486   : > { %v6781_v35 = vcombine.low %v12449_v14, %v12452_v9  ;;  %v12614_v16 = vrot.slane %v10097_v48, %v12163_v51  ;;  %v4811_v27 = vrot.slane %v4795_v60, %v12163_v51  ;;  %v4818_v55 = vrot.slane %v4802_v31, %v12163_v51  ;;  %v14372_v31 = vld [vmem:[#allocation34_spill] sm:$0xff] }
 0x487   : > { %v4949_v33 = vrot.slane %v4935_v22, %v12163_v51  ;;  %v4832_v47 = vrot.slane %v4804_v6, %v12163_v51  ;;  %v4950_v1 = vcombine.high %v4942_v7, %v4942_v7  ;;  %v6788_v40 = vrot.slane %v6780_v46, %v12163_v51 }
 0x488   : > { %v6795_v12 = vrot.slane %v6781_v35, %v12163_v51  ;;  %v7924_v26 = vcombine.low %v4811_v27, %v4825_v30  ;;  %v10100_v53 = vcombine.high %v4811_v27, %v4825_v30  ;;  %v4886_v56 = vcombine.high %v2982_v10, %v2982_v10 }
 0x489   : > { %v6829_v14 = vcombine.low %v12411_v3, %v12414_v39  ;;  %v4893_v9 = vrot.slane %v2982_v10, %v12163_v51  ;;  %v5033_v60 = vcombine.high %v2985_v4, %v2985_v4  ;;  %v6830_v57 = vcombine.low %v14373_v49, %v14372_v31 }
 0x48a   : > { %v6796_v15 = vcombine.low %v6788_v40, %v6795_v12  ;;  %v12628_v48 = vrot.slane %v7975_v23, %v12163_v51  ;;  %v12631_v37 = vrot.slane %v10103_v42, %v12163_v51  ;;  %v4951_v58 = vcombine.high %v4949_v33, %v4949_v33  ;;  %v2793_v40 = vpop.permute.xlu0 %2792 }
 0x48b   : > { %v4958_v20 = vrot.slane %v4942_v7, %v12163_v51  ;;  %v7926_v22 = vcombine.low %v4818_v55, %v4832_v47  ;;  %v12635_v50 = vrot.slane %v4949_v33, %v12163_v51  ;;  %v4972_v3 = vrot.slane %v4950_v1, %v12163_v51 }
 0x48c   : > { %v5040_v39 = vrot.slane %v2985_v4, %v12163_v51  ;;  %9379 = vperm.xlu0 %10415, %v6796_v15   ;;  %v10101_v29 = vcombine.high %v4818_v55, %v4832_v47  ;;  %v4900_v6 = vrot.slane %v4886_v56, %v12163_v51  ;;  %v6837_v23 = vrot.slane %v6829_v14, %v12163_v51  ;;  %v14375_v56 = vld [vmem:[#allocation50_spill] sm:$0xff] }
 0x48d   : > { %v6844_v46 = vrot.slane %v6830_v57, %v12163_v51  ;;  %v12643_v42 = vrot.slane %v7924_v26, %v12163_v51  ;;  %v12646_v7 = vrot.slane %v10100_v53, %v12163_v51  ;;  %v4901_v30 = vcombine.high %v4893_v9, %v4893_v9 }
 0x48e   : > { %v5047_v32 = vrot.slane %v5033_v60, %v12163_v51  ;;  %v6878_v4 = vcombine.low %v12485_v8, %v12488_v59  ;;  %v6879_v35 = vcombine.low %v12491_v21, %v12511_v43  ;;  %v6927_v27 = vcombine.low %v12464_v52, %v12470_v2  ;;  %v14374_v21 = vld [vmem:[#allocation20_spill] sm:$0xff] }
 0x48f   : > { %v6845_v10 = vcombine.low %v6837_v23, %v6844_v46  ;;  %v4979_v55 = vrot.slane %v4951_v58, %v12163_v51  ;;  %v8071_v33 = vcombine.low %v4958_v20, %v4972_v3  ;;  %v10106_v47 = vcombine.high %v4958_v20, %v4972_v3 }
 0x490   : > { %v5048_v1 = vcombine.high %v5040_v39, %v5040_v39  ;;  %v4902_v12 = vcombine.high %v4900_v6, %v4900_v6  ;;  %v6886_v26 = vrot.slane %v6878_v4, %v12163_v51  ;;  %v6893_v53 = vrot.slane %v6879_v35, %v12163_v51 }
 0x491   : > { %9382 = vperm.xlu1 %10416, %v6845_v10   ;;  %v6928_v8 = vcombine.low %v12473_v63, %v12477_v44  ;;  %v12661_v59 = vrot.slane %v7926_v22, %v12163_v51  ;;  %v4923_v52 = vrot.slane %v4901_v30, %v12163_v51  ;;  %v5049_v2 = vcombine.high %v5047_v32, %v5047_v32 }
 0x492   : > { %v2984_v43 = vmul.f32 %v2781_v41, %v14374_v21  ;;  %v2987_v14 = vmul.f32 %v2793_v40, %v14375_v56  ;;  %v6894_v60 = vcombine.low %v6886_v26, %v6893_v53  ;;  %v6935_v15 = vrot.slane %v6927_v27, %v12163_v51 }
 0x493   : > { %v6942_v31 = vrot.slane %v6928_v8, %v12163_v51  ;;  %v12669_v49 = vrot.slane %v10101_v29, %v12163_v51  ;;  %v8073_v63 = vcombine.low %v12635_v50, %v4979_v55  ;;  %v10107_v44 = vcombine.high %v12635_v50, %v4979_v55 }
 0x494   : > { %v5070_v57 = vrot.slane %v5048_v1, %v12163_v51  ;;  %v12675_v58 = vrot.slane %v8071_v33, %v12163_v51  ;;  %v4909_v20 = vrot.slane %v4893_v9, %v12163_v51  ;;  %v4930_v22 = vrot.slane %v4902_v12, %v12163_v51  ;;  %9385 = vperm.xlu0 %10415, %v6894_v60  }
 0x495   : > { %v6943_v3 = vcombine.low %v6935_v15, %v6942_v31  ;;  %v5056_v23 = vrot.slane %v5040_v39, %v12163_v51  ;;  %v5077_v29 = vrot.slane %v5049_v2, %v12163_v51  ;;  %v4984_v46 = vcombine.high %v2984_v43, %v2984_v43  ;;  %v2789_v39 = vpop.permute.xlu1 %2788  ;;  %v14376_v2 = vld [vmem:[#allocation22_spill] sm:$0xff] }
 0x496   : > { %v4991_v30 = vrot.slane %v2984_v43, %v12163_v51  ;;  %v4916_v50 = vrot.slane %v4900_v6, %v12163_v51  ;;  %v8022_v10 = vcombine.low %v4909_v20, %v4923_v52  ;;  %v10104_v41 = vcombine.high %v4909_v20, %v4923_v52  ;;  %v2801_v43 = vpop.permute.xlu0 %2800 }
 0x497   : > { %v5131_v4 = vcombine.high %v2987_v14, %v2987_v14  ;;  %9388 = vperm.xlu1 %10416, %v6943_v3   ;;  %v12684_v35 = vrot.slane %v10106_v47, %v12163_v51  ;;  %v5063_v9 = vrot.slane %v5047_v32, %v12163_v51  ;;  %v8169_v27 = vcombine.low %v5056_v23, %v5070_v57 }
 0x498   : > { %v5138_v55 = vrot.slane %v2987_v14, %v12163_v51  ;;  %v12689_v33 = vrot.slane %v8073_v63, %v12163_v51  ;;  %v8024_v1 = vcombine.low %v4916_v50, %v4930_v22  ;;  %v10105_v40 = vcombine.high %v4916_v50, %v4930_v22 }
 0x499   : > { %v10110_v12 = vcombine.high %v5056_v23, %v5070_v57  ;;  %v12692_v6 = vrot.slane %v10107_v44, %v12163_v51  ;;  %v8171_v26 = vcombine.low %v5063_v9, %v5077_v29  ;;  %v4998_v53 = vrot.slane %v4984_v46, %v12163_v51  ;;  %v14377_v23 = vld [vmem:[#allocation72_spill] sm:$0xff] }
 0x49a   : > { %v4999_v47 = vcombine.high %v4991_v30, %v4991_v30  ;;  %v12696_v8 = vrot.slane %v8022_v10, %v12163_v51  ;;  %v12699_v32 = vrot.slane %v10104_v41, %v12163_v51  ;;  %v5145_v52 = vrot.slane %v5131_v4, %v12163_v51 }
 0x49b   : > { %v2986_v21 = vmul.f32 %v2789_v39, %v14376_v2  ;;  %v10111_v56 = vcombine.high %v5063_v9, %v5077_v29  ;;  %v12704_v14 = vrot.slane %v8169_v27, %v12163_v51  ;;  %v5146_v60 = vcombine.high %v5138_v55, %v5138_v55 }
 0x49c   : > { %v6976_v15 = vcombine.low %v12540_v34, %v12545_v0  ;;  %v12709_v31 = vrot.slane %v8024_v1, %v12163_v51  ;;  %v12712_v63 = vrot.slane %v10105_v40, %v12163_v51  ;;  %v12715_v44 = vrot.slane %v10110_v12, %v12163_v51 }
 0x49d   : > { %v6977_v57 = vcombine.low %v12554_v45, %v12557_v62  ;;  %v12720_v20 = vrot.slane %v8171_v26, %v12163_v51  ;;  %v5000_v22 = vcombine.high %v4998_v53, %v4998_v53  ;;  %v5021_v3 = vrot.slane %v4999_v47, %v12163_v51 }
 0x49e   : > { %v2989_v34 = vmul.f32 %v2801_v43, %v14377_v23  ;;  %v5147_v0 = vcombine.high %v5145_v52, %v5145_v52  ;;  %v5082_v29 = vcombine.high %v2986_v21, %v2986_v21  ;;  %v6984_v46 = vrot.slane %v6976_v15, %v12163_v51 }
 0x49f   : > { %v6991_v50 = vrot.slane %v6977_v57, %v12163_v51  ;;  %v12727_v10 = vrot.slane %v10111_v56, %v12163_v51  ;;  %v5168_v41 = vrot.slane %v5146_v60, %v12163_v51  ;;  %v5089_v45 = vrot.slane %v2986_v21, %v12163_v51  ;;  %v2797_v56 = vpop.permute.xlu1 %2796 }
 0x4a0   : > { %v7809_v62 = vcombine.low %v12522_v28, %v12525_v24  ;;  %v5007_v4 = vrot.slane %v4991_v30, %v12163_v51  ;;  %v5014_v9 = vrot.slane %v4998_v53, %v12163_v51  ;;  %v5154_v27 = vrot.slane %v5138_v55, %v12163_v51 }
 0x4a1   : > { %v6992_v39 = vcombine.low %v6984_v46, %v6991_v50  ;;  %v5028_v1 = vrot.slane %v5000_v22, %v12163_v51  ;;  %v5161_v40 = vrot.slane %v5145_v52, %v12163_v51  ;;  %v5229_v12 = vcombine.high %v2989_v34, %v2989_v34 }
 0x4a2   : > { %v7810_v26 = vcombine.low %v12530_v13, %v12533_v17  ;;  %v8120_v47 = vcombine.low %v5007_v4, %v5021_v3  ;;  %v10108_v2 = vcombine.high %v5007_v4, %v5021_v3  ;;  %v5175_v21 = vrot.slane %v5147_v0, %v12163_v51 }
 0x4a3   : > { %v5096_v28 = vrot.slane %v5082_v29, %v12163_v51  ;;  %9391 = vperm.xlu0 %10415, %v6992_v39   ;;  %v8267_v24 = vcombine.low %v5154_v27, %v5168_v41  ;;  %v5097_v30 = vcombine.high %v5089_v45, %v5089_v45  ;;  %v7817_v55 = vrot.slane %v7809_v62, %v12163_v51 }
 0x4a4   : > { %v7824_v53 = vrot.slane %v7810_v26, %v12163_v51  ;;  %v10114_v43 = vcombine.high %v5154_v27, %v5168_v41  ;;  %v5236_v52 = vrot.slane %v2989_v34, %v12163_v51  ;;  %v7858_v13 = vcombine.low %v12591_v18, %v12594_v36  ;;  %v14378_v36 = vld [vmem:[#allocation70_spill] sm:$0xff] }
 0x4a5   : > { %v7859_v17 = vcombine.low %v12605_v5, %v12614_v16  ;;  %v8122_v60 = vcombine.low %v5014_v9, %v5028_v1  ;;  %v10109_v15 = vcombine.high %v5014_v9, %v5028_v1  ;;  %v5243_v57 = vrot.slane %v5229_v12, %v12163_v51  ;;  %v2809_v16 = vpop.permute.xlu0 %2808  ;;  %v14379_v12 = vld [vmem:[#allocation74_spill] sm:$0xff] }
 0x4a6   : > { %v7825_v22 = vcombine.low %v7817_v55, %v7824_v53  ;;  %v12751_v3 = vrot.slane %v8120_v47, %v12163_v51  ;;  %v12754_v23 = vrot.slane %v10108_v2, %v12163_v51  ;;  %v8269_v0 = vcombine.low %v5161_v40, %v5175_v21 }
 0x4a7   : > { %v5098_v34 = vcombine.high %v5096_v28, %v5096_v28  ;;  %v10115_v29 = vcombine.high %v5161_v40, %v5175_v21  ;;  %v12757_v46 = vrot.slane %v8267_v24, %v12163_v51  ;;  %v5119_v18 = vrot.slane %v5097_v30, %v12163_v51 }
 0x4a8   : > { %9442 = vperm.xlu1 %10416, %v7825_v22   ;;  %v2988_v5 = vmul.f32 %v2797_v56, %v14378_v36  ;;  %v12762_v50 = vrot.slane %v10114_v43, %v12163_v51  ;;  %v5244_v41 = vcombine.high %v5236_v52, %v5236_v52  ;;  %v7866_v62 = vrot.slane %v7858_v13, %v12163_v51 }
 0x4a9   : > { %v7873_v4 = vrot.slane %v7859_v17, %v12163_v51  ;;  %v12767_v9 = vrot.slane %v8122_v60, %v12163_v51  ;;  %v5105_v27 = vrot.slane %v5089_v45, %v12163_v51  ;;  %v5245_v39 = vcombine.high %v5243_v57, %v5243_v57 }
 0x4aa   : > { %v7907_v1 = vcombine.low %v12570_v54, %v12573_v11  ;;  %v5126_v40 = vrot.slane %v5098_v34, %v12163_v51  ;;  %v2991_v26 = vmul.f32 %v2809_v16, %v14379_v12  ;;  %v7908_v2 = vcombine.low %v12576_v25, %v12586_v61  ;;  %v2805_v16 = vpop.permute.xlu1 %2804 }
 0x4ab   : > { %v7874_v47 = vcombine.low %v7866_v62, %v7873_v4  ;;  %v12777_v21 = vrot.slane %v10109_v15, %v12163_v51  ;;  %v5112_v24 = vrot.slane %v5096_v28, %v12163_v51  ;;  %v8218_v30 = vcombine.low %v5105_v27, %v5119_v18 }
 0x4ac   : > { %v5180_v55 = vcombine.high %v2988_v5, %v2988_v5  ;;  %v10112_v45 = vcombine.high %v5105_v27, %v5119_v18  ;;  %v5266_v53 = vrot.slane %v5244_v41, %v12163_v51  ;;  %v5187_v54 = vrot.slane %v2988_v5, %v12163_v51 }
 0x4ad   : > { %9445 = vperm.xlu0 %10415, %v7874_v47   ;;  %v7922_v11 = vrot.slane %v7908_v2, %v12163_v51  ;;  %v12784_v43 = vrot.slane %v8269_v0, %v12163_v51  ;;  %v5252_v25 = vrot.slane %v5236_v52, %v12163_v51  ;;  %v5273_v61 = vrot.slane %v5245_v39, %v12163_v51  ;;  %v14380_v47 = vld [vmem:[#allocation73_spill] sm:$0xff] }
 0x4ae   : > { %v7915_v56 = vrot.slane %v7907_v1, %v12163_v51  ;;  %v8220_v28 = vcombine.low %v5112_v24, %v5126_v40  ;;  %v10113_v13 = vcombine.high %v5112_v24, %v5126_v40  ;;  %v5327_v17 = vcombine.high %v2991_v26, %v2991_v26  ;;  %v2686_v40 = vpop.permute.xlu0 %2685 }
 0x4af   : > { %v5334_v60 = vrot.slane %v2991_v26, %v12163_v51  ;;  %v12791_v15 = vrot.slane %v10115_v29, %v12163_v51  ;;  %v5259_v22 = vrot.slane %v5243_v57, %v12163_v51  ;;  %v5194_v34 = vrot.slane %v5180_v55, %v12163_v51 }
 0x4b0   : > { %v7923_v0 = vcombine.low %v7915_v56, %v7922_v11  ;;  %v12796_v18 = vrot.slane %v8218_v30, %v12163_v51  ;;  %v12799_v52 = vrot.slane %v10112_v45, %v12163_v51  ;;  %v8365_v36 = vcombine.low %v5252_v25, %v5266_v53  ;;  %v14381_v45 = vld [vmem:[#allocation29_spill] sm:$0xff]  ;;  %v2813_v56 = vpop.permute.xlu1 %2812 }
 0x4b1   : > { %v5195_v5 = vcombine.high %v5187_v54, %v5187_v54  ;;  %v10118_v41 = vcombine.high %v5252_v25, %v5266_v53  ;;  %v8367_v62 = vcombine.low %v5259_v22, %v5273_v61  ;;  %v7956_v29 = vcombine.low %v12643_v42, %v12646_v7 }
 0x4b2   : > { %9448 = vperm.xlu1 %10416, %v7923_v0   ;;  %v7957_v57 = vcombine.low %v12661_v59, %v12669_v49  ;;  %v12806_v4 = vrot.slane %v8220_v28, %v12163_v51  ;;  %v12809_v27 = vrot.slane %v10113_v13, %v12163_v51  ;;  %v5341_v39 = vrot.slane %v5327_v17, %v12163_v51 }
 0x4b3   : > { %v5342_v1 = vcombine.high %v5334_v60, %v5334_v60  ;;  %v10119_v12 = vcombine.high %v5259_v22, %v5273_v61  ;;  %v5196_v26 = vcombine.high %v5194_v34, %v5194_v34  ;;  %v2990_v2 = vmul.f32 %v2805_v16, %v14380_v47 }
 0x4b4   : > { %v8006_v42 = vcombine.low %v12628_v48, %v12631_v37  ;;  %v12816_v7 = vrot.slane %v8365_v36, %v12163_v51  ;;  %v5217_v59 = vrot.slane %v5195_v5, %v12163_v51  ;;  %v7964_v49 = vrot.slane %v7956_v29, %v12163_v51 }
 0x4b5   : > { %v7971_v24 = vrot.slane %v7957_v57, %v12163_v51  ;;  %v12822_v30 = vrot.slane %v10118_v41, %v12163_v51  ;;  %v12825_v55 = vrot.slane %v8367_v62, %v12163_v51  ;;  %v2961_v53 = vmul.f32 %v2686_v40, %v14381_v45  ;;  %v14382_v41 = vld [vmem:[#allocation76_spill] sm:$0xff] }
 0x4b6   : > { %v8005_v48 = vcombine.low %v12600_v38, %v12608_v19  ;;  %v5203_v37 = vrot.slane %v5187_v54, %v12163_v51  ;;  %v5343_v11 = vcombine.high %v5341_v39, %v5341_v39  ;;  %v5364_v25 = vrot.slane %v5342_v1, %v12163_v51 }
 0x4b7   : > { %v7972_v61 = vcombine.low %v7964_v49, %v7971_v24  ;;  %v12833_v28 = vrot.slane %v10119_v12, %v12163_v51  ;;  %v5224_v13 = vrot.slane %v5196_v26, %v12163_v51  ;;  %v5278_v17 = vcombine.high %v2990_v2, %v2990_v2  ;;  %v2694_v49 = vpop.permute.xlu0 %2693 }
 0x4b8   : > { %v8020_v22 = vrot.slane %v8006_v42, %v12163_v51  ;;  %v8316_v0 = vcombine.low %v5203_v37, %v5217_v59  ;;  %v10116_v36 = vcombine.high %v5203_v37, %v5217_v59  ;;  %v5350_v5 = vrot.slane %v5334_v60, %v12163_v51 }
 0x4b9   : > { %v5285_v38 = vrot.slane %v2990_v2, %v12163_v51  ;;  %9451 = vperm.xlu0 %10415, %v7972_v61   ;;  %v5210_v19 = vrot.slane %v5194_v34, %v12163_v51  ;;  %v3857_v54 = vcombine.high %v2961_v53, %v2961_v53  ;;  %v8013_v16 = vrot.slane %v8005_v48, %v12163_v51 }
 0x4ba   : > { %v2992_v62 = vmul.f32 %v2813_v56, %v14382_v41  ;;  %v5357_v29 = vrot.slane %v5341_v39, %v12163_v51  ;;  %v5371_v57 = vrot.slane %v5343_v11, %v12163_v51  ;;  %v8463_v1 = vcombine.low %v5350_v5, %v5364_v25 }
 0x4bb   : > { %v3864_v40 = vrot.slane %v2961_v53, %v12163_v51  ;;  %v8318_v12 = vcombine.low %v5210_v19, %v5224_v13  ;;  %v10122_v26 = vcombine.high %v5350_v5, %v5364_v25  ;;  %v5292_v60 = vrot.slane %v5278_v17, %v12163_v51  ;;  %v14384_v17 = vld [vmem:[#allocation33_spill] sm:$0xff] }
 0x4bc   : > { %v8021_v47 = vcombine.low %v8013_v16, %v8020_v22  ;;  %v10117_v2 = vcombine.high %v5210_v19, %v5224_v13  ;;  %v12847_v34 = vrot.slane %v8316_v0, %v12163_v51  ;;  %v12850_v42 = vrot.slane %v10116_v36, %v12163_v51 }
 0x4bd   : > { %v5293_v59 = vcombine.high %v5285_v38, %v5285_v38  ;;  %v3871_v39 = vrot.slane %v3857_v54, %v12163_v51  ;;  %v5376_v24 = vcombine.high %v2992_v62, %v2992_v62  ;;  %v8054_v45 = vcombine.low %v12696_v8, %v12699_v32 }
 0x4be   : > { %9454 = vperm.xlu1 %10416, %v8021_v47   ;;  %v8055_v53 = vcombine.low %v12709_v31, %v12712_v63  ;;  %v8465_v48 = vcombine.low %v5357_v29, %v5371_v57  ;;  %v3872_v37 = vcombine.high %v3864_v40, %v3864_v40  ;;  %v8103_v11 = vcombine.low %v12675_v58, %v12684_v35 }
 0x4bf   : > { %v8104_v25 = vcombine.low %v12689_v33, %v12692_v6  ;;  %v10123_v61 = vcombine.high %v5357_v29, %v5371_v57  ;;  %v12862_v56 = vrot.slane %v8463_v1, %v12163_v51  ;;  %v5294_v13 = vcombine.high %v5292_v60, %v5292_v60 }
 0x4c0   : > { %v2963_v22 = vmul.f32 %v2694_v49, %v14384_v17  ;;  %v5315_v8 = vrot.slane %v5293_v59, %v12163_v51  ;;  %v5383_v32 = vrot.slane %v2992_v62, %v12163_v51  ;;  %v8062_v31 = vrot.slane %v8054_v45, %v12163_v51  ;;  %v2690_v17 = vpop.permute.xlu1 %2689 }
 0x4c1   : > { %14383 = vst [vmem:[#allocation36_spill] sm:$0xff] %v12862_v56  ;;  %v8069_v63 = vrot.slane %v8055_v53, %v12163_v51  ;;  %v12870_v58 = vrot.slane %v10122_v26, %v12163_v51  ;;  %v5301_v35 = vrot.slane %v5285_v38, %v12163_v51  ;;  %v3873_v33 = vcombine.high %v3871_v39, %v3871_v39 }
 0x4c2   : > { %v5390_v6 = vrot.slane %v5376_v24, %v12163_v51  ;;  %v3894_v0 = vrot.slane %v3872_v37, %v12163_v51  ;;  %v8111_v5 = vrot.slane %v8103_v11, %v12163_v51  ;;  %v8118_v19 = vrot.slane %v8104_v25, %v12163_v51 }
 0x4c3   : > { %14385 = vst [vmem:[#allocation65_spill] sm:$0xff] %v12870_v58  ;;  %v8070_v36 = vcombine.low %v8062_v31, %v8069_v63  ;;  %v12878_v54 = vrot.slane %v8318_v12, %v12163_v51  ;;  %v12881_v16 = vrot.slane %v10117_v2, %v12163_v51  ;;  %v5322_v41 = vrot.slane %v5294_v13, %v12163_v51 }
 0x4c4   : > { %v3955_v62 = vcombine.high %v2963_v22, %v2963_v22  ;;  %v8414_v38 = vcombine.low %v5301_v35, %v5315_v8  ;;  %v3880_v29 = vrot.slane %v3864_v40, %v12163_v51  ;;  %v5391_v57 = vcombine.high %v5383_v32, %v5383_v32 }
 0x4c5   : > { %9457 = vperm.xlu0 %10415, %v8070_v36   ;;  %v8119_v1 = vcombine.low %v8111_v5, %v8118_v19  ;;  %v5308_v26 = vrot.slane %v5292_v60, %v12163_v51  ;;  %v10120_v47 = vcombine.high %v5301_v35, %v5315_v8  ;;  %v3901_v59 = vrot.slane %v3873_v33, %v12163_v51 }
 0x4c6   : > { %v5392_v49 = vcombine.high %v5390_v6, %v5390_v6  ;;  %v12888_v12 = vrot.slane %v8465_v48, %v12163_v51  ;;  %v6993_v2 = vcombine.low %v3880_v29, %v3894_v0  ;;  %v10062_v24 = vcombine.high %v3880_v29, %v3894_v0 }
 0x4c7   : > { %v3962_v45 = vrot.slane %v2963_v22, %v12163_v51  ;;  %9460 = vperm.xlu1 %10416, %v8119_v1   ;;  %v12892_v53 = vrot.slane %v10123_v61, %v12163_v51  ;;  %v8416_v40 = vcombine.low %v5308_v26, %v5322_v41  ;;  %v3887_v37 = vrot.slane %v3871_v39, %v12163_v51  ;;  %v2702_v39 = vpop.permute.xlu0 %2701  ;;  %v14389_v1 = vld [vmem:[#allocation48_spill] sm:$0xff] }
 0x4c8   : > { %14386 = vst [vmem:[#allocation31_spill] sm:$0xff] %v12888_v12  ;;  %v3969_v60 = vrot.slane %v3955_v62, %v12163_v51  ;;  %v10121_v25 = vcombine.high %v5308_v26, %v5322_v41  ;;  %v12899_v48 = vrot.slane %v8414_v38, %v12163_v51  ;;  %v5413_v13 = vrot.slane %v5391_v57, %v12163_v51  ;;  %v14388_v41 = vld [vmem:[#allocation24_spill] sm:$0xff] }
 0x4c9   : > { %14387 = vst [vmem:[#allocation34_spill] sm:$0xff] %v12892_v53  ;;  %v12903_v22 = vrot.slane %v10120_v47, %v12163_v51  ;;  %v6995_v61 = vcombine.low %v3887_v37, %v3901_v59  ;;  %v10063_v8 = vcombine.high %v3887_v37, %v3901_v59  ;;  %v5420_v31 = vrot.slane %v5392_v49, %v12163_v51 }
 0x4ca   : > { %v12907_v63 = vrot.slane %v6993_v2, %v12163_v51  ;;  %v12910_v35 = vrot.slane %v10062_v24, %v12163_v51  ;;  %v5399_v33 = vrot.slane %v5383_v32, %v12163_v51  ;;  %v3970_v0 = vcombine.high %v3962_v45, %v3962_v45 }
 0x4cb   : > { %v12914_v36 = vrot.slane %v8416_v40, %v12163_v51  ;;  %v5406_v5 = vrot.slane %v5390_v6, %v12163_v51  ;;  %v3971_v19 = vcombine.high %v3969_v60, %v3969_v60  ;;  %v2962_v62 = vmul.f32 %v2690_v17, %v14388_v41 }
 0x4cc   : > { %v12919_v38 = vrot.slane %v10121_v25, %v12163_v51  ;;  %v8512_v29 = vcombine.low %v5399_v33, %v5413_v13  ;;  %v10124_v57 = vcombine.high %v5399_v33, %v5413_v13  ;;  %v2965_v26 = vmul.f32 %v2702_v39, %v14389_v1 }
 0x4cd   : > { %v12923_v47 = vrot.slane %v6995_v61, %v12163_v51  ;;  %v8514_v32 = vcombine.low %v5406_v5, %v5420_v31  ;;  %v8152_v59 = vcombine.low %v12751_v3, %v12754_v23  ;;  %v8153_v6 = vcombine.low %v12767_v9, %v12777_v21 }
 0x4ce   : > { %v12930_v49 = vrot.slane %v10063_v8, %v12163_v51  ;;  %v10125_v24 = vcombine.high %v5406_v5, %v5420_v31  ;;  %v3992_v40 = vrot.slane %v3970_v0, %v12163_v51  ;;  %v3978_v37 = vrot.slane %v3962_v45, %v12163_v51  ;;  %v2698_v5 = vpop.permute.xlu1 %2697 }
 0x4cf   : > { %v3985_v25 = vrot.slane %v3969_v60, %v12163_v51  ;;  %v3999_v13 = vrot.slane %v3971_v19, %v12163_v51  ;;  %v3906_v17 = vcombine.high %v2962_v62, %v2962_v62  ;;  %v12939_v3 = vrot.slane %v8512_v29, %v12163_v51 }
 0x4d0   : > { %v12942_v23 = vrot.slane %v10124_v57, %v12163_v51  ;;  %v3913_v9 = vrot.slane %v2962_v62, %v12163_v51  ;;  %v4053_v21 = vcombine.high %v2965_v26, %v2965_v26  ;;  %v12946_v61 = vrot.slane %v8514_v32, %v12163_v51 }
 0x4d1   : > { %14390 = vst [vmem:[#allocation32_spill] sm:$0xff] %v12939_v3  ;;  %v4060_v8 = vrot.slane %v2965_v26, %v12163_v51  ;;  %v8160_v45 = vrot.slane %v8152_v59, %v12163_v51  ;;  %v8167_v60 = vrot.slane %v8153_v6, %v12163_v51  ;;  %v12952_v31 = vrot.slane %v10125_v24, %v12163_v51  ;;  %v2710_v26 = vpop.permute.xlu0 %2709  ;;  %v14394_v24 = vld [vmem:[#allocation37_spill] sm:$0xff] }
 0x4d2   : > { %14391 = vst [vmem:[#allocation20_spill] sm:$0xff] %v12942_v23  ;;  %14392 = vst [vmem:[#allocation50_spill] sm:$0xff] %v12946_v61  ;;  %v7091_v39 = vcombine.low %v3978_v37, %v3992_v40  ;;  %v10066_v33 = vcombine.high %v3978_v37, %v3992_v40  ;;  %v8201_v0 = vcombine.low %v12704_v14, %v12715_v44 }
 0x4d3   : > { %14393 = vst [vmem:[#allocation22_spill] sm:$0xff] %v12952_v31  ;;  %v7093_v19 = vcombine.low %v3985_v25, %v3999_v13  ;;  %v3920_v41 = vrot.slane %v3906_v17, %v12163_v51  ;;  %v8168_v62 = vcombine.low %v8160_v45, %v8167_v60  ;;  %v8202_v29 = vcombine.low %v12720_v20, %v12727_v10  ;;  %v14395_v17 = vld [vmem:[#allocation53_spill] sm:$0xff] }
 0x4d4   : > { %v3921_v57 = vcombine.high %v3913_v9, %v3913_v9  ;;  %v4067_v1 = vrot.slane %v4053_v21, %v12163_v51  ;;  %v8250_v32 = vcombine.low %v12796_v18, %v12799_v52  ;;  %v8251_v59 = vcombine.low %v12806_v4, %v12809_v27 }
 0x4d5   : > { %v4068_v6 = vcombine.high %v4060_v8, %v4060_v8  ;;  %9463 = vperm.xlu0 %10415, %v8168_v62   ;;  %v8209_v14 = vrot.slane %v8201_v0, %v12163_v51  ;;  %v8216_v44 = vrot.slane %v8202_v29, %v12163_v51  ;;  %v2964_v40 = vmul.f32 %v2698_v5, %v14394_v24 }
 0x4d6   : > { %v8258_v20 = vrot.slane %v8250_v32, %v12163_v51  ;;  %v8265_v10 = vrot.slane %v8251_v59, %v12163_v51  ;;  %v8299_v37 = vcombine.low %v12757_v46, %v12762_v50  ;;  %v8300_v18 = vcombine.low %v12784_v43, %v12791_v15 }
 0x4d7   : > { %v3922_v4 = vcombine.high %v3920_v41, %v3920_v41  ;;  %v8217_v27 = vcombine.low %v8209_v14, %v8216_v44  ;;  %v2967_v21 = vmul.f32 %v2710_v26, %v14395_v17  ;;  %v10067_v45 = vcombine.high %v3985_v25, %v3999_v13 }
 0x4d8   : > { %v12977_v60 = vrot.slane %v7091_v39, %v12163_v51  ;;  %v3943_v0 = vrot.slane %v3921_v57, %v12163_v51  ;;  %v8266_v5 = vcombine.low %v8258_v20, %v8265_v10  ;;  %v12981_v62 = vrot.slane %v10066_v33, %v12163_v51  ;;  %v2706_v39 = vpop.permute.xlu1 %2705  ;;  %v14396_v20 = vld [vmem:[#allocation51_spill] sm:$0xff] }
 0x4d9   : > { %v12984_v46 = vrot.slane %v7093_v19, %v12163_v51  ;;  %v3929_v50 = vrot.slane %v3913_v9, %v12163_v51  ;;  %v4069_v43 = vcombine.high %v4067_v1, %v4067_v1  ;;  %9466 = vperm.xlu1 %10416, %v8217_v27   ;;  %v4090_v15 = vrot.slane %v4068_v6, %v12163_v51 }
 0x4da   : > { %v4004_v29 = vcombine.high %v2964_v40, %v2964_v40  ;;  %9469 = vperm.xlu0 %10415, %v8266_v5   ;;  %v8307_v25 = vrot.slane %v8299_v37, %v12163_v51  ;;  %v8314_v13 = vrot.slane %v8300_v18, %v12163_v51  ;;  %v3950_v57 = vrot.slane %v3922_v4, %v12163_v51 }
 0x4db   : > { %v4076_v33 = vrot.slane %v4060_v8, %v12163_v51  ;;  %v4011_v19 = vrot.slane %v2964_v40, %v12163_v51  ;;  %v4151_v26 = vcombine.high %v2967_v21, %v2967_v21  ;;  %v7042_v32 = vcombine.low %v3929_v50, %v3943_v0 }
 0x4dc   : > { %v10064_v9 = vcombine.high %v3929_v50, %v3943_v0  ;;  %v4158_v59 = vrot.slane %v2967_v21, %v12163_v51  ;;  %v8315_v14 = vcombine.low %v8307_v25, %v8314_v13  ;;  %v12995_v6 = vrot.slane %v10067_v45, %v12163_v51 }
 0x4dd   : > { %v3936_v44 = vrot.slane %v3920_v41, %v12163_v51  ;;  %v4097_v24 = vrot.slane %v4069_v43, %v12163_v51  ;;  %v2966_v10 = vmul.f32 %v2706_v39, %v14396_v20  ;;  %v7189_v37 = vcombine.low %v4076_v33, %v4090_v15 }
 0x4de   : > { %v10070_v40 = vcombine.high %v4076_v33, %v4090_v15  ;;  %v4018_v18 = vrot.slane %v4004_v29, %v12163_v51  ;;  %9472 = vperm.xlu1 %10416, %v8315_v14   ;;  %v4083_v27 = vrot.slane %v4067_v1, %v12163_v51  ;;  %v4019_v17 = vcombine.high %v4011_v19, %v4011_v19  ;;  %v2718_v15 = vpop.permute.xlu0 %2717 }
 0x4df   : > { %v7044_v4 = vcombine.low %v3936_v44, %v3950_v57  ;;  %v4165_v21 = vrot.slane %v4151_v26, %v12163_v51  ;;  %v10065_v45 = vcombine.high %v3936_v44, %v3950_v57  ;;  %v13006_v41 = vrot.slane %v7042_v32, %v12163_v51 }
 0x4e0   : > { %v13009_v0 = vrot.slane %v10064_v9, %v12163_v51  ;;  %v4166_v5 = vcombine.high %v4158_v59, %v4158_v59  ;;  %v7191_v50 = vcombine.low %v4083_v27, %v4097_v24  ;;  %v4102_v43 = vcombine.high %v2966_v10, %v2966_v10 }
 0x4e1   : > { %v8348_v29 = vcombine.low %v12847_v34, %v12850_v42  ;;  %v8349_v1 = vcombine.low %v12878_v54, %v12881_v16  ;;  %v10071_v25 = vcombine.high %v4083_v27, %v4097_v24  ;;  %v13016_v13 = vrot.slane %v7189_v37, %v12163_v51  ;;  %v14397_v42 = vld [vmem:[#allocation57_spill] sm:$0xff] }
 0x4e2   : > { %v13019_v39 = vrot.slane %v10070_v40, %v12163_v51  ;;  %v4020_v57 = vcombine.high %v4018_v18, %v4018_v18  ;;  %v13022_v33 = vrot.slane %v7044_v4, %v12163_v51  ;;  %v4041_v26 = vrot.slane %v4019_v17, %v12163_v51  ;;  %v2714_v40 = vpop.permute.xlu1 %2713 }
 0x4e3   : > { %v4167_v32 = vcombine.high %v4165_v21, %v4165_v21  ;;  %v4109_v9 = vrot.slane %v2966_v10, %v12163_v51  ;;  %v4188_v34 = vrot.slane %v4166_v5, %v12163_v51  ;;  %v2969_v54 = vmul.f32 %v2718_v15, %v14397_v42 }
 0x4e4   : > { %v8356_v16 = vrot.slane %v8348_v29, %v12163_v51  ;;  %v8363_v14 = vrot.slane %v8349_v1, %v12163_v51  ;;  %v13031_v44 = vrot.slane %v10065_v45, %v12163_v51  ;;  %v4027_v20 = vrot.slane %v4011_v19, %v12163_v51 }
 0x4e5   : > { %v4116_v37 = vrot.slane %v4102_v43, %v12163_v51  ;;  %v13038_v10 = vrot.slane %v7191_v50, %v12163_v51  ;;  %v4048_v4 = vrot.slane %v4020_v57, %v12163_v51  ;;  %v4174_v27 = vrot.slane %v4158_v59, %v12163_v51  ;;  %v14398_v43 = vld [vmem:[#allocation56_spill] sm:$0xff] }
 0x4e6   : > { %v8364_v17 = vcombine.low %v8356_v16, %v8363_v14  ;;  %v7140_v5 = vcombine.low %v4027_v20, %v4041_v26  ;;  %v10068_v15 = vcombine.high %v4027_v20, %v4041_v26  ;;  %v4195_v45 = vrot.slane %v4167_v32, %v12163_v51  ;;  %v2722_v8 = vpop.permute.xlu1 %2721 }
 0x4e7   : > { %v4117_v29 = vcombine.high %v4109_v9, %v4109_v9  ;;  %v4034_v1 = vrot.slane %v4018_v18, %v12163_v51  ;;  %v7287_v42 = vcombine.low %v4174_v27, %v4188_v34  ;;  %v4249_v19 = vcombine.high %v2969_v54, %v2969_v54 }
 0x4e8   : > { %9475 = vperm.xlu1 %10416, %v8364_v17   ;;  %v2968_v52 = vmul.f32 %v2714_v40, %v14398_v43  ;;  %v13046_v50 = vrot.slane %v10071_v25, %v12163_v51  ;;  %v4181_v57 = vrot.slane %v4165_v21, %v12163_v51  ;;  %v10074_v11 = vcombine.high %v4174_v27, %v4188_v34  ;;  %v2726_v17 = vpop.permute.xlu0 %2725 }
 0x4e9   : > { %v4118_v59 = vcombine.high %v4116_v37, %v4116_v37  ;;  %v7142_v16 = vcombine.low %v4034_v1, %v4048_v4  ;;  %v10069_v32 = vcombine.high %v4034_v1, %v4048_v4  ;;  %v4256_v14 = vrot.slane %v2969_v54, %v12163_v51 }
 0x4ea   : > { %v13053_v18 = vrot.slane %v7140_v5, %v12163_v51  ;;  %v13056_v20 = vrot.slane %v10068_v15, %v12163_v51  ;;  %v7289_v40 = vcombine.low %v4181_v57, %v4195_v45  ;;  %v4139_v25 = vrot.slane %v4117_v29, %v12163_v51 }
 0x4eb   : > { %v10075_v21 = vcombine.high %v4181_v57, %v4195_v45  ;;  %v13060_v34 = vrot.slane %v7287_v42, %v12163_v51  ;;  %v4263_v27 = vrot.slane %v4249_v19, %v12163_v51  ;;  %v4200_v43 = vcombine.high %v2968_v52, %v2968_v52  ;;  %v14399_v42 = vld [vmem:[#allocation59_spill] sm:$0xff] }
 0x4ec   : > { %v13064_v4 = vrot.slane %v10074_v11, %v12163_v51  ;;  %v4125_v54 = vrot.slane %v4109_v9, %v12163_v51  ;;  %v4146_v5 = vrot.slane %v4118_v59, %v12163_v51  ;;  %v4207_v15 = vrot.slane %v2968_v52, %v12163_v51 }
 0x4ed   : > { %v13070_v1 = vrot.slane %v7142_v16, %v12163_v51  ;;  %v13073_v45 = vrot.slane %v10069_v32, %v12163_v51  ;;  %v4264_v29 = vcombine.high %v4256_v14, %v4256_v14  ;;  %v2971_v57 = vmul.f32 %v2726_v17, %v14399_v42 }
 0x4ee   : > { %v13079_v11 = vrot.slane %v7289_v40, %v12163_v51  ;;  %v4132_v9 = vrot.slane %v4116_v37, %v12163_v51  ;;  %v7238_v59 = vcombine.low %v4125_v54, %v4139_v25  ;;  %v13083_v52 = vrot.slane %v10075_v21, %v12163_v51 }
 0x4ef   : > { %v4265_v16 = vcombine.high %v4263_v27, %v4263_v27  ;;  %v4214_v26 = vrot.slane %v4200_v43, %v12163_v51  ;;  %v8397_v32 = vcombine.low %v12816_v7, %v12822_v30  ;;  %v10072_v42 = vcombine.high %v4125_v54, %v4139_v25  ;;  %v14400_v30 = vld [vmem:[#allocation58_spill] sm:$0xff] }
 0x4f0   : > { %v7240_v19 = vcombine.low %v4132_v9, %v4146_v5  ;;  %v4215_v40 = vcombine.high %v4207_v15, %v4207_v15  ;;  %v10073_v2 = vcombine.high %v4132_v9, %v4146_v5  ;;  %v4286_v37 = vrot.slane %v4264_v29, %v12163_v51 }
 0x4f1   : > { %v4347_v24 = vcombine.high %v2971_v57, %v2971_v57  ;;  %v8398_v21 = vcombine.low %v12825_v55, %v12833_v28  ;;  %v13094_v23 = vrot.slane %v7238_v59, %v12163_v51  ;;  %v4272_v43 = vrot.slane %v4256_v14, %v12163_v51 }
 0x4f2   : > { %v4279_v7 = vrot.slane %v4263_v27, %v12163_v51  ;;  %v2970_v3 = vmul.f32 %v2722_v8, %v14400_v30  ;;  %v4293_v25 = vrot.slane %v4265_v16, %v12163_v51  ;;  %v4216_v54 = vcombine.high %v4214_v26, %v4214_v26 }
 0x4f3   : > { %v8405_v5 = vrot.slane %v8397_v32, %v12163_v51  ;;  %v8412_v29 = vrot.slane %v8398_v21, %v12163_v51  ;;  %v13103_v9 = vrot.slane %v10072_v42, %v12163_v51  ;;  %v13106_v55 = vrot.slane %v7240_v19, %v12163_v51  ;;  %v2734_v42 = vpop.permute.xlu0 %2733 }
 0x4f4   : > { %v4237_v28 = vrot.slane %v4215_v40, %v12163_v51  ;;  %v4354_v14 = vrot.slane %v2971_v57, %v12163_v51  ;;  %v13111_v27 = vrot.slane %v10073_v2, %v12163_v51  ;;  %v7385_v8 = vcombine.low %v4272_v43, %v4286_v37 }
 0x4f5   : > { %v4361_v59 = vrot.slane %v4347_v24, %v12163_v51  ;;  %v8413_v16 = vcombine.low %v8405_v5, %v8412_v29  ;;  %v10078_v32 = vcombine.high %v4272_v43, %v4286_v37  ;;  %v4223_v21 = vrot.slane %v4207_v15, %v12163_v51  ;;  %v2730_v37 = vpop.permute.xlu1 %2729 }
 0x4f6   : > { %v4298_v30 = vcombine.high %v2970_v3, %v2970_v3  ;;  %v8446_v19 = vcombine.low %v12899_v48, %v12903_v22  ;;  %v7387_v17 = vcombine.low %v4279_v7, %v4293_v25  ;;  %v10079_v58 = vcombine.high %v4279_v7, %v4293_v25  ;;  %v14401_v22 = vld [vmem:[#allocation62_spill] sm:$0xff] }
 0x4f7   : > { %v4244_v40 = vrot.slane %v4216_v54, %v12163_v51  ;;  %9478 = vperm.xlu1 %10416, %v8413_v16   ;;  %v4305_v2 = vrot.slane %v2970_v3, %v12163_v51  ;;  %v7336_v57 = vcombine.low %v4223_v21, %v4237_v28  ;;  %v10076_v56 = vcombine.high %v4223_v21, %v4237_v28 }
 0x4f8   : > { %v4362_v61 = vcombine.high %v4354_v14, %v4354_v14  ;;  %v8447_v24 = vcombine.low %v12914_v36, %v12919_v38  ;;  %v13122_v15 = vrot.slane %v7385_v8, %v12163_v51  ;;  %v4230_v43 = vrot.slane %v4214_v26, %v12163_v51  ;;  %v2742_v36 = vpop.permute.xlu0 %2741 }
 0x4f9   : > { %v4363_v48 = vcombine.high %v4361_v59, %v4361_v59  ;;  %v2973_v7 = vmul.f32 %v2734_v42, %v14401_v22  ;;  %v13127_v25 = vrot.slane %v10078_v32, %v12163_v51  ;;  %v4312_v3 = vrot.slane %v4298_v30, %v12163_v51 }
 0x4fa   : > { %v8454_v54 = vrot.slane %v8446_v19, %v12163_v51  ;;  %v8461_v5 = vrot.slane %v8447_v24, %v12163_v51  ;;  %v7338_v38 = vcombine.low %v4230_v43, %v4244_v40  ;;  %v10077_v29 = vcombine.high %v4230_v43, %v4244_v40 }
 0x4fb   : > { %v4313_v28 = vcombine.high %v4305_v2, %v4305_v2  ;;  %v13135_v26 = vrot.slane %v7336_v57, %v12163_v51  ;;  %v13138_v8 = vrot.slane %v10076_v56, %v12163_v51  ;;  %v4384_v16 = vrot.slane %v4362_v61, %v12163_v51  ;;  %v14402_v56 = vld [vmem:[#allocation61_spill] sm:$0xff]  ;;  %v13152_v61 = vpop.permute.xlu1 %2737 }
 0x4fc   : > { %v8462_v32 = vcombine.low %v8454_v54, %v8461_v5  ;;  %v13142_v21 = vrot.slane %v7387_v17, %v12163_v51  ;;  %v13145_v30 = vrot.slane %v10079_v58, %v12163_v51  ;;  %v4391_v42 = vrot.slane %v4363_v48, %v12163_v51 }
 0x4fd   : > { %v4445_v19 = vcombine.high %v2973_v7, %v2973_v7  ;;  %v4370_v57 = vrot.slane %v4354_v14, %v12163_v51  ;;  %v4314_v24 = vcombine.high %v4312_v3, %v4312_v3  ;;  %v2972_v43 = vmul.f32 %v2730_v37, %v14402_v56 }
 0x4fe   : > { %9481 = vperm.xlu1 %10416, %v8462_v32   ;;  %v13155_v17 = vrot.slane %v7338_v38, %v12163_v51  ;;  %v4377_v58 = vrot.slane %v4361_v59, %v12163_v51  ;;  %v4335_v22 = vrot.slane %v4313_v28, %v12163_v51  ;;  %v4452_v48 = vrot.slane %v2973_v7, %v12163_v51 }
 0x4ff   : > { %v13161_v54 = vrot.slane %v10077_v29, %v12163_v51  ;;  %v7483_v5 = vcombine.low %v4370_v57, %v4384_v16  ;;  %v10082_v32 = vcombine.high %v4370_v57, %v4384_v16  ;;  %v4321_v40 = vrot.slane %v4305_v2, %v12163_v51  ;;  %v14403_v57 = vld [vmem:[#allocation64_spill] sm:$0xff] }
 0x500   : > { %v7485_v37 = vcombine.low %v4377_v58, %v4391_v42  ;;  %v10083_v56 = vcombine.high %v4377_v58, %v4391_v42  ;;  %v4459_v38 = vrot.slane %v4445_v19, %v12163_v51  ;;  %v4328_v59 = vrot.slane %v4312_v3, %v12163_v51  ;;  %v13180_v58 = vpop.permute.xlu1 %2745 }
 0x501   : > { %v4342_v28 = vrot.slane %v4314_v24, %v12163_v51  ;;  %v4396_v7 = vcombine.high %v2972_v43, %v2972_v43  ;;  %v7075_v29 = vcombine.low %v13022_v33, %v13031_v44  ;;  %v7434_v31 = vcombine.low %v4321_v40, %v4335_v22 }
 0x502   : > { %v10080_v12 = vcombine.high %v4321_v40, %v4335_v22  ;;  %v4460_v14 = vcombine.high %v4452_v48, %v4452_v48  ;;  %v4403_v16 = vrot.slane %v2972_v43, %v12163_v51  ;;  %v2975_v42 = vmul.f32 %v2742_v36, %v14403_v57 }
 0x503   : > { %v14404_v2 = vcombine.low %v13006_v41, %v13009_v0  ;;  %v7089_v3 = vrot.slane %v7075_v29, %v12163_v51  ;;  %v7026_v24 = vcombine.low %v12923_v47, %v12930_v49  ;;  %v13183_v33 = vrot.slane %v7483_v5, %v12163_v51 }
 0x504   : > { %v13186_v44 = vrot.slane %v10082_v32, %v12163_v51  ;;  %v13189_v36 = vrot.slane %v7485_v37, %v12163_v51  ;;  %v4461_v40 = vcombine.high %v4459_v38, %v4459_v38  ;;  %v13192_v41 = vrot.slane %v10083_v56, %v12163_v51 }
 0x505   : > { %v7082_v19 = vrot.slane %v14404_v2, %v12163_v51  ;;  %v7436_v0 = vcombine.low %v4328_v59, %v4342_v28  ;;  %v4410_v43 = vrot.slane %v4396_v7, %v12163_v51  ;;  %v10081_v47 = vcombine.high %v4328_v59, %v4342_v28 }
 0x506   : > { %14405 = vst [vmem:[#allocation72_spill] sm:$0xff] %v13186_v44  ;;  %v13196_v49 = vrot.slane %v7434_v31, %v12163_v51  ;;  %v4482_v5 = vrot.slane %v4460_v14, %v12163_v51  ;;  %v4411_v29 = vcombine.high %v4403_v16, %v4403_v16  ;;  %v13200_v32 = vrot.slane %v10080_v12, %v12163_v51 }
 0x507   : > { %v7090_v22 = vcombine.low %v7082_v19, %v7089_v3  ;;  %v4543_v37 = vcombine.high %v2975_v42, %v2975_v42  ;;  %v4550_v57 = vrot.slane %v2975_v42, %v12163_v51  ;;  %v7040_v56 = vrot.slane %v7026_v24, %v12163_v51  ;;  %v13218_v3 = vpop.permute.xlu1 %2823 }
 0x508   : > { %v4468_v59 = vrot.slane %v4452_v48, %v12163_v51  ;;  %v4489_v31 = vrot.slane %v4461_v40, %v12163_v51  ;;  %v14406_v14 = vcombine.low %v12907_v63, %v12910_v35  ;;  %v13213_v12 = vrot.slane %v7436_v0, %v12163_v51 }
 0x509   : > { %9397 = vperm.xlu0 %10415, %v7090_v22   ;;  %v4475_v42 = vrot.slane %v4459_v38, %v12163_v51  ;;  %v4412_v2 = vcombine.high %v4410_v43, %v4410_v43  ;;  %v7173_v19 = vcombine.low %v13070_v1, %v13073_v45  ;;  %v13221_v48 = vrot.slane %v10081_v47, %v12163_v51  ;;  %v14407_v45 = vld [vmem:[#allocation63_spill] sm:$0xff] }
 0x50a   : > { %v7033_v28 = vrot.slane %v14406_v14, %v12163_v51  ;;  %v7581_v24 = vcombine.low %v4468_v59, %v4482_v5  ;;  %v4433_v40 = vrot.slane %v4411_v29, %v12163_v51  ;;  %v10086_v35 = vcombine.high %v4468_v59, %v4482_v5  ;;  %v2820_v14 = vpop.permute.xlu0 %2819 }
 0x50b   : > { %v4557_v0 = vrot.slane %v4543_v37, %v12163_v51  ;;  %v4558_v38 = vcombine.high %v4550_v57, %v4550_v57  ;;  %v7583_v7 = vcombine.low %v4475_v42, %v4489_v31  ;;  %v10087_v53 = vcombine.high %v4475_v42, %v4489_v31 }
 0x50c   : > { %v7041_v22 = vcombine.low %v7033_v28, %v7040_v56  ;;  %v4419_v1 = vrot.slane %v4403_v16, %v12163_v51  ;;  %v2974_v47 = vmul.f32 %v13152_v61, %v14407_v45  ;;  %v4440_v44 = vrot.slane %v4412_v2, %v12163_v51  ;;  %v14409_v28 = vld [vmem:[#allocation45_spill] sm:$0xff] }
 0x50d   : > { %v14408_v29 = vcombine.low %v13053_v18, %v13056_v20  ;;  %v7187_v5 = vrot.slane %v7173_v19, %v12163_v51  ;;  %v7124_v37 = vcombine.low %v12984_v46, %v12995_v6  ;;  %v13239_v59 = vrot.slane %v7581_v24, %v12163_v51  ;;  %v13244_v18 = vpop.permute.xlu1 %2831 }
 0x50e   : > { %9394 = vperm.xlu1 %10416, %v7041_v22   ;;  %v4426_v16 = vrot.slane %v4410_v43, %v12163_v51  ;;  %v7532_v31 = vcombine.low %v4419_v1, %v4433_v40  ;;  %v2993_v61 = vmul.f32 %v2820_v14, %v14409_v28  ;;  %v10084_v42 = vcombine.high %v4419_v1, %v4433_v40 }
 0x50f   : > { %v7180_v56 = vrot.slane %v14408_v29, %v12163_v51  ;;  %v4559_v2 = vcombine.high %v4557_v0, %v4557_v0  ;;  %v4580_v22 = vrot.slane %v4558_v38, %v12163_v51  ;;  %v13247_v20 = vrot.slane %v10086_v35, %v12163_v51 }
 0x510   : > { %v13250_v46 = vrot.slane %v7583_v7, %v12163_v51  ;;  %v4494_v6 = vcombine.high %v2974_v47, %v2974_v47  ;;  %v4501_v19 = vrot.slane %v2974_v47, %v12163_v51  ;;  %v7534_v43 = vcombine.low %v4426_v16, %v4440_v44 }
 0x511   : > { %v7188_v45 = vcombine.low %v7180_v56, %v7187_v5  ;;  %v10085_v24 = vcombine.high %v4426_v16, %v4440_v44  ;;  %v4566_v14 = vrot.slane %v4550_v57, %v12163_v51  ;;  %v7138_v40 = vrot.slane %v7124_v37, %v12163_v51  ;;  %v14411_v16 = vld [vmem:[#allocation67_spill] sm:$0xff] }
 0x512   : > { %v13256_v38 = vrot.slane %v10087_v53, %v12163_v51  ;;  %v5425_v1 = vcombine.high %v2993_v61, %v2993_v61  ;;  %v5432_v35 = vrot.slane %v2993_v61, %v12163_v51  ;;  %v14410_v7 = vcombine.low %v12977_v60, %v12981_v62 }
 0x513   : > { %9403 = vperm.xlu0 %10415, %v7188_v45   ;;  %v13264_v47 = vrot.slane %v7532_v31, %v12163_v51  ;;  %v13267_v44 = vrot.slane %v10084_v42, %v12163_v51  ;;  %v4587_v57 = vrot.slane %v4559_v2, %v12163_v51  ;;  %v7679_v56 = vcombine.low %v4566_v14, %v4580_v22  ;;  %v13282_v42 = vpop.permute.xlu1 %2839 }
 0x514   : > { %v7131_v29 = vrot.slane %v14410_v7, %v12163_v51  ;;  %v4508_v53 = vrot.slane %v4494_v6, %v12163_v51  ;;  %v4509_v5 = vcombine.high %v4501_v19, %v4501_v19  ;;  %v2976_v28 = vmul.f32 %v13180_v58, %v14411_v16 }
 0x515   : > { %v13276_v62 = vrot.slane %v7534_v43, %v12163_v51  ;;  %v13279_v31 = vrot.slane %v10085_v24, %v12163_v51  ;;  %v4573_v61 = vrot.slane %v4557_v0, %v12163_v51  ;;  %v10090_v2 = vcombine.high %v4566_v14, %v4580_v22 }
 0x516   : > { %v7139_v37 = vcombine.low %v7131_v29, %v7138_v40  ;;  %v5439_v45 = vrot.slane %v5425_v1, %v12163_v51  ;;  %v5440_v6 = vcombine.high %v5432_v35, %v5432_v35  ;;  %v7271_v58 = vcombine.low %v13106_v55, %v13111_v27  ;;  %v2828_v1 = vpop.permute.xlu0 %2827 }
 0x517   : > { %v7681_v43 = vcombine.low %v4573_v61, %v4587_v57  ;;  %v10091_v7 = vcombine.high %v4573_v61, %v4587_v57  ;;  %v7222_v24 = vcombine.low %v13038_v10, %v13046_v50  ;;  %v13292_v0 = vrot.slane %v7679_v56, %v12163_v51  ;;  %v13312_v40 = vpop.permute.xlu1 %2847 }
 0x518   : > { %9400 = vperm.xlu1 %10416, %v7139_v37   ;;  %v4510_v29 = vcombine.high %v4508_v53, %v4508_v53  ;;  %v4531_v22 = vrot.slane %v4509_v5, %v12163_v51  ;;  %v4592_v14 = vcombine.high %v2976_v28, %v2976_v28  ;;  %v14413_v55 = vcombine.low %v13094_v23, %v13103_v9  ;;  %v14416_v9 = vld [vmem:[#allocation49_spill] sm:$0xff] }
 0x519   : > { %14412 = vst [vmem:[#allocation70_spill] sm:$0xff] %v13292_v0  ;;  %v7285_v37 = vrot.slane %v7271_v58, %v12163_v51  ;;  %v14414_v57 = vcombine.low %v13016_v13, %v13019_v39  ;;  %v7236_v50 = vrot.slane %v7222_v24, %v12163_v51  ;;  %v13306_v56 = vrot.slane %v10090_v2, %v12163_v51 }
 0x51a   : > { %v7278_v27 = vrot.slane %v14413_v55, %v12163_v51  ;;  %v4517_v5 = vrot.slane %v4501_v19, %v12163_v51  ;;  %v5441_v16 = vcombine.high %v5439_v45, %v5439_v45  ;;  %v5462_v61 = vrot.slane %v5440_v6, %v12163_v51 }
 0x51b   : > { %v7229_v10 = vrot.slane %v14414_v57, %v12163_v51  ;;  %14415 = vst [vmem:[#allocation74_spill] sm:$0xff] %v13306_v56  ;;  %v4599_v23 = vrot.slane %v2976_v28, %v12163_v51  ;;  %v2995_v55 = vmul.f32 %v2828_v1, %v14416_v9  ;;  %v13315_v13 = vrot.slane %v7681_v43, %v12163_v51  ;;  %v14417_v28 = vld [vmem:[#allocation40_spill] sm:$0xff]  ;;  %v13337_v9 = vpop.permute.xlu1 %2855 }
 0x51c   : > { %v7286_v58 = vcombine.low %v7278_v27, %v7285_v37  ;;  %v4538_v39 = vrot.slane %v4510_v29, %v12163_v51  ;;  %v7630_v2 = vcombine.low %v4517_v5, %v4531_v22  ;;  %v5448_v24 = vrot.slane %v5432_v35, %v12163_v51 }
 0x51d   : > { %v7237_v60 = vcombine.low %v7229_v10, %v7236_v50  ;;  %v10088_v19 = vcombine.high %v4517_v5, %v4531_v22  ;;  %v4606_v57 = vrot.slane %v4592_v14, %v12163_v51  ;;  %v2994_v6 = vmul.f32 %v13218_v3, %v14417_v28 }
 0x51e   : > { %9409 = vperm.xlu0 %10415, %v7286_v58   ;;  %v4524_v1 = vrot.slane %v4508_v53, %v12163_v51  ;;  %v5469_v27 = vrot.slane %v5441_v16, %v12163_v51  ;;  %v8561_v37 = vcombine.low %v5448_v24, %v5462_v61  ;;  %v10126_v43 = vcombine.high %v5448_v24, %v5462_v61  ;;  %v2836_v61 = vpop.permute.xlu0 %2835 }
 0x51f   : > { %9406 = vperm.xlu1 %10416, %v7237_v60   ;;  %v13325_v10 = vrot.slane %v10091_v7, %v12163_v51  ;;  %v4607_v29 = vcombine.high %v4599_v23, %v4599_v23  ;;  %v5523_v22 = vcombine.high %v2995_v55, %v2995_v55  ;;  %v5455_v60 = vrot.slane %v5439_v45, %v12163_v51 }
 0x520   : > { %v7632_v14 = vcombine.low %v4524_v1, %v4538_v39  ;;  %v10089_v50 = vcombine.high %v4524_v1, %v4538_v39  ;;  %v5530_v3 = vrot.slane %v2995_v55, %v12163_v51  ;;  %v13332_v53 = vrot.slane %v7630_v2, %v12163_v51 }
 0x521   : > { %v13335_v5 = vrot.slane %v10088_v19, %v12163_v51  ;;  %v4608_v16 = vcombine.high %v4606_v57, %v4606_v57  ;;  %v5474_v7 = vcombine.high %v2994_v6, %v2994_v6  ;;  %v8563_v58 = vcombine.low %v5455_v60, %v5469_v27 }
 0x522   : > { %v10127_v24 = vcombine.high %v5455_v60, %v5469_v27  ;;  %v13340_v28 = vrot.slane %v8561_v37, %v12163_v51  ;;  %v13343_v45 = vrot.slane %v10126_v43, %v12163_v51  ;;  %v4629_v55 = vrot.slane %v4607_v29, %v12163_v51  ;;  %v2844_v56 = vpop.permute.xlu0 %2843 }
 0x523   : > { %v5537_v39 = vrot.slane %v5523_v22, %v12163_v51  ;;  %v5481_v2 = vrot.slane %v2994_v6, %v12163_v51  ;;  %v7369_v19 = vcombine.low %v13155_v17, %v13161_v54  ;;  %v13351_v1 = vrot.slane %v7632_v14, %v12163_v51  ;;  %v14418_v17 = vld [vmem:[#allocation55_spill] sm:$0xff] }
 0x524   : > { %v13354_v27 = vrot.slane %v10089_v50, %v12163_v51  ;;  %v5538_v37 = vcombine.high %v5530_v3, %v5530_v3  ;;  %v7320_v43 = vcombine.low %v13079_v11, %v13083_v52  ;;  %v4615_v22 = vrot.slane %v4599_v23, %v12163_v51 }
 0x525   : > { %v4636_v6 = vrot.slane %v4608_v16, %v12163_v51  ;;  %v5488_v60 = vrot.slane %v5474_v7, %v12163_v51  ;;  %v2997_v54 = vmul.f32 %v2836_v61, %v14418_v17  ;;  %v14419_v14 = vcombine.low %v13135_v26, %v13138_v8  ;;  %v13371_v16 = vpop.permute.xlu1 %2863 }
 0x526   : > { %v7383_v35 = vrot.slane %v7369_v19, %v12163_v51  ;;  %v7334_v11 = vrot.slane %v7320_v43, %v12163_v51  ;;  %v4622_v52 = vrot.slane %v4606_v57, %v12163_v51  ;;  %v7728_v29 = vcombine.low %v4615_v22, %v4629_v55  ;;  %14420 = vst [vmem:[#allocation73_spill] sm:$0xff] %v13371_v16 }
 0x527   : > { %v7376_v50 = vrot.slane %v14419_v14, %v12163_v51  ;;  %v5539_v63 = vcombine.high %v5537_v39, %v5537_v39  ;;  %v5489_v23 = vcombine.high %v5481_v2, %v5481_v2  ;;  %v10092_v7 = vcombine.high %v4615_v22, %v4629_v55 }
 0x528   : > { %v5560_v61 = vrot.slane %v5538_v37, %v12163_v51  ;;  %v14421_v26 = vcombine.low %v13060_v34, %v13064_v4  ;;  %v13379_v19 = vrot.slane %v8563_v58, %v12163_v51  ;;  %v13382_v57 = vrot.slane %v10127_v24, %v12163_v51 }
 0x529   : > { %v7384_v17 = vcombine.low %v7376_v50, %v7383_v35  ;;  %v7730_v43 = vcombine.low %v4622_v52, %v4636_v6  ;;  %v5546_v14 = vrot.slane %v5530_v3, %v12163_v51  ;;  %v10093_v0 = vcombine.high %v4622_v52, %v4636_v6  ;;  %v14422_v52 = vld [vmem:[#allocation52_spill] sm:$0xff] }
 0x52a   : > { %v7327_v8 = vrot.slane %v14421_v26, %v12163_v51  ;;  %v5490_v16 = vcombine.high %v5488_v60, %v5488_v60  ;;  %v5621_v55 = vcombine.high %v2997_v54, %v2997_v54  ;;  %v5553_v34 = vrot.slane %v5537_v39, %v12163_v51 }
 0x52b   : > { %9415 = vperm.xlu0 %10415, %v7384_v17   ;;  %v5567_v4 = vrot.slane %v5539_v63, %v12163_v51  ;;  %v5511_v58 = vrot.slane %v5489_v23, %v12163_v51  ;;  %v13391_v24 = vrot.slane %v7728_v29, %v12163_v51  ;;  %v13394_v22 = vrot.slane %v10092_v7, %v12163_v51  ;;  %v13402_v23 = vpop.permute.xlu0 %2851  ;;  %v13404_v29 = vpop.permute.xlu1 %2871 }
 0x52c   : > { %v7335_v37 = vcombine.low %v7327_v8, %v7334_v11  ;;  %v8659_v3 = vcombine.low %v5546_v14, %v5560_v61  ;;  %v5628_v6 = vrot.slane %v2997_v54, %v12163_v51  ;;  %v10130_v50 = vcombine.high %v5546_v14, %v5560_v61 }
 0x52d   : > { %v5497_v11 = vrot.slane %v5481_v2, %v12163_v51  ;;  %v2996_v39 = vmul.f32 %v13244_v18, %v14422_v52  ;;  %v7467_v63 = vcombine.low %v13213_v12, %v13221_v48  ;;  %v13407_v7 = vrot.slane %v7730_v43, %v12163_v51 }
 0x52e   : > { %9412 = vperm.xlu1 %10416, %v7335_v37   ;;  %v13410_v17 = vrot.slane %v10093_v0, %v12163_v51  ;;  %v5518_v54 = vrot.slane %v5490_v16, %v12163_v51  ;;  %v5635_v2 = vrot.slane %v5621_v55, %v12163_v51  ;;  %v8661_v61 = vcombine.low %v5553_v34, %v5567_v4  ;;  %v14423_v37 = vld [vmem:[#allocation66_spill] sm:$0xff] }
 0x52f   : > { %v10131_v26 = vcombine.high %v5553_v34, %v5567_v4  ;;  %v8610_v18 = vcombine.low %v5497_v11, %v5511_v58  ;;  %v10128_v8 = vcombine.high %v5497_v11, %v5511_v58  ;;  %v13415_v12 = vrot.slane %v8659_v3, %v12163_v51  ;;  %v13436_v35 = vpop.permute.xlu0 %2859 }
 0x530   : > { %v5504_v48 = vrot.slane %v5488_v60, %v12163_v51  ;;  %v5636_v14 = vcombine.high %v5628_v6, %v5628_v6  ;;  %v2999_v43 = vmul.f32 %v2844_v56, %v14423_v37  ;;  %v13420_v52 = vrot.slane %v10130_v50, %v12163_v51 }
 0x531   : > { %v5572_v0 = vcombine.high %v2996_v39, %v2996_v39  ;;  %v14424_v16 = vcombine.low %v13196_v49, %v13200_v32  ;;  %v7481_v34 = vrot.slane %v7467_v63, %v12163_v51  ;;  %v5637_v3 = vcombine.high %v5635_v2, %v5635_v2  ;;  %v13438_v49 = vpop.permute.xlu1 %2879 }
 0x532   : > { %v8612_v4 = vcombine.low %v5504_v48, %v5518_v54  ;;  %v10129_v58 = vcombine.high %v5504_v48, %v5518_v54  ;;  %v5579_v11 = vrot.slane %v2996_v39, %v12163_v51  ;;  %v13429_v60 = vrot.slane %v8610_v18, %v12163_v51  ;;  %14425 = vst [vmem:[#allocation29_spill] sm:$0xff] %v13438_v49 }
 0x533   : > { %v7474_v55 = vrot.slane %v14424_v16, %v12163_v51  ;;  %v13432_v56 = vrot.slane %v10128_v8, %v12163_v51  ;;  %v7418_v37 = vcombine.low %v13142_v21, %v13145_v30  ;;  %v13443_v63 = vrot.slane %v8661_v61, %v12163_v51 }
 0x534   : > { %v5658_v39 = vrot.slane %v5636_v14, %v12163_v51  ;;  %v5719_v54 = vcombine.high %v2999_v43, %v2999_v43  ;;  %v13447_v18 = vrot.slane %v10131_v26, %v12163_v51  ;;  %v5586_v21 = vrot.slane %v5572_v0, %v12163_v51 }
 0x535   : > { %v7482_v50 = vcombine.low %v7474_v55, %v7481_v34  ;;  %v5726_v30 = vrot.slane %v2999_v43, %v12163_v51  ;;  %v13454_v48 = vrot.slane %v8612_v4, %v12163_v51  ;;  %v5644_v61 = vrot.slane %v5628_v6, %v12163_v51  ;;  %v13468_v4 = vpop.permute.xlu1 %9349 }
 0x536   : > { %v5665_v16 = vrot.slane %v5637_v3, %v12163_v51  ;;  %v5587_v14 = vcombine.high %v5579_v11, %v5579_v11  ;;  %v13459_v55 = vrot.slane %v10129_v58, %v12163_v51  ;;  %v14426_v0 = vcombine.low %v13122_v15, %v13127_v25  ;;  %14427 = vst [vmem:[#allocation76_spill] sm:$0xff] %v13468_v4  ;;  %v13476_v15 = vpop.permute.xlu0 %2867  ;;  %v14428_v4 = vld [vmem:[#allocation60_spill] sm:$0xff] }
 0x537   : > { %9421 = vperm.xlu0 %10415, %v7482_v50   ;;  %v7432_v34 = vrot.slane %v7418_v37, %v12163_v51  ;;  %v5651_v6 = vrot.slane %v5635_v2, %v12163_v51  ;;  %v8757_v50 = vcombine.low %v5644_v61, %v5658_v39  ;;  %v5733_v3 = vrot.slane %v5719_v54, %v12163_v51 }
 0x538   : > { %v7425_v43 = vrot.slane %v14426_v0, %v12163_v51  ;;  %v7565_v58 = vcombine.low %v13276_v62, %v13279_v31  ;;  %v5588_v8 = vcombine.high %v5586_v21, %v5586_v21  ;;  %v5734_v32 = vcombine.high %v5726_v30, %v5726_v30 }
 0x539   : > { %v7516_v49 = vcombine.low %v13189_v36, %v13192_v41  ;;  %v10134_v25 = vcombine.high %v5644_v61, %v5658_v39  ;;  %v8759_v37 = vcombine.low %v5651_v6, %v5665_v16  ;;  %v5609_v0 = vrot.slane %v5587_v14, %v12163_v51  ;;  %v14430_v36 = vld [vmem:[#allocation72_spill] sm:$0xff] }
 0x53a   : > { %v7433_v26 = vcombine.low %v7425_v43, %v7432_v34  ;;  %v2998_v2 = vmul.f32 %v13282_v42, %v14428_v4  ;;  %v14429_v62 = vcombine.low %v13264_v47, %v13267_v44  ;;  %v7579_v54 = vrot.slane %v7565_v58, %v12163_v51  ;;  %v14432_v42 = vld [vmem:[#allocation16_spill] sm:$0xff] }
 0x53b   : > { %v14431_v41 = vcombine.low %v13183_v33, %v14430_v36  ;;  %v7530_v39 = vrot.slane %v7516_v49, %v12163_v51  ;;  %v10135_v61 = vcombine.high %v5651_v6, %v5665_v16  ;;  %v5595_v14 = vrot.slane %v5579_v11, %v12163_v51 }
 0x53c   : > { %9418 = vperm.xlu1 %10416, %v7433_v26   ;;  %v7572_v31 = vrot.slane %v14429_v62, %v12163_v51  ;;  %v5735_v34 = vcombine.high %v5733_v3, %v5733_v3  ;;  %v3001_v26 = vmul.f32 %v13402_v23, %v14432_v42  ;;  %v5616_v4 = vrot.slane %v5588_v8, %v12163_v51  ;;  %v13496_v62 = vpop.permute.xlu1 %9352  ;;  %v13504_v8 = vpop.permute.xlu0 %2875 }
 0x53d   : > { %v7523_v43 = vrot.slane %v14431_v41, %v12163_v51  ;;  %v5756_v47 = vrot.slane %v5734_v32, %v12163_v51  ;;  %14433 = vst [vmem:[#allocation33_spill] sm:$0xff] %v13496_v62  ;;  %v13499_v33 = vrot.slane %v8757_v50, %v12163_v51  ;;  %v5602_v49 = vrot.slane %v5586_v21, %v12163_v51 }
 0x53e   : > { %v7580_v44 = vcombine.low %v7572_v31, %v7579_v54  ;;  %v5742_v16 = vrot.slane %v5726_v30, %v12163_v51  ;;  %v5670_v11 = vcombine.high %v2998_v2, %v2998_v2  ;;  %v8708_v6 = vcombine.low %v5595_v14, %v5609_v0 }
 0x53f   : > { %v7531_v58 = vcombine.low %v7523_v43, %v7530_v39  ;;  %v10132_v36 = vcombine.high %v5595_v14, %v5609_v0  ;;  %v5677_v23 = vrot.slane %v2998_v2, %v12163_v51  ;;  %v13507_v32 = vrot.slane %v10134_v25, %v12163_v51  ;;  %v14435_v39 = vld [vmem:[#allocation39_spill] sm:$0xff] }
 0x540   : > { %9427 = vperm.xlu0 %10415, %v7580_v44   ;;  %v13510_v31 = vrot.slane %v8759_v37, %v12163_v51  ;;  %v13513_v50 = vrot.slane %v5735_v34, %v12163_v51  ;;  %v5817_v21 = vcombine.high %v3001_v26, %v3001_v26  ;;  %v8710_v30 = vcombine.low %v5602_v49, %v5616_v4  ;;  %v13529_v44 = vpop.permute.xlu0 %9346 }
 0x541   : > { %9424 = vperm.xlu1 %10416, %v7531_v58   ;;  %14434 = vst [vmem:[#allocation24_spill] sm:$0xff] %v13507_v32  ;;  %v8855_v54 = vcombine.low %v5742_v16, %v5756_v47  ;;  %v10138_v41 = vcombine.high %v5742_v16, %v5756_v47  ;;  %v5824_v0 = vrot.slane %v3001_v26, %v12163_v51  ;;  %14436 = vst [vmem:[#allocation48_spill] sm:$0xff] %v13529_v44  ;;  %v13531_v26 = vpop.permute.xlu1 %9358  ;;  %v14444_v32 = vld [vmem:[#allocation18_spill] sm:$0xff] }
 0x542   : > { %v13517_v2 = vrot.slane %v10135_v61, %v12163_v51  ;;  %v5749_v43 = vrot.slane %v5733_v3, %v12163_v51  ;;  %v5684_v25 = vrot.slane %v5670_v11, %v12163_v51  ;;  %v3000_v37 = vmul.f32 %v13312_v40, %v14435_v39  ;;  %14437 = vst [vmem:[#allocation37_spill] sm:$0xff] %v13531_v26 }
 0x543   : > { %v10133_v14 = vcombine.high %v5602_v49, %v5616_v4  ;;  %v13524_v34 = vrot.slane %v8708_v6, %v12163_v51  ;;  %v13527_v42 = vrot.slane %v10132_v36, %v12163_v51  ;;  %v5685_v47 = vcombine.high %v5677_v23, %v5677_v23 }
 0x544   : > { %v8857_v61 = vcombine.low %v5749_v43, %v13513_v50  ;;  %v10139_v58 = vcombine.high %v5749_v43, %v13513_v50  ;;  %v5831_v40 = vrot.slane %v5817_v21, %v12163_v51  ;;  %v13539_v4 = vrot.slane %v8710_v30, %v12163_v51 }
 0x545   : > { %v13542_v49 = vrot.slane %v8855_v54, %v12163_v51  ;;  %v13545_v16 = vrot.slane %v10138_v41, %v12163_v51  ;;  %v5832_v11 = vcombine.high %v5824_v0, %v5824_v0  ;;  %v5686_v6 = vcombine.high %v5684_v25, %v5684_v25  ;;  %v13558_v41 = vpop.permute.xlu0 %9355 }
 0x546   : > { %v5768_v36 = vcombine.high %v3000_v37, %v3000_v37  ;;  %v5775_v39 = vrot.slane %v3000_v37, %v12163_v51  ;;  %v7663_v3 = vcombine.low %v13351_v1, %v13354_v27  ;;  %v13551_v50 = vrot.slane %v10133_v14, %v12163_v51  ;;  %14438 = vst [vmem:[#allocation53_spill] sm:$0xff] %v13558_v41  ;;  %v14440_v1 = vld [vmem:[#allocation17_spill] sm:$0xff]  ;;  %v13573_v41 = vpop.permute.xlu1 %9364 }
 0x547   : > { %v5707_v30 = vrot.slane %v5685_v47, %v12163_v51  ;;  %v7614_v54 = vcombine.low %v13250_v46, %v13256_v38  ;;  %v13561_v43 = vrot.slane %v8857_v61, %v12163_v51  ;;  %v5693_v37 = vrot.slane %v5677_v23, %v12163_v51  ;;  %14442 = vst [vmem:[#allocation57_spill] sm:$0xff] %v13573_v41 }
 0x548   : > { %v5833_v26 = vcombine.high %v5831_v40, %v5831_v40  ;;  %v3003_v27 = vmul.f32 %v13436_v35, %v14440_v1  ;;  %v5854_v14 = vrot.slane %v5832_v11, %v12163_v51  ;;  %v14441_v47 = vcombine.low %v13332_v53, %v13335_v5 }
 0x549   : > { %14439 = vst [vmem:[#allocation51_spill] sm:$0xff] %v13561_v43  ;;  %v7677_v46 = vrot.slane %v7663_v3, %v12163_v51  ;;  %v7628_v38 = vrot.slane %v7614_v54, %v12163_v51  ;;  %v5714_v61 = vrot.slane %v5686_v6, %v12163_v51  ;;  %v5782_v23 = vrot.slane %v5768_v36, %v12163_v51 }
 0x54a   : > { %v7670_v21 = vrot.slane %v14441_v47, %v12163_v51  ;;  %v5783_v62 = vcombine.high %v5775_v39, %v5775_v39  ;;  %v14443_v35 = vcombine.low %v13239_v59, %v13247_v20  ;;  %v5700_v1 = vrot.slane %v5684_v25, %v12163_v51  ;;  %v13588_v20 = vpop.permute.xlu0 %9361 }
 0x54b   : > { %v8806_v53 = vcombine.low %v5693_v37, %v5707_v30  ;;  %v5840_v5 = vrot.slane %v5824_v0, %v12163_v51  ;;  %v10136_v47 = vcombine.high %v5693_v37, %v5707_v30  ;;  %v5861_v54 = vrot.slane %v5833_v26, %v12163_v51  ;;  %14445 = vst [vmem:[#allocation56_spill] sm:$0xff] %v13588_v20 }
 0x54c   : > { %v7621_v11 = vrot.slane %v14443_v35, %v12163_v51  ;;  %v7678_v3 = vcombine.low %v7670_v21, %v7677_v46  ;;  %v5915_v41 = vcombine.high %v3003_v27, %v3003_v27  ;;  %v5847_v6 = vrot.slane %v5831_v40, %v12163_v51 }
 0x54d   : > { %v8953_v36 = vcombine.low %v5840_v5, %v5854_v14  ;;  %v5922_v43 = vrot.slane %v3003_v27, %v12163_v51  ;;  %v3002_v59 = vmul.f32 %v13337_v9, %v14444_v32  ;;  %v8808_v25 = vcombine.low %v5700_v1, %v5714_v61  ;;  %v13599_v27 = vpop.permute.xlu1 %9370 }
 0x54e   : > { %v7629_v44 = vcombine.low %v7621_v11, %v7628_v38  ;;  %9433 = vperm.xlu0 %10415, %v7678_v3   ;;  %v10142_v35 = vcombine.high %v5840_v5, %v5854_v14  ;;  %v5784_v0 = vcombine.high %v5782_v23, %v5782_v23  ;;  %v5805_v21 = vrot.slane %v5783_v62, %v12163_v51 }
 0x54f   : > { %v13592_v26 = vrot.slane %v10139_v58, %v12163_v51  ;;  %v10137_v30 = vcombine.high %v5700_v1, %v5714_v61  ;;  %v13597_v37 = vrot.slane %v8806_v53, %v12163_v51  ;;  %14446 = vst [vmem:[#allocation59_spill] sm:$0xff] %v13599_v27  ;;  %v13602_v9 = vrot.slane %v10136_v47, %v12163_v51  ;;  %v13622_v47 = vpop.permute.xlu0 %9367 }
 0x550   : > { %9430 = vperm.xlu1 %10416, %v7629_v44   ;;  %v8955_v32 = vcombine.low %v5847_v6, %v5861_v54  ;;  %v5791_v14 = vrot.slane %v5775_v39, %v12163_v51  ;;  %v5929_v62 = vrot.slane %v5915_v41, %v12163_v51  ;;  %v10143_v44 = vcombine.high %v5847_v6, %v5861_v54 }
 0x551   : > { %v13607_v58 = vrot.slane %v8953_v36, %v12163_v51  ;;  %v5930_v46 = vcombine.high %v5922_v43, %v5922_v43  ;;  %v5866_v38 = vcombine.high %v3002_v59, %v3002_v59  ;;  %v13610_v61 = vrot.slane %v8808_v25, %v12163_v51  ;;  %14448 = vst [vmem:[#allocation62_spill] sm:$0xff] %v13622_v47  ;;  %v14449_v25 = vld [vmem:[#allocation68_spill] sm:$0xff]  ;;  %v14453_v47 = vld [vmem:[#allocation74_spill] sm:$0xff] }
 0x552   : > { %v13613_v11 = vrot.slane %v10142_v35, %v12163_v51  ;;  %v5812_v1 = vrot.slane %v5784_v0, %v12163_v51  ;;  %v8904_v53 = vcombine.low %v5791_v14, %v5805_v21  ;;  %v13617_v5 = vrot.slane %v10137_v30, %v12163_v51 }
 0x553   : > { %v10140_v39 = vcombine.high %v5791_v14, %v5805_v21  ;;  %v5873_v41 = vrot.slane %v3002_v59, %v12163_v51  ;;  %v7761_v3 = vcombine.low %v13407_v7, %v13410_v17  ;;  %v5798_v6 = vrot.slane %v5782_v23, %v12163_v51  ;;  %v13637_v17 = vpop.permute.xlu1 %9376 }
 0x554   : > { %14447 = vst [vmem:[#allocation58_spill] sm:$0xff] %v13613_v11  ;;  %v5931_v36 = vcombine.high %v5929_v62, %v5929_v62  ;;  %v3005_v35 = vmul.f32 %v13476_v15, %v14449_v25  ;;  %v13630_v0 = vrot.slane %v8955_v32, %v12163_v51  ;;  %v13633_v21 = vrot.slane %v10143_v44, %v12163_v51 }
 0x555   : > { %v5952_v59 = vrot.slane %v5930_v46, %v12163_v51  ;;  %v5880_v7 = vrot.slane %v5866_v38, %v12163_v51  ;;  %14450 = vst [vmem:[#allocation61_spill] sm:$0xff] %v13637_v17  ;;  %v8906_v23 = vcombine.low %v5798_v6, %v5812_v1  ;;  %v10141_v14 = vcombine.high %v5798_v6, %v5812_v1 }
 0x556   : > { %v13642_v40 = vrot.slane %v8904_v53, %v12163_v51  ;;  %v13645_v15 = vrot.slane %v10140_v39, %v12163_v51  ;;  %v5938_v32 = vrot.slane %v5922_v43, %v12163_v51  ;;  %v5881_v44 = vcombine.high %v5873_v41, %v5873_v41  ;;  %v13657_v43 = vpop.permute.xlu0 %9373 }
 0x557   : > { %v7775_v46 = vrot.slane %v7761_v3, %v12163_v51  ;;  %v5959_v38 = vrot.slane %v5931_v36, %v12163_v51  ;;  %v6013_v25 = vcombine.high %v3005_v35, %v3005_v35  ;;  %v14451_v30 = vcombine.low %v13391_v24, %v13394_v22  ;;  %v14452_v36 = vld [vmem:[#allocation70_spill] sm:$0xff] }
 0x558   : > { %v7712_v1 = vcombine.low %v13315_v13, %v13325_v10  ;;  %v5945_v53 = vrot.slane %v5929_v62, %v12163_v51  ;;  %v9051_v39 = vcombine.low %v5938_v32, %v5952_v59  ;;  %v10146_v6 = vcombine.high %v5938_v32, %v5952_v59  ;;  %v14455_v62 = vld [vmem:[#allocation19_spill] sm:$0xff]  ;;  %v14456_v59 = vld [vmem:[#allocation73_spill] sm:$0xff] }
 0x559   : > { %v7768_v54 = vrot.slane %v14451_v30, %v12163_v51  ;;  %v5882_v17 = vcombine.high %v5880_v7, %v5880_v7  ;;  %v6020_v3 = vrot.slane %v3005_v35, %v12163_v51  ;;  %v14454_v20 = vcombine.low %v14452_v36, %v14453_v47  ;;  %v13674_v35 = vpop.permute.xlu1 %9382 }
 0x55a   : > { %v7726_v24 = vrot.slane %v7712_v1, %v12163_v51  ;;  %v13666_v22 = vrot.slane %v8906_v23, %v12163_v51  ;;  %v13669_v13 = vrot.slane %v10141_v14, %v12163_v51  ;;  %v5903_v10 = vrot.slane %v5881_v44, %v12163_v51 }
 0x55b   : > { %v7776_v27 = vcombine.low %v7768_v54, %v7775_v46  ;;  %v7719_v11 = vrot.slane %v14454_v20, %v12163_v51  ;;  %v3004_v30 = vmul.f32 %v14456_v59, %v14455_v62  ;;  %v9053_v54 = vcombine.low %v5945_v53, %v5959_v38 }
 0x55c   : > { %v10147_v32 = vcombine.high %v5945_v53, %v5959_v38  ;;  %v6027_v47 = vrot.slane %v6013_v25, %v12163_v51  ;;  %v8936_v23 = vcombine.low %v13642_v40, %v13645_v15  ;;  %v5889_v46 = vrot.slane %v5873_v41, %v12163_v51 }
 0x55d   : > { %9439 = vperm.xlu0 %10415, %v7776_v27   ;;  %v7727_v20 = vcombine.low %v7719_v11, %v7726_v24  ;;  %v5910_v14 = vrot.slane %v5882_v17, %v12163_v51  ;;  %v8643_v44 = vcombine.low %v13454_v48, %v13459_v55  ;;  %v13684_v1 = vrot.slane %v9051_v39, %v12163_v51  ;;  %v13692_v17 = vpop.permute.xlu0 %9379 }
 0x55e   : > { %v13687_v36 = vrot.slane %v10146_v6, %v12163_v51  ;;  %v6028_v38 = vcombine.high %v6020_v3, %v6020_v3  ;;  %v8594_v27 = vcombine.low %v13379_v19, %v13382_v57  ;;  %v5896_v11 = vrot.slane %v5880_v7, %v12163_v51  ;;  %v14457_v57 = vld [vmem:[#allocation71_spill] sm:$0xff] }
 0x55f   : > { %9436 = vperm.xlu1 %10416, %v7727_v20   ;;  %v9002_v25 = vcombine.low %v5889_v46, %v5903_v10  ;;  %v10144_v41 = vcombine.high %v5889_v46, %v5903_v10  ;;  %v5964_v53 = vcombine.high %v3004_v30, %v3004_v30  ;;  %v13695_v48 = vrot.slane %v9053_v54, %v12163_v51  ;;  %v13704_v10 = vpop.permute.xlu1 %9388 }
 0x560   : > { %v13698_v55 = vrot.slane %v10147_v32, %v12163_v51  ;;  %v6029_v39 = vcombine.high %v6027_v47, %v6027_v47  ;;  %v8657_v6 = vrot.slane %v8643_v44, %v12163_v51  ;;  %v9004_v24 = vcombine.low %v5896_v11, %v5910_v14 }
 0x561   : > { %v10145_v62 = vcombine.high %v5896_v11, %v5910_v14  ;;  %v5971_v19 = vrot.slane %v3004_v30, %v12163_v51  ;;  %v3007_v7 = vmul.f32 %v13504_v8, %v14457_v57  ;;  %v6050_v54 = vrot.slane %v6028_v38, %v12163_v51 }
 0x562   : > { %v14458_v32 = vcombine.low %v13429_v60, %v13432_v56  ;;  %v8608_v46 = vrot.slane %v8594_v27, %v12163_v51  ;;  %v13715_v14 = vrot.slane %v9002_v25, %v12163_v51  ;;  %v13718_v30 = vrot.slane %v10144_v41, %v12163_v51 }
 0x563   : > { %v6036_v8 = vrot.slane %v6020_v3, %v12163_v51  ;;  %v5978_v44 = vrot.slane %v5964_v53, %v12163_v51  ;;  %v6043_v11 = vrot.slane %v6027_v47, %v12163_v51  ;;  %v6057_v38 = vrot.slane %v6029_v39, %v12163_v51  ;;  %v14460_v39 = vld [vmem:[#allocation69_spill] sm:$0xff] }
 0x564   : > { %v8650_v20 = vrot.slane %v14458_v32, %v12163_v51  ;;  %v14459_v60 = vcombine.low %v13340_v28, %v13343_v45  ;;  %v13729_v27 = vrot.slane %v9004_v24, %v12163_v51  ;;  %v13732_v25 = vrot.slane %v10145_v62, %v12163_v51  ;;  %v13734_v32 = vpop.permute.xlu0 %9385 }
 0x565   : > { %v5979_v41 = vcombine.high %v5971_v19, %v5971_v19  ;;  %v6111_v3 = vcombine.high %v3007_v7, %v3007_v7  ;;  %v9149_v53 = vcombine.low %v6036_v8, %v6050_v54  ;;  %v8741_v28 = vcombine.low %v13539_v4, %v13551_v50 }
 0x566   : > { %v8658_v57 = vcombine.low %v8650_v20, %v8657_v6  ;;  %v8601_v56 = vrot.slane %v14459_v60, %v12163_v51  ;;  %v3006_v6 = vmul.f32 %v13404_v29, %v14460_v39  ;;  %v10150_v45 = vcombine.high %v6036_v8, %v6050_v54  ;;  %v13743_v60 = vpop.permute.xlu1 %9442 }
 0x567   : > { %v5980_v20 = vcombine.high %v5978_v44, %v5978_v44  ;;  %v6118_v24 = vrot.slane %v3007_v7, %v12163_v51  ;;  %v8692_v62 = vcombine.low %v13443_v63, %v13447_v18  ;;  %v9151_v59 = vcombine.low %v6043_v11, %v6057_v38 }
 0x568   : > { %9493 = vperm.xlu0 %10415, %v8658_v57   ;;  %v8609_v47 = vcombine.low %v8601_v56, %v8608_v46  ;;  %v14461_v46 = vcombine.low %v13524_v34, %v13527_v42  ;;  %v8755_v29 = vrot.slane %v8741_v28, %v12163_v51  ;;  %v8839_v4 = vcombine.low %v13610_v61, %v13617_v5 }
 0x569   : > { %v6001_v50 = vrot.slane %v5979_v41, %v12163_v51  ;;  %v6125_v7 = vrot.slane %v6111_v3, %v12163_v51  ;;  %v14462_v63 = vcombine.low %v13415_v12, %v13420_v52  ;;  %v8706_v54 = vrot.slane %v8692_v62, %v12163_v51  ;;  %v13764_v3 = vpop.permute.xlu0 %9391  ;;  %v14463_v12 = vld [vmem:[#allocation75_spill] sm:$0xff]  ;;  %v14464_v52 = vld [vmem:[#allocation29_spill] sm:$0xff] }
 0x56a   : > { %9490 = vperm.xlu1 %10416, %v8609_v47   ;;  %v8748_v57 = vrot.slane %v14461_v46, %v12163_v51  ;;  %v10151_v8 = vcombine.high %v6043_v11, %v6057_v38  ;;  %v13760_v34 = vrot.slane %v9149_v53, %v12163_v51  ;;  %v6062_v42 = vcombine.high %v3006_v6, %v3006_v6 }
 0x56b   : > { %v8699_v18 = vrot.slane %v14462_v63, %v12163_v51  ;;  %v5987_v47 = vrot.slane %v5971_v19, %v12163_v51  ;;  %v6008_v61 = vrot.slane %v5980_v20, %v12163_v51  ;;  %v6126_v5 = vcombine.high %v6118_v24, %v6118_v24 }
 0x56c   : > { %v8756_v56 = vcombine.low %v8748_v57, %v8755_v29  ;;  %v13767_v39 = vrot.slane %v10150_v45, %v12163_v51  ;;  %v3008_v11 = vmul.f32 %v14464_v52, %v14463_v12  ;;  %v14465_v38 = vcombine.low %v13597_v37, %v13602_v9  ;;  %v13779_v45 = vpop.permute.xlu1 %9448 }
 0x56d   : > { %v8707_v41 = vcombine.low %v8699_v18, %v8706_v54  ;;  %v8853_v19 = vrot.slane %v8839_v4, %v12163_v51  ;;  %v9034_v28 = vcombine.low %v13715_v14, %v13718_v30  ;;  %v5994_v20 = vrot.slane %v5978_v44, %v12163_v51 }
 0x56e   : > { %9499 = vperm.xlu0 %10415, %v8756_v56   ;;  %v8846_v53 = vrot.slane %v14465_v38, %v12163_v51  ;;  %v9100_v62 = vcombine.low %v5987_v47, %v6001_v50  ;;  %v6127_v46 = vcombine.high %v6125_v7, %v6125_v7  ;;  %v10148_v57 = vcombine.high %v5987_v47, %v6001_v50  ;;  %v14466_v47 = vld [vmem:[#allocation24_spill] sm:$0xff] }
 0x56f   : > { %9496 = vperm.xlu1 %10416, %v8707_v41   ;;  %v6076_v29 = vrot.slane %v6062_v42, %v12163_v51  ;;  %v8790_v37 = vcombine.low %v13510_v31, %v13517_v2  ;;  %v13785_v9 = vrot.slane %v9151_v59, %v12163_v51  ;;  %v9102_v4 = vcombine.low %v5994_v20, %v6008_v61 }
 0x570   : > { %v8854_v63 = vcombine.low %v8846_v53, %v8853_v19  ;;  %v10149_v18 = vcombine.high %v5994_v20, %v6008_v61  ;;  %v13788_v14 = vrot.slane %v6126_v5, %v12163_v51  ;;  %v13791_v30 = vrot.slane %v10151_v8, %v12163_v51  ;;  %v13808_v8 = vpop.permute.xlu0 %9445  ;;  %v13824_v38 = vpop.permute.xlu1 %9454 }
 0x571   : > { %v9181_v44 = vcombine.low %v13760_v34, %v13767_v39  ;;  %v6069_v50 = vrot.slane %v3006_v6, %v12163_v51  ;;  %v6160_v54 = vcombine.high %v3008_v11, %v3008_v11  ;;  %v13797_v31 = vrot.slane %v9100_v62, %v12163_v51 }
 0x572   : > { %9505 = vperm.xlu0 %10415, %v8854_v63   ;;  %v13800_v2 = vrot.slane %v6118_v24, %v12163_v51  ;;  %v13803_v59 = vrot.slane %v6125_v7, %v12163_v51  ;;  %v13806_v42 = vrot.slane %v6127_v46, %v12163_v51  ;;  %v13811_v56 = vrot.slane %v10148_v57, %v12163_v51 }
 0x573   : > { %v6078_v6 = vcombine.high %v6076_v29, %v6076_v29  ;;  %v14467_v61 = vcombine.low %v13499_v33, %v14466_v47  ;;  %v8804_v24 = vrot.slane %v8790_v37, %v12163_v51  ;;  %v9124_v41 = vrot.slane %v9102_v4, %v12163_v51  ;;  %v14468_v33 = vld [vmem:[#allocation51_spill] sm:$0xff] }
 0x574   : > { %v9131_v7 = vrot.slane %v10149_v18, %v12163_v51  ;;  %v9247_v12 = vcombine.low %v13800_v2, %v13788_v14  ;;  %v8937_v52 = vcombine.low %v13666_v22, %v13669_v13  ;;  %v6077_v53 = vcombine.high %v6069_v50, %v6069_v50 }
 0x575   : > { %v8797_v5 = vrot.slane %v14467_v61, %v12163_v51  ;;  %v6174_v19 = vrot.slane %v6160_v54, %v12163_v51  ;;  %v8888_v62 = vcombine.low %v14468_v33, %v13592_v26  ;;  %v8944_v46 = vrot.slane %v8936_v23, %v12163_v51  ;;  %v14470_v54 = vld [vmem:[#allocation34_spill] sm:$0xff] }
 0x576   : > { %v8951_v57 = vrot.slane %v8937_v52, %v12163_v51  ;;  %v9035_v63 = vcombine.low %v13729_v27, %v13732_v25  ;;  %v8986_v22 = vcombine.low %v13630_v0, %v13633_v21  ;;  %v6106_v13 = vrot.slane %v6078_v6, %v12163_v51  ;;  %v13849_v21 = vpop.permute.xlu0 %9451  ;;  %v14472_v52 = vld [vmem:[#allocation58_spill] sm:$0xff] }
 0x577   : > { %v8805_v20 = vcombine.low %v8797_v5, %v8804_v24  ;;  %v6167_v37 = vrot.slane %v3008_v11, %v12163_v51  ;;  %v14469_v26 = vcombine.low %v13542_v49, %v13545_v16  ;;  %v8902_v40 = vrot.slane %v8888_v62, %v12163_v51  ;;  %v14471_v49 = vld [vmem:[#allocation31_spill] sm:$0xff]  ;;  %v13858_v5 = vpop.permute.xlu1 %9460 }
 0x578   : > { %v8952_v15 = vcombine.low %v8944_v46, %v8951_v57  ;;  %v9042_v23 = vrot.slane %v9034_v28, %v12163_v51  ;;  %v9049_v27 = vrot.slane %v9035_v63, %v12163_v51  ;;  %v9084_v0 = vcombine.low %v13695_v48, %v13698_v55 }
 0x579   : > { %9502 = vperm.xlu1 %10416, %v8805_v20   ;;  %v8895_v4 = vrot.slane %v14469_v26, %v12163_v51  ;;  %v6099_v25 = vrot.slane %v6077_v53, %v12163_v51  ;;  %v9000_v18 = vrot.slane %v8986_v22, %v12163_v51  ;;  %v8496_v16 = vcombine.low %v14471_v49, %v14470_v54  ;;  %v14474_v26 = vld [vmem:[#allocation22_spill] sm:$0xff] }
 0x57a   : > { %v10154_v6 = vcombine.high %v13800_v2, %v13788_v14  ;;  %v6092_v28 = vrot.slane %v6076_v29, %v12163_v51  ;;  %v6176_v47 = vcombine.high %v6174_v19, %v6174_v19  ;;  %9511 = vperm.xlu0 %10415, %v8952_v15   ;;  %v9050_v61 = vcombine.low %v9042_v23, %v9049_v27 }
 0x57b   : > { %v8903_v11 = vcombine.low %v8895_v4, %v8902_v40  ;;  %v9249_v48 = vcombine.low %v13803_v59, %v13806_v42  ;;  %v6085_v55 = vrot.slane %v6069_v50, %v12163_v51  ;;  %v6175_v24 = vcombine.high %v6167_v37, %v6167_v37  ;;  %v14475_v4 = vld [vmem:[#allocation50_spill] sm:$0xff]  ;;  %v13892_v49 = vpop.permute.xlu1 %9466 }
 0x57c   : > { %v14473_v53 = vcombine.low %v13607_v58, %v14472_v52  ;;  %v9200_v33 = vcombine.low %v6092_v28, %v6106_v13  ;;  %v10153_v62 = vcombine.high %v6092_v28, %v6106_v13  ;;  %v9098_v29 = vrot.slane %v9084_v0, %v12163_v51  ;;  %v14477_v0 = vld [vmem:[#allocation36_spill] sm:$0xff] }
 0x57d   : > { %9508 = vperm.xlu1 %10416, %v8903_v11   ;;  %v9133_v46 = vcombine.low %v9124_v41, %v9131_v7  ;;  %v9198_v57 = vcombine.low %v6085_v55, %v6099_v25  ;;  %v8510_v22 = vrot.slane %v8496_v16, %v12163_v51  ;;  %v8545_v40 = vcombine.low %v14475_v4, %v14474_v26  ;;  %v13878_v41 = vpop.permute.xlu0 %9457  ;;  %v14481_v52 = vld [vmem:[#allocation20_spill] sm:$0xff] }
 0x57e   : > { %v8993_v20 = vrot.slane %v14473_v53, %v12163_v51  ;;  %v9132_v50 = vcombine.low %v13797_v31, %v13811_v56  ;;  %v10152_v15 = vcombine.high %v6085_v55, %v6099_v25  ;;  %v6204_v23 = vrot.slane %v6176_v47, %v12163_v51  ;;  %9517 = vperm.xlu0 %10415, %v9050_v61   ;;  %v14478_v31 = vld [vmem:[#allocation65_spill] sm:$0xff] }
 0x57f   : > { %v14476_v58 = vcombine.low %v13684_v1, %v13687_v36  ;;  %v10155_v7 = vcombine.high %v13803_v59, %v13806_v42  ;;  %v6190_v27 = vrot.slane %v6174_v19, %v12163_v51  ;;  %v14479_v56 = vcombine.low %v14477_v0, %v14478_v31  ;;  %v14487_v0 = vld [vmem:[#allocation26_spill] sm:$0xff] }
 0x580   : > { %v9001_v63 = vcombine.low %v8993_v20, %v9000_v18  ;;  %v9182_v11 = vcombine.low %v13785_v9, %v13791_v30  ;;  %v9222_v18 = vrot.slane %v9200_v33, %v12163_v51  ;;  %v9229_v1 = vrot.slane %v10153_v62, %v12163_v51 }
 0x581   : > { %v9091_v13 = vrot.slane %v14476_v58, %v12163_v51  ;;  %v8503_v25 = vrot.slane %v14479_v56, %v12163_v51  ;;  %v9147_v54 = vrot.slane %v9133_v46, %v12163_v51  ;;  %v9208_v59 = vrot.slane %v9198_v57, %v12163_v51 }
 0x582   : > { %9514 = vperm.xlu1 %10416, %v9001_v63   ;;  %v6197_v42 = vrot.slane %v6175_v24, %v12163_v51  ;;  %v8559_v16 = vrot.slane %v8545_v40, %v12163_v51  ;;  %v9215_v28 = vrot.slane %v10152_v15, %v12163_v51  ;;  %v9298_v47 = vcombine.low %v6190_v27, %v6204_v23  ;;  %v14480_v24 = vld [vmem:[#allocation32_spill] sm:$0xff]  ;;  %v9464_v63 = vpop.permute.xlu0 %9463  ;;  %v9473_v40 = vpop.permute.xlu1 %9472  ;;  %v14483_v15 = vld [vmem:[#allocation21_spill] sm:$0xff] }
 0x583   : > { %v9099_v36 = vcombine.low %v9091_v13, %v9098_v29  ;;  %v8511_v19 = vcombine.low %v8503_v25, %v8510_v22  ;;  %v10157_v9 = vcombine.high %v6190_v27, %v6204_v23  ;;  %v9140_v30 = vrot.slane %v9132_v50, %v12163_v51  ;;  %v14484_v23 = vld [vmem:[#allocation25_spill] sm:$0xff]  ;;  %v14485_v13 = vld [vmem:[#allocation23_spill] sm:$0xff] }
 0x584   : > { %v9257_v61 = vrot.slane %v9247_v12, %v12163_v51  ;;  %v6183_v55 = vrot.slane %v6167_v37, %v12163_v51  ;;  %v14482_v53 = vcombine.low %v14480_v24, %v14481_v52  ;;  %v9196_v33 = vrot.slane %v9182_v11, %v12163_v51  ;;  %v14488_v11 = vld [vmem:[#allocation28_spill] sm:$0xff] }
 0x585   : > { %9520 = vperm.xlu0 %10415, %v9099_v36   ;;  %v9271_v62 = vrot.slane %v9249_v48, %v12163_v51  ;;  %v9278_v29 = vrot.slane %v10155_v7, %v12163_v51  ;;  %v9148_v46 = vcombine.low %v9140_v30, %v9147_v54  ;;  %v9231_v57 = vcombine.low %v9222_v18, %v9229_v1  ;;  %v14486_v7 = vld [vmem:[#allocation27_spill] sm:$0xff]  ;;  %v14489_v36 = vld [vmem:[#allocation30_spill] sm:$0xff] }
 0x586   : > { %9484 = vperm.xlu1 %10416, %v8511_v19   ;;  %v8552_v20 = vrot.slane %v14482_v53, %v12163_v51  ;;  %v9264_v14 = vrot.slane %v10154_v6, %v12163_v51  ;;  %v9296_v2 = vcombine.low %v6183_v55, %v6197_v42  ;;  %v9189_v37 = vrot.slane %v9181_v44, %v12163_v51  ;;  %v9470_v54 = vpop.permute.xlu0 %9469  ;;  %v9476_v30 = vpop.permute.xlu1 %9475 }
 0x587   : > { %v9230_v22 = vcombine.low %v9208_v59, %v9215_v28  ;;  %v10156_v26 = vcombine.high %v6183_v55, %v6197_v42  ;;  %v9320_v4 = vrot.slane %v9298_v47, %v12163_v51  ;;  %v9327_v48 = vrot.slane %v10157_v9, %v12163_v51  ;;  %v14490_v42 = vld [vmem:[#allocation35_spill] sm:$0xff]  ;;  %v14491_v47 = vld [vmem:[#allocation38_spill] sm:$0xff]  ;;  %v14492_v55 = vld [vmem:[#allocation41_spill] sm:$0xff] }
 0x588   : > { %v8560_v12 = vcombine.low %v8552_v20, %v8559_v16  ;;  %v9197_v50 = vcombine.low %v9189_v37, %v9196_v33  ;;  %v9698_v6 = vrot.slane %v13743_v60, %v14483_v15  ;;  %v9707_v58 = vrot.slane %v13779_v45, %v14484_v23  ;;  %v14493_v20 = vld [vmem:[#allocation42_spill] sm:$0xff] }
 0x589   : > { %9523 = vperm.xlu0 %10415, %v9148_v46   ;;  %v9702_v34 = vrot.slane %v13808_v8, %v14485_v13  ;;  %v9245_v39 = vrot.slane %v9231_v57, %v12163_v51  ;;  %v9280_v44 = vcombine.low %v9271_v62, %v9278_v29  ;;  %v9717_v27 = vrot.slane %v13824_v38, %v14486_v7  ;;  %v14494_v29 = vld [vmem:[#allocation43_spill] sm:$0xff] }
 0x58a   : > { %9487 = vperm.xlu1 %10416, %v8560_v12   ;;  %v9712_v31 = vrot.slane %v13849_v21, %v14487_v0  ;;  %v9279_v56 = vcombine.low %v9257_v61, %v9264_v14  ;;  %v9306_v25 = vrot.slane %v9296_v2, %v12163_v51  ;;  %v9722_v45 = vrot.slane %v13878_v41, %v14488_v11 }
 0x58b   : > { %v9703_v60 = vsel %vm1919_vm0, %v9702_v34, %v9698_v6  ;;  %v9313_v18 = vrot.slane %v10156_v26, %v12163_v51  ;;  %v9238_v8 = vrot.slane %v9230_v22, %v12163_v51  ;;  %v9727_v38 = vrot.slane %v13858_v5, %v14489_v36  ;;  %v13959_v26 = vpop.permute.xlu1 %9478 }
 0x58c   : > { %v9708_v1 = vsel %vm1926_vm1, %v9707_v58, %v9703_v60  ;;  %v9329_v21 = vcombine.low %v9320_v4, %v9327_v48  ;;  %v9732_v19 = vrot.slane %v9464_v63, %v14490_v42  ;;  %v9294_v28 = vrot.slane %v9280_v44, %v12163_v51  ;;  %v9398_v48 = vpop.permute.xlu0 %9397 }
 0x58d   : > { %9526 = vperm.xlu0 %10415, %v9197_v50   ;;  %v9713_v59 = vsel %vm1933_vm2, %v9712_v31, %v9708_v1  ;;  %v9246_v16 = vcombine.low %v9238_v8, %v9245_v39  ;;  %v9737_v9 = vrot.slane %v13892_v49, %v14491_v47  ;;  %v9742_v24 = vrot.slane %v9470_v54, %v14492_v55 }
 0x58e   : > { %v9718_v41 = vsel %vm1940_vm3, %v9717_v27, %v9713_v59  ;;  %v9328_v5 = vcombine.low %v9306_v25, %v9313_v18  ;;  %v9287_v52 = vrot.slane %v9279_v56, %v12163_v51  ;;  %v9747_v33 = vrot.slane %v9473_v40, %v14493_v20 }
 0x58f   : > { %v9723_v61 = vsel %vm1947_vm4, %v9722_v45, %v9718_v41  ;;  %v9752_v46 = vrot.slane %v9476_v30, %v14494_v29  ;;  %v9343_v49 = vrot.slane %v9329_v21, %v12163_v51  ;;  %v13961_v4 = vpop.permute.xlu1 %9481  ;;  %v14495_v41 = vld [vmem:[#allocation76_spill] sm:$0xff] }
 0x590   : > { %v9728_v53 = vsel %vm1954_vm5, %v9727_v38, %v9723_v61  ;;  %v9295_v57 = vcombine.low %v9287_v52, %v9294_v28  ;;  %v9336_v2 = vrot.slane %v9328_v5, %v12163_v51  ;;  %v14496_v30 = vld [vmem:[#allocation48_spill] sm:$0xff]  ;;  %v14497_v52 = vld [vmem:[#allocation33_spill] sm:$0xff] }
 0x591   : > { %9529 = vperm.xlu0 %10415, %v9246_v16   ;;  %v9733_v62 = vsel %vm1961_vm6, %v9732_v19, %v9728_v53  ;;  %v9623_v16 = vrot.slane %v9398_v48, %v14485_v13  ;;  %v9540_v61 = vrot.slane %v14496_v30, %v14483_v15  ;;  %v9549_v53 = vrot.slane %v14497_v52, %v14484_v23  ;;  %v14499_v48 = vld [vmem:[#allocation37_spill] sm:$0xff] }
 0x592   : > { %v9738_v63 = vsel %vm1968_vm7, %v9737_v9, %v9733_v62  ;;  %v9344_v22 = vcombine.low %v9336_v2, %v9343_v49  ;;  %v9404_v50 = vpop.permute.xlu0 %9403  ;;  %v9544_v9 = vrot.slane %v14495_v41, %v14485_v13  ;;  %v14498_v49 = vld [vmem:[#allocation53_spill] sm:$0xff] }
 0x593   : > { %v9743_v14 = vsel %vm1975_vm8, %v9742_v24, %v9738_v63  ;;  %v9395_v40 = vpop.permute.xlu1 %9394  ;;  %v9633_v5 = vrot.slane %v9404_v50, %v14487_v0  ;;  %v9554_v63 = vrot.slane %v14498_v49, %v14487_v0 }
 0x594   : > { %v9748_v12 = vsel %vm1982_vm9, %v9747_v33, %v9743_v14  ;;  %v9619_v19 = vrot.slane %v9395_v40, %v14483_v15  ;;  %v9545_v14 = vsel %vm1919_vm0, %v9544_v9, %v9540_v61  ;;  %v9559_v40 = vrot.slane %v14499_v48, %v14486_v7 }
 0x595   : > { %9532 = vperm.xlu0 %10415, %v9295_v57   ;;  %v13957_v37 = vsel %vm1989_vm10, %v9752_v46, %v9748_v12 }
 0x596   : > { %v9624_v24 = vsel %vm1919_vm0, %v9623_v16, %v9619_v19  ;;  %v14500_v16 = vld [vmem:[#allocation56_spill] sm:$0xff] }
 0x597   : > { %v9401_v6 = vpop.permute.xlu1 %9400 }
 0x598   : > { %v9628_v28 = vrot.slane %v9401_v6, %v14484_v23 }
 0x599   : > { %9535 = vperm.xlu0 %10415, %v9344_v22   ;;  %v9550_v22 = vsel %vm1926_vm1, %v9549_v53, %v9545_v14 }
 0x59a   : > { %v9629_v33 = vsel %vm1926_vm1, %v9628_v28, %v9624_v24  ;;  %v9555_v19 = vsel %vm1933_vm2, %v9554_v63, %v9550_v22  ;;  %v9564_v28 = vrot.slane %v14500_v16, %v14488_v11  ;;  %v14503_v63 = vld [vmem:[#allocation59_spill] sm:$0xff] }
 0x59b   : > { %v9634_v2 = vsel %vm1933_vm2, %v9633_v5, %v9629_v33  ;;  %v9560_v52 = vsel %vm1940_vm3, %v9559_v40, %v9555_v19  ;;  %v9579_v14 = vrot.slane %v14503_v63, %v14491_v47  ;;  %v14504_v19 = vld [vmem:[#allocation61_spill] sm:$0xff] }
 0x59c   : > { %v9589_v16 = vrot.slane %v14504_v19, %v14493_v20 }
 0x59d   : > { %v9410_v58 = vpop.permute.xlu0 %9409 }
 0x59e   : > { %v9407_v34 = vpop.permute.xlu1 %9406  ;;  %v9643_v12 = vrot.slane %v9410_v58, %v14488_v11 }
 0x59f   : > { %v9638_v62 = vrot.slane %v9407_v34, %v14486_v7 }
 0x5a1   : > { %v9639_v50 = vsel %vm1940_vm3, %v9638_v62, %v9634_v2 }
 0x5a2   : > { %v9644_v61 = vsel %vm1947_vm4, %v9643_v12, %v9639_v50 }
 0x5aa   : > { %v9416_v39 = vpop.permute.xlu0 %9415 }
 0x5ab   : > { %v9653_v24 = vrot.slane %v9416_v39, %v14490_v42 }
 0x5ad   : > { %v9413_v44 = vpop.permute.xlu1 %9412 }
 0x5ae   : > { %v9648_v6 = vrot.slane %v9413_v44, %v14489_v36  ;;  %v14501_v44 = vld [vmem:[#allocation57_spill] sm:$0xff] }
 0x5af   : > { %v9569_v5 = vrot.slane %v14501_v44, %v14489_v36 }
 0x5b0   : > { %v9649_v53 = vsel %vm1954_vm5, %v9648_v6, %v9644_v61 }
 0x5b1   : > { %v9654_v49 = vsel %vm1961_vm6, %v9653_v24, %v9649_v53 }
 0x5b6   : > { %v13963_v27 = vpop.permute.xlu0 %9421 }
 0x5bb   : > { %v9419_v31 = vpop.permute.xlu1 %9418 }
 0x5bc   : > { %v9658_v33 = vrot.slane %v9419_v31, %v14491_v47  ;;  %v9663_v31 = vrot.slane %v13963_v27, %v14492_v55 }
 0x5be   : > { %v9659_v12 = vsel %vm1968_vm7, %v9658_v33, %v9654_v49  ;;  %v14507_v33 = vld [vmem:[#allocation47_spill] sm:$0xff] }
 0x5bf   : > { %v13965_v56 = vpop.permute.xlu0 %9427  ;;  %v9664_v6 = vsel %vm1975_vm8, %v9663_v31, %v9659_v12 }
 0x5c0   : > { %v13967_v25 = vpop.permute.xlu1 %9424 }
 0x5c1   : > { %v9668_v22 = vrot.slane %v13967_v25, %v14493_v20  ;;  %v9673_v25 = vrot.slane %v13965_v56, %v14494_v29 }
 0x5cd   : > { %v13969_v60 = vpop.permute.xlu0 %9433 }
 0x5cf   : > { %v13971_v45 = vpop.permute.xlu1 %9430 }
 0x5dc   : > { %v13973_v18 = vpop.permute.xlu0 %9439 }
 0x5de   : > { %v13975_v8 = vpop.permute.xlu1 %9436 }
 0x5e7   : > { %v9494_v1 = vpop.permute.xlu0 %9493 }
 0x5e8   : > { %v9781_v58 = vrot.slane %v9494_v1, %v14485_v13 }
 0x5e9   : > { %v9491_v38 = vpop.permute.xlu1 %9490 }
 0x5ea   : > { %v9777_v41 = vrot.slane %v9491_v38, %v14483_v15  ;;  %v9565_v15 = vsel %vm1947_vm4, %v9564_v28, %v9560_v52 }
 0x5eb   : > { %v9570_v2 = vsel %vm1954_vm5, %v9569_v5, %v9565_v15  ;;  %v14506_v5 = vld [vmem:[#allocation46_spill] sm:$0xff] }
 0x5ec   : > { %v9782_v1 = vsel %vm1919_vm0, %v9781_v58, %v9777_v41  ;;  %v14505_v41 = vld [vmem:[#allocation44_spill] sm:$0xff]  ;;  %v9762_v31 = vrot.slane %v13961_v4, %v14506_v5 }
 0x5ed   : > { %v9500_v54 = vpop.permute.xlu0 %9499  ;;  %v9678_v58 = vrot.slane %v13971_v45, %v14505_v41  ;;  %v9683_v45 = vrot.slane %v13969_v60, %v14506_v5  ;;  %v9599_v52 = vrot.slane %v13674_v35, %v14505_v41  ;;  %v9609_v35 = vrot.slane %v13704_v10, %v14507_v33 }
 0x5ee   : > { %v9497_v21 = vpop.permute.xlu1 %9496  ;;  %v9791_v39 = vrot.slane %v9500_v54, %v14487_v0  ;;  %v9757_v10 = vrot.slane %v13959_v26, %v14505_v41 }
 0x5ef   : > { %v9786_v9 = vrot.slane %v9497_v21, %v14484_v23  ;;  %v14502_v23 = vld [vmem:[#allocation62_spill] sm:$0xff] }
 0x5f0   : > { %v9574_v13 = vrot.slane %v14502_v23, %v14490_v42  ;;  %v9758_v4 = vsel %vm1996_vm11, %v9757_v10, %v13957_v37 }
 0x5f1   : > { %v13977_v59 = vpop.permute.xlu0 %9505  ;;  %v9787_v38 = vsel %vm1926_vm1, %v9786_v9, %v9782_v1 }
 0x5f2   : > { %v9575_v48 = vsel %vm1961_vm6, %v9574_v13, %v9570_v2  ;;  %v9801_v27 = vrot.slane %v13977_v59, %v14488_v11 }
 0x5f3   : > { %v9580_v28 = vsel %vm1968_vm7, %v9579_v14, %v9575_v48 }
 0x5f8   : > { %v9503_v46 = vpop.permute.xlu1 %9502 }
 0x5f9   : > { %v13992_v57 = vpop.permute.xlu0 %9511  ;;  %v9796_v21 = vrot.slane %v9503_v46, %v14486_v7  ;;  %v9584_v7 = vrot.slane %v13657_v43, %v14492_v55  ;;  %v9792_v46 = vsel %vm1933_vm2, %v9791_v39, %v9787_v38  ;;  %v9669_v43 = vsel %vm1982_vm9, %v9668_v22, %v9664_v6 }
 0x5fa   : > { %v9811_v56 = vrot.slane %v13992_v57, %v14490_v42  ;;  %v9674_v44 = vsel %vm1989_vm10, %v9673_v25, %v9669_v43  ;;  %v9688_v42 = vrot.slane %v13975_v8, %v14507_v33  ;;  %v14508_v8 = vld [vmem:[#allocation54_spill] sm:$0xff] }
 0x5fb   : > { %v9797_v40 = vsel %vm1940_vm3, %v9796_v21, %v9792_v46  ;;  %v9585_v59 = vsel %vm1975_vm8, %v9584_v7, %v9580_v28  ;;  %v9679_v53 = vsel %vm1996_vm11, %v9678_v58, %v9674_v44  ;;  %v9614_v39 = vrot.slane %v13764_v3, %v14508_v8 }
 0x5fc   : > { %v9509_v30 = vpop.permute.xlu1 %9508  ;;  %v9802_v9 = vsel %vm1947_vm4, %v9801_v27, %v9797_v40  ;;  %v9684_v38 = vsel %vm2003_vm12, %v9683_v45, %v9679_v53  ;;  %v9763_v46 = vsel %vm2003_vm12, %v9762_v31, %v9758_v4  ;;  %v14509_v58 = vlaneseq }
 0x5fd   : > { %v14004_v34 = vpop.permute.xlu0 %9517  ;;  %v9806_v50 = vrot.slane %v9509_v30, %v14489_v36  ;;  %v9594_v36 = vrot.slane %v13692_v17, %v14494_v29  ;;  %v9590_v17 = vsel %vm1982_vm9, %v9589_v16, %v9585_v59 }
 0x5fe   : > { %v9821_v60 = vrot.slane %v14004_v34, %v14492_v55  ;;  %v9689_v34 = vsel %vm2010_vm13, %v9688_v42, %v9684_v38  ;;  %vm9880_vm0 = vcmp.lt.s32.totalorder %v14509_v58, 512 }
 0x5ff   : > { %v9807_v30 = vsel %vm1954_vm5, %v9806_v50, %v9802_v9  ;;  %v9595_v15 = vsel %vm1989_vm10, %v9594_v36, %v9590_v17 }
 0x600   : > { %v9812_v23 = vsel %vm1961_vm6, %v9811_v56, %v9807_v30  ;;  %v9600_v55 = vsel %vm1996_vm11, %v9599_v52, %v9595_v15 }
 0x601   : > { %v9515_v0 = vpop.permute.xlu1 %9514 }
 0x602   : > { %v9816_v61 = vrot.slane %v9515_v0, %v14491_v47  ;;  %v9604_v47 = vrot.slane %v13734_v32, %v14506_v5  ;;  %v9693_v32 = vrot.slane %v13973_v18, %v14508_v8 }
 0x604   : > { %v14019_v62 = vpop.permute.xlu0 %9520  ;;  %v9817_v13 = vsel %vm1968_vm7, %v9816_v61, %v9812_v23  ;;  %v9605_v3 = vsel %vm2003_vm12, %v9604_v47, %v9600_v55  ;;  %v9694_v2 = vsel %vm2017_vm14, %v9693_v32, %v9689_v34 }
 0x605   : > { %v9485_v24 = vpop.permute.xlu1 %9484  ;;  %v9826_v1 = vrot.slane %v14019_v62, %v14493_v20  ;;  %v9822_v18 = vsel %vm1975_vm8, %v9821_v60, %v9817_v13  ;;  %v9610_v0 = vsel %vm2010_vm13, %v9609_v35, %v9605_v3 }
 0x606   : > { %v9767_v63 = vrot.slane %v9485_v24, %v14507_v33  ;;  %v9615_v7 = vsel %vm2017_vm14, %v9614_v39, %v9610_v0 }
 0x607   : > { %v9827_v26 = vsel %vm1982_vm9, %v9826_v1, %v9822_v18  ;;  %v9853_v50 = vcombine.low %v9615_v7, %v9694_v2 }
 0x608   : > { %v9524_v54 = vpop.permute.xlu0 %9523  ;;  %v9768_v6 = vsel %vm2010_vm13, %v9767_v63, %v9763_v46 }
 0x609   : > { %v9831_v21 = vrot.slane %v9524_v54, %v14494_v29  ;;  %v9488_v49 = vpop.permute.xlu1 %9487  ;;  %v9861_v28 = vrot.slane %v9853_v50, %v12163_v51 }
 0x60a   : > { %v9772_v12 = vrot.slane %v9488_v49, %v14508_v8 }
 0x60b   : > { %v9832_v22 = vsel %vm1989_vm10, %v9831_v21, %v9827_v26 }
 0x60c   : > { %v9527_v11 = vpop.permute.xlu0 %9526  ;;  %v9773_v37 = vsel %vm2017_vm14, %v9772_v12, %v9768_v6 }
 0x60d   : > { %v9836_v20 = vrot.slane %v9527_v11, %v14505_v41 }
 0x60f   : > { %v9837_v54 = vsel %vm1996_vm11, %v9836_v20, %v9832_v22 }
 0x610   : > { %v9530_v57 = vpop.permute.xlu0 %9529 }
 0x611   : > { %v9841_v29 = vrot.slane %v9530_v57, %v14506_v5 }
 0x613   : > { %v9842_v27 = vsel %vm2003_vm12, %v9841_v29, %v9837_v54 }
 0x614   : > { %v9533_v62 = vpop.permute.xlu0 %9532 }
 0x615   : > { %v9846_v14 = vrot.slane %v9533_v62, %v14507_v33 }
 0x617   : > { %v9847_v25 = vsel %vm2010_vm13, %v9846_v14, %v9842_v27 }
 0x618   : > { %v9536_v48 = vpop.permute.xlu0 %9535 }
 0x619   : > { %v9851_v40 = vrot.slane %v9536_v48, %v14508_v8 }
 0x61b   : > { %v9852_v19 = vsel %vm2017_vm14, %v9851_v40, %v9847_v25 }
 0x61c   : > { %v9854_v16 = vcombine.low %v9773_v37, %v9852_v19 }
 0x61e   : > { %v9868_v43 = vrot.slane %v9854_v16, %v12163_v51 }
 0x620   : > { %v9869_v41 = vcombine.low %v9861_v28, %v9868_v43 }
 0x622   : > { %v9876_v11 = vrot.slane %v9869_v41, %v12163_v51 }
 0x624   : > { %9882 = vst.msk [vmem:[%s298_s16] sm:$0xf] %vm9880_vm0, %v9876_v11 }
 0x625   : > { %10560 = shalt.err (!%p10557_p5)
}
 0x626   : > { %s10561_s12 = scalar_lea.hbm %s14125_s28, 64  ;;  %s10565_s8 = scalar_lea.hbm %s14179_s5, 128 }
 0x627   : > { %p10562_p10 = scmp.ne.s32.totalorder %s14125_s28, %s10561_s12  ;;  %p10566_p3 = scmp.lt.u32.totalorder %s14125_s28, %s14179_s5 }
 0x628   : > { %p10567_p7 = scmp.lt.u32.totalorder %s10565_s8, %s10561_s12  ;;  %p10569_p12 = scmp.lt.u32.totalorder %s10561_s12, %s14125_s28 }
 0x629   : > { %p10563_p13 = pnand %p10562_p10, %p10825_p2 }
 0x62a   : > { %p10568_p11 = por %p10567_p7, %p10566_p3 }
 0x62b   : > { %p10564_p9 = pneg %p10563_p13 }
 0x62c   : > { %p10570_p1 = por %p10569_p12, %p10568_p11 }
 0x62e   : > { %p10571_p4 = pnand %p10570_p1, %p10564_p9 }
 0x630   : > { %10574 = shalt.err (!%p10571_p4)
}
 0x631   : > { %10329 = dma.vmem_to_hbm [thread:$0]  (%p10825_p2), %s14127_s17, 64, %s14125_s28, %s9884_s30  }
 0x632 PF: > { %s9910_s13 = sand.u32 1, %s10617_s18   ;;  %p14510_p6 = scmp.ne.s32.totalorder %s14275_s29, 0 }
 0x633   : > { %p14511_p8 = scmp.ge.s32.totalorder %s10637_s23, 2  ;;  %s9911_s16 = scalar_lea.sflag [#allocation5], %s9910_s13 }
 0x635   : > { %p10346_p0 = pnand %p14511_p8, %p14510_p6 }
 0x637   : > { %10612 = dma.done.wait (!%p10346_p0), %s9911_s16, 64  }
 0x638   : > { %10614 = vsyncadd (!%p10346_p0), %s9911_s16, 4294967232  ;;  %s23_s23 = sadd.s32 1, %s10637_s23   ;;  %s14512_s18 = smov %s10621_s19 }
 0x639   : > { %p20_p5 = scmp.ge.s32.totalorder %s23_s23, 4   ;;  %s14513_s19 = smov %s10625_s20 }
 0x63a   : > { %s14514_s20 = smov %s10837_s25  ;;  %s14515_s21 = smov %s10633_s22 }
 0x63b   : > { %s14516_s22 = smov %s14518_s24  ;;  %22 = sbr.rel (!%p20_p5) target bundleno = 10 (0xa), region = 105 }
 0x642   :  { %9916 = vsyncpa [#allocation4], 1 }
 0x643   :  { %9918 = vsyncpa [#allocation4 + $0x1], 1 }
 0x644   :  { %9919 = vsyncpa [#allocation7], 1 }
 0x645   :  { %9920 = vsyncpa [#allocation10], 1 }
 0x646   :  { %9921 = vsyncpa [#allocation5], 1 }
 0x647   :  { %9923 = vsyncpa [#allocation5 + $0x1], 1 }

</bundles_post_ra>
